<compile_context>
chip_gen: v6e
topology: v6e:2x2x1
jax: 0.10.0
libtpu: 0.0.40
codegen_flags: <defaults>
</compile_context>

<pallas_src>
import jax
import jax.numpy as jnp
from jax.experimental import pallas as pl
from jax.experimental.pallas import tpu as pltpu

IMG_CHANNELS = 1
IMG_SIZE = 28
Z_DIM = 100
HIDDENS = (256, 512, 1024)
OUT_DIM = IMG_SIZE * IMG_SIZE      # 784

Z_PAD = 128                        # lane-aligned K for the first matmul
OUT_PAD = 896                      # 7 * 128, lane-dense output block
_VMEM_LIMIT = 48 << 20


def _round_up(x, m):
    return ((x + m - 1) // m) * m


def _row_tile_index(i):            # batch-tiled arrays
    return (i, 0)


def _const_index(i):               # VMEM-resident weights/biases (never re-DMA'd)
    return (0, 0)


def _mlp(h, w1, b1, w2, b2, w3, b3, w4, b4):
    """Shared 4-layer MLP: bf16 operands, f32 MXU accumulation, bf16 bias/ReLU."""
    a = jnp.dot(h, w1, preferred_element_type=jnp.float32).astype(jnp.bfloat16)
    h = jnp.maximum(a + b1, 0)
    a = jnp.dot(h, w2, preferred_element_type=jnp.float32).astype(jnp.bfloat16)
    h = jnp.maximum(a + b2, 0)
    a = jnp.dot(h, w3, preferred_element_type=jnp.float32).astype(jnp.bfloat16)
    h = jnp.maximum(a + b3, 0)
    y = jnp.dot(h, w4, preferred_element_type=jnp.float32).astype(jnp.bfloat16)
    return y + b4


def _generator_kernel_resident(z_ref, w1_ref, b1_ref, w2_ref, b2_ref,
                               w3_ref, b3_ref, w4_ref, b4_ref, out_ref):
    """Multi-tile path: all weights VMEM-resident via constant-index BlockSpecs."""
    out_ref[...] = _mlp(z_ref[...],
                        w1_ref[...], b1_ref[...],
                        w2_ref[...], b2_ref[...],
                        w3_ref[...], b3_ref[...],
                        w4_ref[...], b4_ref[...]).astype(out_ref.dtype)


def _generator_kernel_overlap(z_ref, w1_ref, b1_ref, w2_ref, b2_ref,
                              w3_hbm, b3_ref, w4_hbm, b4_ref,
                              out_ref, w3_buf, w4_buf, dma_sems):
    """Single-tile path: overlap the big-weight DMA (w3/w4) with layer-1/2 compute."""
    cp3 = pltpu.make_async_copy(w3_hbm, w3_buf, dma_sems.at[0])
    cp4 = pltpu.make_async_copy(w4_hbm, w4_buf, dma_sems.at[1])
    cp3.start()
    cp4.start()

    h = z_ref[...]
    a = jnp.dot(h, w1_ref[...], preferred_element_type=jnp.float32).astype(jnp.bfloat16)
    h = jnp.maximum(a + b1_ref[...], 0)
    a = jnp.dot(h, w2_ref[...], preferred_element_type=jnp.float32).astype(jnp.bfloat16)
    h = jnp.maximum(a + b2_ref[...], 0)

    cp3.wait()
    a = jnp.dot(h, w3_buf[...], preferred_element_type=jnp.float32).astype(jnp.bfloat16)
    h = jnp.maximum(a + b3_ref[...], 0)

    cp4.wait()
    y = jnp.dot(h, w4_buf[...], preferred_element_type=jnp.float32).astype(jnp.bfloat16)
    out_ref[...] = (y + b4_ref[...]).astype(out_ref.dtype)


def init_generator_params(key, dtype=jnp.float32):
    """PyTorch-like Linear params, stored as (in_features, out_features)."""
    dims = (Z_DIM,) + HIDDENS + (OUT_DIM,)
    params = []
    for i in range(len(dims) - 1):
        fan_in, fan_out = dims[i], dims[i + 1]
        key, wk, bk = jax.random.split(key, 3)
        bound = 1.0 / float(fan_in) ** 0.5
        w = jax.random.uniform(wk, (fan_in, fan_out), dtype, -bound, bound)
        b = jax.random.uniform(bk, (1, fan_out), dtype, -bound, bound)
        params.append((w, b))
    return params


def prepare_generator_params(params):
    """Zero-pad to lane-aligned shapes; weights and biases in bf16."""
    n = len(params)
    prepared = []
    for idx, (w, b) in enumerate(params):
        fan_in, fan_out = w.shape
        in_pad = Z_PAD if idx == 0 else fan_in
        out_pad = OUT_PAD if idx == n - 1 else fan_out
        w_p = jnp.zeros((in_pad, out_pad), jnp.bfloat16)
        w_p = w_p.at[:fan_in, :fan_out].set(w.astype(jnp.bfloat16))
        b_p = jnp.zeros((1, out_pad), jnp.bfloat16)
        b_p = b_p.at[:, :fan_out].set(b.astype(jnp.bfloat16))
        prepared.append((w_p, b_p))
    return prepared


def _build_weight_specs(prepared, single_buffer):
    specs = []
    for w, b in prepared:
        if single_buffer:
            # Constant index_map -> never re-DMA'd; single-buffering frees ~3 MiB VMEM.
            specs.append(pl.BlockSpec(w.shape, _const_index, pipeline_mode=pl.Buffered(1)))
            specs.append(pl.BlockSpec(b.shape, _const_index, pipeline_mode=pl.Buffered(1)))
        else:
            specs.append(pl.BlockSpec(w.shape, _const_index))
            specs.append(pl.BlockSpec(b.shape, _const_index))
    return specs


def _forward_multi_tile(z_p, prepared, tm, n_tiles):
    b_pad = z_p.shape[0]
    flat_args = [z_p]
    for w, b in prepared:
        flat_args.extend([w, b])
    z_spec = pl.BlockSpec((tm, Z_PAD), _row_tile_index)
    out_spec = pl.BlockSpec((tm, OUT_PAD), _row_tile_index)

    last_err = None
    for single_buffer in (True, False):   # fall back if pipeline_mode unsupported
        try:
            in_specs = [z_spec] + _build_weight_specs(prepared, single_buffer)
            return pl.pallas_call(
                _generator_kernel_resident,
                out_shape=jax.ShapeDtypeStruct((b_pad, OUT_PAD), jnp.bfloat16),
                grid=(n_tiles,),
                in_specs=in_specs,
                out_specs=out_spec,
                compiler_params=pltpu.CompilerParams(
                    dimension_semantics=("parallel",),
                    vmem_limit_bytes=_VMEM_LIMIT),
            )(*flat_args)
        except Exception as err:  # noqa: BLE001 - retry without pipeline_mode
            last_err = err
    raise last_err


def _forward_single_tile(z_p, prepared, tm):
    b_pad = z_p.shape[0]
    (w1, b1), (w2, b2), (w3, b3), (w4, b4) = prepared
    in_specs = [
        pl.BlockSpec((tm, Z_PAD), _row_tile_index),
        pl.BlockSpec(w1.shape, _const_index), pl.BlockSpec(b1.shape, _const_index),
        pl.BlockSpec(w2.shape, _const_index), pl.BlockSpec(b2.shape, _const_index),
        pl.BlockSpec(memory_space=pl.ANY),    pl.BlockSpec(b3.shape, _const_index),
        pl.BlockSpec(memory_space=pl.ANY),    pl.BlockSpec(b4.shape, _const_index),
    ]
    return pl.pallas_call(
        _generator_kernel_overlap,
        out_shape=jax.ShapeDtypeStruct((b_pad, OUT_PAD), jnp.bfloat16),
        grid=(1,),
        in_specs=in_specs,
        out_specs=pl.BlockSpec((tm, OUT_PAD), _row_tile_index),
        scratch_shapes=[
            pltpu.VMEM(w3.shape, jnp.bfloat16),
            pltpu.VMEM(w4.shape, jnp.bfloat16),
            pltpu.SemaphoreType.DMA((2,)),
        ],
        compiler_params=pltpu.CompilerParams(
            dimension_semantics=("arbitrary",),
            vmem_limit_bytes=_VMEM_LIMIT),
    )(z_p, w1, b1, w2, b2, w3, b3, w4, b4)


def generator_forward(z, prepared_params, *, block_m=512, min_grid_steps=1):
    """z: (B, Z_DIM) float32 -> (B, 1, 28, 28) float32.

    block_m: max batch-tile rows (512 default; v5e/v6e can use 1024).
    min_grid_steps: pass 2 on v7x so both TensorCores get a grid step
                    (only applied when B is large enough to split).
    """
    B = z.shape[0]
    n_tiles = pl.cdiv(B, block_m)
    n_tiles = max(n_tiles, min(min_grid_steps, pl.cdiv(B, 16)))
    tm = _round_up(pl.cdiv(B, n_tiles), 16)       # even tiling, bf16-sublane aligned
    b_pad = tm * n_tiles

    z_p = jnp.zeros((b_pad, Z_PAD), jnp.bfloat16)
    z_p = z_p.at[:B, :Z_DIM].set(z.astype(jnp.bfloat16))

    if n_tiles == 1:
        flat = _forward_single_tile(z_p, prepared_params, tm)
    else:
        flat = _forward_multi_tile(z_p, prepared_params, tm, n_tiles)

    return (flat[:B, :OUT_DIM].astype(jnp.float32)
            .reshape(B, IMG_CHANNELS, IMG_SIZE, IMG_SIZE))


def _reference_forward(z, prepared_params):
    """Pure-JAX mirror of the kernel's bf16-compute / f32-accumulate pipeline."""
    B = z.shape[0]
    h = jnp.zeros((B, Z_PAD), jnp.bfloat16).at[:, :Z_DIM].set(z.astype(jnp.bfloat16))
    flat = []
    for w, b in prepared_params:
        flat.extend([w, b])
    y = _mlp(h, *flat)
    return (y[:, :OUT_DIM].astype(jnp.float32)
            .reshape(B, IMG_CHANNELS, IMG_SIZE, IMG_SIZE))


if __name__ == "__main__":
    key = jax.random.PRNGKey(0)
    pkey, zkey = jax.random.split(key)

    params = init_generator_params(pkey)
    prepared = prepare_generator_params(params)

    # Small batch -> single-tile path (w3/w4 DMA overlapped with compute).
    B = 2
    z = jax.random.normal(zkey, (B, Z_DIM), dtype=jnp.float32)
    out = jax.block_until_ready(generator_forward(z, prepared))
    assert out.shape == (B, IMG_CHANNELS, IMG_SIZE, IMG_SIZE), out.shape
    assert out.dtype == jnp.float32, out.dtype
    ref = _reference_forward(z, prepared)
    assert jnp.allclose(out, ref, atol=2e-2, rtol=2e-2), "mismatch (single-tile path)"

    # Larger batch with a tiny block_m -> exercises the multi-tile pipelined path.
    B2 = 40
    z2 = jax.random.normal(jax.random.fold_in(zkey, 1), (B2, Z_DIM), dtype=jnp.float32)
    out2 = jax.block_until_ready(generator_forward(z2, prepared, block_m=16))
    assert out2.shape == (B2, IMG_CHANNELS, IMG_SIZE, IMG_SIZE), out2.shape
    ref2 = _reference_forward(z2, prepared)
    assert jnp.allclose(out2, ref2, atol=2e-2, rtol=2e-2), "mismatch (multi-tile path)"

    print("KERNEL_OK")
</pallas_src>

<mosaic_0001>
module attributes {stable_mosaic.version = 11 : i64} {
  func.func @_generator_kernel_overlap(%arg0: i32, %arg1: memref<16x128xbf16, #tpu.memory_space<vmem>>, %arg2: memref<128x256xbf16, #tpu.memory_space<vmem>>, %arg3: memref<1x256xbf16, #tpu.memory_space<vmem>>, %arg4: memref<256x512xbf16, #tpu.memory_space<vmem>>, %arg5: memref<1x512xbf16, #tpu.memory_space<vmem>>, %arg6: memref<512x1024xbf16, #tpu.memory_space<any>>, %arg7: memref<1x1024xbf16, #tpu.memory_space<vmem>>, %arg8: memref<1024x896xbf16, #tpu.memory_space<any>>, %arg9: memref<1x896xbf16, #tpu.memory_space<vmem>>, %arg10: memref<16x896xbf16, #tpu.memory_space<vmem>>, %arg11: memref<512x1024xbf16, #tpu.memory_space<vmem>>, %arg12: memref<1024x896xbf16, #tpu.memory_space<vmem>>, %arg13: memref<2x!tpu.dma_semaphore, #tpu.memory_space<semaphore_mem>>) attributes {dimension_semantics = [#tpu.dimension_semantics<arbitrary>], iteration_bounds = array<i64: 1>, scalar_prefetch = 0 : i64, scratch_operands = 3 : i64, tpu.core_type = #tpu.core_type<tc>, window_params = [{transform_indices = @transform_0, window_bounds = array<i64: 16, 128>}, {pipeline_mode = #tpu.pipeline_mode<synchronous>, transform_indices = @transform_1, window_bounds = array<i64: 128, 256>}, {pipeline_mode = #tpu.pipeline_mode<synchronous>, transform_indices = @transform_2, window_bounds = array<i64: 1, 256>}, {pipeline_mode = #tpu.pipeline_mode<synchronous>, transform_indices = @transform_3, window_bounds = array<i64: 256, 512>}, {pipeline_mode = #tpu.pipeline_mode<synchronous>, transform_indices = @transform_4, window_bounds = array<i64: 1, 512>}, {}, {pipeline_mode = #tpu.pipeline_mode<synchronous>, transform_indices = @transform_6, window_bounds = array<i64: 1, 1024>}, {}, {pipeline_mode = #tpu.pipeline_mode<synchronous>, transform_indices = @transform_8, window_bounds = array<i64: 1, 896>}, {transform_indices = @transform_9, window_bounds = array<i64: 16, 896>}]} {
    %c0_i32 = arith.constant 0 : i32
    %0 = tpu.memref_slice %arg13[%c0_i32] : memref<2x!tpu.dma_semaphore, #tpu.memory_space<semaphore_mem>> -> memref<1x!tpu.dma_semaphore, #tpu.memory_space<semaphore_mem>>
    %1 = tpu.memref_squeeze %0 : memref<1x!tpu.dma_semaphore, #tpu.memory_space<semaphore_mem>> -> memref<!tpu.dma_semaphore, #tpu.memory_space<semaphore_mem>>
    tpu.enqueue_dma source(%arg6 : memref<512x1024xbf16, #tpu.memory_space<any>>) target(%arg11 : memref<512x1024xbf16, #tpu.memory_space<vmem>>) target_semaphore(%1 : memref<!tpu.dma_semaphore, #tpu.memory_space<semaphore_mem>>)
    %c1_i32 = arith.constant 1 : i32
    %2 = tpu.memref_slice %arg13[%c1_i32] : memref<2x!tpu.dma_semaphore, #tpu.memory_space<semaphore_mem>> -> memref<1x!tpu.dma_semaphore, #tpu.memory_space<semaphore_mem>>
    %3 = tpu.memref_squeeze %2 : memref<1x!tpu.dma_semaphore, #tpu.memory_space<semaphore_mem>> -> memref<!tpu.dma_semaphore, #tpu.memory_space<semaphore_mem>>
    tpu.enqueue_dma source(%arg8 : memref<1024x896xbf16, #tpu.memory_space<any>>) target(%arg12 : memref<1024x896xbf16, #tpu.memory_space<vmem>>) target_semaphore(%3 : memref<!tpu.dma_semaphore, #tpu.memory_space<semaphore_mem>>)
    %c0 = arith.constant 0 : index
    %c0_0 = arith.constant 0 : index
    %4 = vector.load %arg1[%c0, %c0_0] : memref<16x128xbf16, #tpu.memory_space<vmem>>, vector<16x128xbf16>
    %c0_1 = arith.constant 0 : index
    %c0_2 = arith.constant 0 : index
    %5 = vector.load %arg2[%c0_1, %c0_2] : memref<128x256xbf16, #tpu.memory_space<vmem>>, vector<128x256xbf16>
    %cst = arith.constant dense<0.000000e+00> : vector<16x256xf32>
    %6 = tpu.matmul %4, %5, %cst {dimension_numbers = #tpu.dot_dimension_numbers<[1], [0], [0], [1], [0, 0, 1, 1], [], []>} : vector<16x128xbf16>, vector<128x256xbf16>, vector<16x256xf32> -> vector<16x256xf32>
    %7 = arith.truncf %6 : vector<16x256xf32> to vector<16x256xbf16>
    %c0_3 = arith.constant 0 : index
    %c0_4 = arith.constant 0 : index
    %8 = vector.load %arg3[%c0_3, %c0_4] : memref<1x256xbf16, #tpu.memory_space<vmem>>, vector<1x256xbf16>
    %9 = vector.broadcast %8 : vector<1x256xbf16> to vector<16x256xbf16>
    %10 = arith.addf %7, %9 : vector<16x256xbf16>
    %cst_5 = arith.constant 0.000000e+00 : bf16
    %11 = vector.broadcast %cst_5 : bf16 to vector<16x256xbf16>
    %12 = arith.maximumf %10, %11 : vector<16x256xbf16>
    %c0_6 = arith.constant 0 : index
    %c0_7 = arith.constant 0 : index
    %13 = vector.load %arg4[%c0_6, %c0_7] : memref<256x512xbf16, #tpu.memory_space<vmem>>, vector<256x512xbf16>
    %cst_8 = arith.constant dense<0.000000e+00> : vector<16x512xf32>
    %14 = tpu.matmul %12, %13, %cst_8 {dimension_numbers = #tpu.dot_dimension_numbers<[1], [0], [0], [1], [0, 0, 1, 1], [], []>} : vector<16x256xbf16>, vector<256x512xbf16>, vector<16x512xf32> -> vector<16x512xf32>
    %15 = arith.truncf %14 : vector<16x512xf32> to vector<16x512xbf16>
    %c0_9 = arith.constant 0 : index
    %c0_10 = arith.constant 0 : index
    %16 = vector.load %arg5[%c0_9, %c0_10] : memref<1x512xbf16, #tpu.memory_space<vmem>>, vector<1x512xbf16>
    %17 = vector.broadcast %16 : vector<1x512xbf16> to vector<16x512xbf16>
    %18 = arith.addf %15, %17 : vector<16x512xbf16>
    %cst_11 = arith.constant 0.000000e+00 : bf16
    %19 = vector.broadcast %cst_11 : bf16 to vector<16x512xbf16>
    %20 = arith.maximumf %18, %19 : vector<16x512xbf16>
    %c0_i32_12 = arith.constant 0 : i32
    %21 = tpu.memref_slice %arg13[%c0_i32_12] : memref<2x!tpu.dma_semaphore, #tpu.memory_space<semaphore_mem>> -> memref<1x!tpu.dma_semaphore, #tpu.memory_space<semaphore_mem>>
    %22 = tpu.memref_squeeze %21 : memref<1x!tpu.dma_semaphore, #tpu.memory_space<semaphore_mem>> -> memref<!tpu.dma_semaphore, #tpu.memory_space<semaphore_mem>>
    tpu.wait_dma2 semaphore(%22 : memref<!tpu.dma_semaphore, #tpu.memory_space<semaphore_mem>>) src(%arg6 : memref<512x1024xbf16, #tpu.memory_space<any>>) dst(%arg11 : memref<512x1024xbf16, #tpu.memory_space<vmem>>)
    %c0_13 = arith.constant 0 : index
    %c0_14 = arith.constant 0 : index
    %23 = vector.load %arg11[%c0_13, %c0_14] : memref<512x1024xbf16, #tpu.memory_space<vmem>>, vector<512x1024xbf16>
    %cst_15 = arith.constant dense<0.000000e+00> : vector<16x1024xf32>
    %24 = tpu.matmul %20, %23, %cst_15 {dimension_numbers = #tpu.dot_dimension_numbers<[1], [0], [0], [1], [0, 0, 1, 1], [], []>} : vector<16x512xbf16>, vector<512x1024xbf16>, vector<16x1024xf32> -> vector<16x1024xf32>
    %25 = arith.truncf %24 : vector<16x1024xf32> to vector<16x1024xbf16>
    %c0_16 = arith.constant 0 : index
    %c0_17 = arith.constant 0 : index
    %26 = vector.load %arg7[%c0_16, %c0_17] : memref<1x1024xbf16, #tpu.memory_space<vmem>>, vector<1x1024xbf16>
    %27 = vector.broadcast %26 : vector<1x1024xbf16> to vector<16x1024xbf16>
    %28 = arith.addf %25, %27 : vector<16x1024xbf16>
    %cst_18 = arith.constant 0.000000e+00 : bf16
    %29 = vector.broadcast %cst_18 : bf16 to vector<16x1024xbf16>
    %30 = arith.maximumf %28, %29 : vector<16x1024xbf16>
    %c1_i32_19 = arith.constant 1 : i32
    %31 = tpu.memref_slice %arg13[%c1_i32_19] : memref<2x!tpu.dma_semaphore, #tpu.memory_space<semaphore_mem>> -> memref<1x!tpu.dma_semaphore, #tpu.memory_space<semaphore_mem>>
    %32 = tpu.memref_squeeze %31 : memref<1x!tpu.dma_semaphore, #tpu.memory_space<semaphore_mem>> -> memref<!tpu.dma_semaphore, #tpu.memory_space<semaphore_mem>>
    tpu.wait_dma2 semaphore(%32 : memref<!tpu.dma_semaphore, #tpu.memory_space<semaphore_mem>>) src(%arg8 : memref<1024x896xbf16, #tpu.memory_space<any>>) dst(%arg12 : memref<1024x896xbf16, #tpu.memory_space<vmem>>)
    %c0_20 = arith.constant 0 : index
    %c0_21 = arith.constant 0 : index
    %33 = vector.load %arg12[%c0_20, %c0_21] : memref<1024x896xbf16, #tpu.memory_space<vmem>>, vector<1024x896xbf16>
    %cst_22 = arith.constant dense<0.000000e+00> : vector<16x896xf32>
    %34 = tpu.matmul %30, %33, %cst_22 {dimension_numbers = #tpu.dot_dimension_numbers<[1], [0], [0], [1], [0, 0, 1, 1], [], []>} : vector<16x1024xbf16>, vector<1024x896xbf16>, vector<16x896xf32> -> vector<16x896xf32>
    %35 = arith.truncf %34 : vector<16x896xf32> to vector<16x896xbf16>
    %c0_23 = arith.constant 0 : index
    %c0_24 = arith.constant 0 : index
    %36 = vector.load %arg9[%c0_23, %c0_24] : memref<1x896xbf16, #tpu.memory_space<vmem>>, vector<1x896xbf16>
    %37 = vector.broadcast %36 : vector<1x896xbf16> to vector<16x896xbf16>
    %38 = arith.addf %35, %37 : vector<16x896xbf16>
    %c0_25 = arith.constant 0 : index
    %c0_26 = arith.constant 0 : index
    %39 = vector.load %arg10[%c0_25, %c0_26] : memref<16x896xbf16, #tpu.memory_space<vmem>>, vector<16x896xbf16>
    tpu.vector_store %arg10[%c0_25, %c0_26], %38 {strides = array<i32>} : memref<16x896xbf16, #tpu.memory_space<vmem>>, vector<16x896xbf16>,
    return
  }
  func.func @transform_0(%arg0: i32) -> (i32, i32) {
    %c0_i32 = arith.constant 0 : i32
    %c0_i32_0 = arith.constant 0 : i32
    return %arg0, %c0_i32 : i32, i32
  }
  func.func @transform_1(%arg0: i32) -> (i32, i32) {
    %c0_i32 = arith.constant 0 : i32
    %c0_i32_0 = arith.constant 0 : i32
    %c0_i32_1 = arith.constant 0 : i32
    return %c0_i32, %c0_i32_0 : i32, i32
  }
  func.func @transform_2(%arg0: i32) -> (i32, i32) {
    %c0_i32 = arith.constant 0 : i32
    %c0_i32_0 = arith.constant 0 : i32
    %c0_i32_1 = arith.constant 0 : i32
    return %c0_i32, %c0_i32_0 : i32, i32
  }
  func.func @transform_3(%arg0: i32) -> (i32, i32) {
    %c0_i32 = arith.constant 0 : i32
    %c0_i32_0 = arith.constant 0 : i32
    %c0_i32_1 = arith.constant 0 : i32
    return %c0_i32, %c0_i32_0 : i32, i32
  }
  func.func @transform_4(%arg0: i32) -> (i32, i32) {
    %c0_i32 = arith.constant 0 : i32
    %c0_i32_0 = arith.constant 0 : i32
    %c0_i32_1 = arith.constant 0 : i32
    return %c0_i32, %c0_i32_0 : i32, i32
  }
  func.func @transform_6(%arg0: i32) -> (i32, i32) {
    %c0_i32 = arith.constant 0 : i32
    %c0_i32_0 = arith.constant 0 : i32
    %c0_i32_1 = arith.constant 0 : i32
    return %c0_i32, %c0_i32_0 : i32, i32
  }
  func.func @transform_8(%arg0: i32) -> (i32, i32) {
    %c0_i32 = arith.constant 0 : i32
    %c0_i32_0 = arith.constant 0 : i32
    %c0_i32_1 = arith.constant 0 : i32
    return %c0_i32, %c0_i32_0 : i32, i32
  }
  func.func @transform_9(%arg0: i32) -> (i32, i32) {
    %c0_i32 = arith.constant 0 : i32
    %c0_i32_0 = arith.constant 0 : i32
    return %arg0, %c0_i32 : i32, i32
  }
}

</mosaic_0001>

<bundles_post_ra>
// kernel: tpu_custom_call.1
= control target key start
LH: loop header
LB: loop body
LE: loop exit
PB: predicated region body
PF: predicated region fallthrough
CT: control target
= control target key end

     0   :  { %14 = vsyncpa [#allocation6], 0  ;;  %s8705_s0 = inlined_call_operand.hbm [shape: bf16[16,128], index: 0, kind: input, shape index: {}]   ;;  %s8706_s1 = inlined_call_operand.hbm [shape: bf16[128,256], index: 1, kind: input, shape index: {}]   ;;  %s8707_s2 = inlined_call_operand.hbm [shape: bf16[1,256], index: 2, kind: input, shape index: {}]   ;;  %s8708_s3 = inlined_call_operand.hbm [shape: bf16[256,512], index: 3, kind: input, shape index: {}]   ;;  %s8709_s4 = inlined_call_operand.hbm [shape: bf16[1,512], index: 4, kind: input, shape index: {}]   ;;  %s8710_s5 = inlined_call_operand.hbm [shape: bf16[512,1024], index: 5, kind: input, shape index: {}]   ;;  %s8711_s6 = inlined_call_operand.hbm [shape: bf16[1,1024], index: 6, kind: input, shape index: {}]   ;;  %s8712_s7 = inlined_call_operand.hbm [shape: bf16[1024,896], index: 7, kind: input, shape index: {}]   ;;  %s8713_s8 = inlined_call_operand.hbm [shape: bf16[1,896], index: 8, kind: input, shape index: {}]   ;;  %s8714_s9 = inlined_call_operand.hbm [shape: bf16[16,896], index: 9, kind: output, shape index: {}]  }
   0x1   :  { %15 = vsyncpa [#allocation9], 0 }
   0x2   :  { %16 = vsyncpa [#allocation12], 0 }
   0x3   :  { %17 = vsyncpa [#allocation15], 0 }
   0x4   :  { %18 = vsyncpa [#allocation7], 0  ;;  %s8455_s30 = smov [#allocation8]  }
   0x5   :  { %s36_s10 = sshll.u32 %s8455_s30, 4  ;;  %s37_s10 = int_to_ptr.vmem [resolvable:$true] %s36_s10 }
   0x6   :  { %s8249_s11 = scalar_lea.vmem %s37_s10, 2048  ;;  %p8254_p1 = scmp.lt.s32.totalorder %s37_s10, %s37_s10 }
   0x7   :  { %p8250_p0 = scmp.ne.s32.totalorder %s37_s10, %s8249_s11  ;;  %p8255_p2 = scmp.lt.s32.totalorder %s8249_s11, %s8249_s11 }
   0x9   :  { %p8256_p3 = por %p8255_p2, %p8254_p1 }
   0xb   :  { %p8257_p4 = pnand %p8256_p3, %p8250_p0 }
   0xd   :  { %8260 = shalt.err (!%p8257_p4)
}
   0xe   :  { %s8456_s12 = smov 128   ;;  %s8457_s13 = smov 8  }
   0xf   :  { %42 = dma.hbm_to_vmem [thread:$0]  %s8706_s1, 2048, %s37_s10, [#allocation9], %s8456_s12, %s8456_s12, %s8457_s13  }
  0x10   :  { %s8458_s16 = smov [#allocation11]  }
  0x11   :  { %s58_s17 = sshll.u32 %s8458_s16, 4  ;;  %s59_s17 = int_to_ptr.vmem [resolvable:$true] %s58_s17 }
  0x12   :  { %s8269_s18 = scalar_lea.vmem %s59_s17, 8192  ;;  %p8274_p6 = scmp.lt.s32.totalorder %s59_s17, %s59_s17 }
  0x13   :  { %p8270_p5 = scmp.ne.s32.totalorder %s59_s17, %s8269_s18  ;;  %p8275_p7 = scmp.lt.s32.totalorder %s8269_s18, %s8269_s18 }
  0x15   :  { %p8276_p8 = por %p8275_p7, %p8274_p6 }
  0x17   :  { %p8277_p9 = pnand %p8276_p8, %p8270_p5 }
  0x19   :  { %8280 = shalt.err (!%p8277_p9)
}
  0x1a   :  { %s8459_s19 = smov 256   ;;  %s8460_s20 = smov 16  }
  0x1b   :  { %64 = dma.hbm_to_vmem [thread:$0]  %s8708_s3, 8192, %s59_s17, [#allocation12], %s8459_s19, %s8459_s19, %s8460_s20  }
  0x1c   :  { %s8461_s23 = smov [#allocation14]   ;;  %s8462_s25 = smov [#allocation5]  }
  0x1d   :  { %s81_s24 = sshll.u32 %s8461_s23, 4  ;;  %s24_s1 = sshll.u32 %s8462_s25, 4  ;;  %s82_s24 = int_to_ptr.vmem [resolvable:$true] %s81_s24  ;;  %s25_s1 = int_to_ptr.vmem [resolvable:$true] %s24_s1 }
  0x1e   :  { %s8289_s26 = scalar_lea.vmem %s82_s24, 128  ;;  %p8294_p11 = scmp.lt.s32.totalorder %s82_s24, %s82_s24 }
  0x1f   :  { %p8290_p10 = scmp.ne.s32.totalorder %s82_s24, %s8289_s26  ;;  %p8295_p12 = scmp.lt.s32.totalorder %s8289_s26, %s8289_s26 }
  0x21   :  { %p8296_p13 = por %p8295_p12, %p8294_p11 }
  0x23   :  { %p8297_p0 = pnand %p8296_p13, %p8290_p10 }
  0x25   :  { %8300 = shalt.err (!%p8297_p0)
}
  0x26   :  { %84 = dma.hbm_to_vmem [thread:$0]  %s8711_s6, 128, %s82_s24, [#allocation15]  }
  0x27   :  { %s8309_s29 = scalar_lea.vmem %s25_s1, 128  ;;  %p8314_p2 = scmp.lt.s32.totalorder %s25_s1, %s25_s1 }
  0x28   :  { %p8310_p1 = scmp.ne.s32.totalorder %s25_s1, %s8309_s29  ;;  %p8315_p3 = scmp.lt.s32.totalorder %s8309_s29, %s8309_s29 }
  0x2a   :  { %p8316_p4 = por %p8315_p3, %p8314_p2 }
  0x2c   :  { %p8317_p5 = pnand %p8316_p4, %p8310_p1 }
  0x2e   :  { %8320 = shalt.err (!%p8317_p5)
}
  0x2f   :  { %s8463_s3 = smov 64   ;;  %s8464_s30 = smov 4  }
  0x30   :  { %30 = dma.hbm_to_vmem [thread:$0]  %s8705_s0, 128, %s25_s1, [#allocation6], %s8463_s3, %s8463_s3, %s8464_s30  }
  0x31   :  { %s8465_s12 = smov [#allocation10]   ;;  %s8466_s14 = smov [#allocation13]  }
  0x32   :  { %s49_s13 = sshll.u32 %s8465_s12, 4  ;;  %s71_s15 = sshll.u32 %s8466_s14, 4  ;;  %s50_s13 = int_to_ptr.vmem [resolvable:$true] %s49_s13  ;;  %s72_s15 = int_to_ptr.vmem [resolvable:$true] %s71_s15 }
  0x33   :  { %s8329_s6 = scalar_lea.vmem %s50_s13, 32  ;;  %p8334_p7 = scmp.lt.s32.totalorder %s50_s13, %s50_s13 }
  0x34   :  { %p8330_p6 = scmp.ne.s32.totalorder %s50_s13, %s8329_s6  ;;  %p8335_p8 = scmp.lt.s32.totalorder %s8329_s6, %s8329_s6 }
  0x36   :  { %p8336_p9 = por %p8335_p8, %p8334_p7 }
  0x38   :  { %p8337_p10 = pnand %p8336_p9, %p8330_p6 }
  0x3a   :  { %8340 = shalt.err (!%p8337_p10)
}
  0x3b   :  { %52 = dma.hbm_to_vmem [thread:$0]  %s8707_s2, 32, %s50_s13, [#allocation9]  }
  0x3c   :  { %s8349_s18 = scalar_lea.vmem %s72_s15, 64  ;;  %p8354_p12 = scmp.lt.s32.totalorder %s72_s15, %s72_s15 }
  0x3d   :  { %p8350_p11 = scmp.ne.s32.totalorder %s72_s15, %s8349_s18  ;;  %p8355_p13 = scmp.lt.s32.totalorder %s8349_s18, %s8349_s18 }
  0x3f   :  { %p8356_p0 = por %p8355_p13, %p8354_p12 }
  0x41   :  { %p8357_p1 = pnand %p8356_p0, %p8350_p11 }
  0x43   :  { %8360 = shalt.err (!%p8357_p1)
}
  0x44   :  { %74 = dma.hbm_to_vmem [thread:$0]  %s8709_s4, 64, %s72_s15, [#allocation12]  }
  0x45   :  { %s8467_s20 = smov [#allocation16]  }
  0x46   :  { %s91_s21 = sshll.u32 %s8467_s20, 4  ;;  %s92_s21 = int_to_ptr.vmem [resolvable:$true] %s91_s21 }
  0x47   :  { %s8369_s22 = scalar_lea.vmem %s92_s21, 112  ;;  %s8373_s23 = scalar_lea.vmem %s92_s21, 128 }
  0x48   :  { %p8370_p2 = scmp.ne.s32.totalorder %s92_s21, %s8369_s22  ;;  %p8374_p3 = scmp.lt.s32.totalorder %s92_s21, %s92_s21 }
  0x49   :  { %p8375_p4 = scmp.lt.s32.totalorder %s8373_s23, %s8369_s22 }
  0x4b   :  { %p8376_p5 = por %p8375_p4, %p8374_p3 }
  0x4d   :  { %p8377_p6 = pnand %p8376_p5, %p8370_p2 }
  0x4f   :  { %8380 = shalt.err (!%p8377_p6)
}
  0x50   :  { %94 = dma.hbm_to_vmem [thread:$0]  %s8713_s8, 112, %s92_s21, [#allocation15]  }
  0x51   :  { %8441 = dma.done.wait [#allocation6], 128  }
  0x52   :  { %8442 = vsyncadd [#allocation6], 4294967168 }
  0x53   :  { %8443 = dma.done.wait [#allocation9], 2080  }
  0x54   :  { %8444 = vsyncadd [#allocation9], 4294965216 }
  0x55   :  { %8445 = dma.done.wait [#allocation12], 8256  }
  0x56   :  { %8446 = vsyncadd [#allocation12], 4294959040 }
  0x57   :  { %8447 = dma.done.wait [#allocation15], 240  }
  0x58   :  { %8448 = vsyncadd [#allocation15], 4294967056  ;;  %v8468_v0 = vmov 0   ;;  %v7478_v1 = vld [vmem:[#allocation8 + $0x74] ss:$8 sps:$4 sm:$0xff]   ;;  %s8470_s4 = smov [#allocation2]  }
  0x59   :  { %276 = vmatprep.mubr.bf16.mxu0 %v8468_v0  ;;  %v7480_v2 = vld [vmem:[#allocation8 + $0x70] ss:$8 sps:$4 sm:$0xff]   ;;  %244 = vmatprep.subr.bf16.mxu0 %v7478_v1  ;;  %v7481_v3 = vld [vmem:[#allocation8 + $0x64] ss:$8 sps:$4 sm:$0xff]   ;;  %v7483_v4 = vld [vmem:[#allocation8 + $0x60] ss:$8 sps:$4 sm:$0xff]  }
  0x5a   :  { %245 = vmatpush1.bf16.msra.mxu0 %v7480_v2  ;;  %v7484_v5 = vld [vmem:[#allocation8 + $0x54] ss:$8 sps:$4 sm:$0xff]   ;;  %v7486_v6 = vld [vmem:[#allocation8 + $0x50] ss:$8 sps:$4 sm:$0xff]   ;;  %v7487_v7 = vld [vmem:[#allocation8 + $0x44] ss:$8 sps:$4 sm:$0xff]  }
  0x5b   :  { %246 = vmatprep.subr.bf16.mxu0 %v7481_v3  ;;  %v7489_v8 = vld [vmem:[#allocation8 + $0x40] ss:$8 sps:$4 sm:$0xff]   ;;  %v7490_v9 = vld [vmem:[#allocation8 + $0x34] ss:$8 sps:$4 sm:$0xff]   ;;  %v7492_v11 = vld [vmem:[#allocation8 + $0x30] ss:$8 sps:$4 sm:$0xff]  }
  0x5c   :  { %v7503_v10 = vld [vmem:[#allocation11 + $0xe4] ss:$16 sps:$4 sm:$0xff]   ;;  %v7508_v12 = vld [vmem:[#allocation11 + $0xe0] ss:$16 sps:$4 sm:$0xff]   ;;  %v7507_v26 = vld [vmem:[#allocation11 + $0xec] ss:$16 sps:$4 sm:$0xff]  }
  0x5d   :  { %715 = vmatprep.subr.bf16.mxu1 %v7503_v10  ;;  %v7509_v13 = vld [vmem:[#allocation11 + $0xc4] ss:$16 sps:$4 sm:$0xff]   ;;  %v7514_v15 = vld [vmem:[#allocation11 + $0xc0] ss:$16 sps:$4 sm:$0xff]   ;;  %v7505_v30 = vld [vmem:[#allocation11 + $0xe8] ss:$16 sps:$4 sm:$0xff]  }
  0x5e   :  { %247 = vmatpush1.bf16.msra.mxu0 %v7483_v4  ;;  %v7493_v14 = vld [vmem:[#allocation8 + $0x24] ss:$8 sps:$4 sm:$0xff]   ;;  %716 = vmatpush1.bf16.msra.mxu1 %v7508_v12  ;;  %v7495_v17 = vld [vmem:[#allocation8 + $0x20] ss:$8 sps:$4 sm:$0xff]   ;;  %v7496_v18 = vld [vmem:[#allocation8 + $0x14] ss:$8 sps:$4 sm:$0xff]  }
  0x5f   :  { %248 = vmatprep.subr.bf16.mxu0 %v7484_v5  ;;  %717 = vmatprep.subr.bf16.mxu1 %v7509_v13  ;;  %v7515_v16 = vld [vmem:[#allocation11 + $0xa4] ss:$16 sps:$4 sm:$0xff]   ;;  %v7520_v19 = vld [vmem:[#allocation11 + $0xa0] ss:$16 sps:$4 sm:$0xff]   ;;  %v7513_v31 = vld [vmem:[#allocation11 + $0xcc] ss:$16 sps:$4 sm:$0xff]  }
  0x60   :  { %v7521_v20 = vld [vmem:[#allocation11 + $0x84] ss:$16 sps:$4 sm:$0xff]   ;;  %v7526_v23 = vld [vmem:[#allocation11 + $0x80] ss:$16 sps:$4 sm:$0xff]   ;;  %v7511_v34 = vld [vmem:[#allocation11 + $0xc8] ss:$16 sps:$4 sm:$0xff]  }
  0x61   :  { %v7498_v21 = vld [vmem:[#allocation8 + $0x10] ss:$8 sps:$4 sm:$0xff]   ;;  %v7499_v22 = vld [vmem:[#allocation8 + $0x4] ss:$8 sps:$4 sm:$0xff]   ;;  %v7501_v25 = vld [vmem:[#allocation8] ss:$8 sps:$4 sm:$0xff]  }
  0x62   :  { %249 = vmatpush1.bf16.msra.mxu0 %v7486_v6  ;;  %718 = vmatpush1.bf16.msra.mxu1 %v7514_v15  ;;  %v7527_v24 = vld [vmem:[#allocation11 + $0x64] ss:$16 sps:$4 sm:$0xff]   ;;  %v7532_v27 = vld [vmem:[#allocation11 + $0x60] ss:$16 sps:$4 sm:$0xff]   ;;  %v7519_v35 = vld [vmem:[#allocation11 + $0xac] ss:$16 sps:$4 sm:$0xff]  }
  0x63   :  { %250 = vmatprep.subr.bf16.mxu0 %v7487_v7  ;;  %719 = vmatprep.subr.bf16.mxu1 %v7515_v16  ;;  %v7533_v28 = vld [vmem:[#allocation11 + $0x44] ss:$16 sps:$4 sm:$0xff]   ;;  %v7538_v32 = vld [vmem:[#allocation11 + $0x40] ss:$16 sps:$4 sm:$0xff]   ;;  %v7517_v38 = vld [vmem:[#allocation11 + $0xa8] ss:$16 sps:$4 sm:$0xff]  }
  0x64   :  { %v7502_v29 = vld [vmem:[#allocation5] sm:$0xff]   ;;  %v7544_v36 = vld [vmem:[#allocation11 + $0x20] ss:$16 sps:$4 sm:$0xff]   ;;  %s124_s8 = sshll.u32 %s8470_s4, 4  ;;  %s8471_s25 = smov [#allocation3]   ;;  %s125_s8 = int_to_ptr.vmem [resolvable:$true] %s124_s8 }
  0x65   :  { %v7539_v33 = vld [vmem:[#allocation11 + $0x24] ss:$16 sps:$4 sm:$0xff]   ;;  %v7525_v39 = vld [vmem:[#allocation11 + $0x8c] ss:$16 sps:$4 sm:$0xff]   ;;  %v7550_v40 = vld [vmem:[#allocation11] ss:$16 sps:$4 sm:$0xff]   ;;  %p8394_p8 = scmp.lt.s32.totalorder %s125_s8, %s125_s8 }
  0x66   :  { %251 = vmatpush1.bf16.msra.mxu0 %v7489_v8  ;;  %720 = vmatpush1.bf16.msra.mxu1 %v7520_v19  ;;  %v7545_v37 = vld [vmem:[#allocation11 + $0x4] ss:$16 sps:$4 sm:$0xff]   ;;  %v7523_v42 = vld [vmem:[#allocation11 + $0x88] ss:$16 sps:$4 sm:$0xff]   ;;  %v7531_v43 = vld [vmem:[#allocation11 + $0x6c] ss:$16 sps:$4 sm:$0xff]  }
  0x67   :  { %252 = vmatprep.subr.bf16.mxu0 %v7490_v9  ;;  %721 = vmatprep.subr.bf16.mxu1 %v7521_v20  ;;  %v7551_v41 = vld [vmem:[#allocation11 + $0x1e4] ss:$16 sps:$4 sm:$0xff]   ;;  %v7556_v44 = vld [vmem:[#allocation11 + $0x1e0] ss:$16 sps:$4 sm:$0xff]   ;;  %v7529_v45 = vld [vmem:[#allocation11 + $0x68] ss:$16 sps:$4 sm:$0xff]  }
  0x68   :  { %v7557_v46 = vld [vmem:[#allocation11 + $0x1c4] ss:$16 sps:$4 sm:$0xff]   ;;  %v7537_v47 = vld [vmem:[#allocation11 + $0x4c] ss:$16 sps:$4 sm:$0xff]   ;;  %v7562_v48 = vld [vmem:[#allocation11 + $0x1c0] ss:$16 sps:$4 sm:$0xff]  }
  0x69   :  { %v7563_v49 = vld [vmem:[#allocation11 + $0x1a4] ss:$16 sps:$4 sm:$0xff]   ;;  %v7535_v50 = vld [vmem:[#allocation11 + $0x48] ss:$16 sps:$4 sm:$0xff]   ;;  %v7543_v51 = vld [vmem:[#allocation11 + $0x2c] ss:$16 sps:$4 sm:$0xff]  }
  0x6a   :  { %253 = vmatpush1.bf16.msra.mxu0 %v7492_v11  ;;  %722 = vmatpush1.bf16.msra.mxu1 %v7526_v23  ;;  %v7568_v52 = vld [vmem:[#allocation11 + $0x1a0] ss:$16 sps:$4 sm:$0xff]   ;;  %v7569_v53 = vld [vmem:[#allocation11 + $0x184] ss:$16 sps:$4 sm:$0xff]   ;;  %v7541_v54 = vld [vmem:[#allocation11 + $0x28] ss:$16 sps:$4 sm:$0xff]  }
  0x6b   :  { %254 = vmatprep.subr.bf16.mxu0 %v7493_v14  ;;  %723 = vmatprep.subr.bf16.mxu1 %v7527_v24  ;;  %v7549_v55 = vld [vmem:[#allocation11 + $0xc] ss:$16 sps:$4 sm:$0xff]   ;;  %v7574_v56 = vld [vmem:[#allocation11 + $0x180] ss:$16 sps:$4 sm:$0xff]   ;;  %v7575_v57 = vld [vmem:[#allocation11 + $0x164] ss:$16 sps:$4 sm:$0xff]  }
  0x6c   :  { %v7547_v58 = vld [vmem:[#allocation11 + $0x8] ss:$16 sps:$4 sm:$0xff]   ;;  %v7555_v59 = vld [vmem:[#allocation11 + $0x1ec] ss:$16 sps:$4 sm:$0xff]   ;;  %v7580_v60 = vld [vmem:[#allocation11 + $0x160] ss:$16 sps:$4 sm:$0xff]  }
  0x6d   :  { %v7553_v61 = vld [vmem:[#allocation11 + $0x1e8] ss:$16 sps:$4 sm:$0xff]   ;;  %v7561_v62 = vld [vmem:[#allocation11 + $0x1cc] ss:$16 sps:$4 sm:$0xff]   ;;  %v7581_v7 = vld [vmem:[#allocation11 + $0x144] ss:$16 sps:$4 sm:$0xff]  }
  0x6e   :  { %255 = vmatpush1.bf16.msra.mxu0 %v7495_v17  ;;  %724 = vmatpush1.bf16.msra.mxu1 %v7532_v27  ;;  %v7559_v63 = vld [vmem:[#allocation11 + $0x1c8] ss:$16 sps:$4 sm:$0xff]   ;;  %v7567_v1 = vld [vmem:[#allocation11 + $0x1ac] ss:$16 sps:$4 sm:$0xff]   ;;  %v7586_v10 = vld [vmem:[#allocation11 + $0x140] ss:$16 sps:$4 sm:$0xff]  }
  0x6f   :  { %256 = vmatprep.subr.bf16.mxu0 %v7496_v18  ;;  %725 = vmatprep.subr.bf16.mxu1 %v7533_v28  ;;  %v7565_v2 = vld [vmem:[#allocation11 + $0x1a8] ss:$16 sps:$4 sm:$0xff]   ;;  %v7573_v3 = vld [vmem:[#allocation11 + $0x18c] ss:$16 sps:$4 sm:$0xff]   ;;  %v7587_v11 = vld [vmem:[#allocation11 + $0x124] ss:$16 sps:$4 sm:$0xff]  }
  0x70   :  { %v7571_v4 = vld [vmem:[#allocation11 + $0x188] ss:$16 sps:$4 sm:$0xff]   ;;  %v7579_v5 = vld [vmem:[#allocation11 + $0x16c] ss:$16 sps:$4 sm:$0xff]   ;;  %v7592_v14 = vld [vmem:[#allocation11 + $0x120] ss:$16 sps:$4 sm:$0xff]  }
  0x71   :  { %v7577_v6 = vld [vmem:[#allocation11 + $0x168] ss:$16 sps:$4 sm:$0xff]   ;;  %v7585_v8 = vld [vmem:[#allocation11 + $0x14c] ss:$16 sps:$4 sm:$0xff]   ;;  %v7593_v15 = vld [vmem:[#allocation11 + $0x104] ss:$16 sps:$4 sm:$0xff]  }
  0x72   :  { %257 = vmatpush1.bf16.msra.mxu0 %v7498_v21  ;;  %726 = vmatpush1.bf16.msra.mxu1 %v7538_v32  ;;  %v7583_v9 = vld [vmem:[#allocation11 + $0x148] ss:$16 sps:$4 sm:$0xff]   ;;  %v7591_v12 = vld [vmem:[#allocation11 + $0x12c] ss:$16 sps:$4 sm:$0xff]   ;;  %v7598_v18 = vld [vmem:[#allocation11 + $0x100] ss:$16 sps:$4 sm:$0xff]   ;;  %v302_v21 = vlaneseq }
  0x73   :  { %258 = vmatprep.subr.bf16.mxu0 %v7499_v22  ;;  %727 = vmatprep.subr.bf16.mxu1 %v7539_v33  ;;  %v7589_v13 = vld [vmem:[#allocation11 + $0x128] ss:$16 sps:$4 sm:$0xff]   ;;  %v7597_v16 = vld [vmem:[#allocation11 + $0x10c] ss:$16 sps:$4 sm:$0xff]   ;;  %v8469_v19 = vmov 1966171168  }
  0x74   :  { %v7595_v17 = vld [vmem:[#allocation11 + $0x108] ss:$16 sps:$4 sm:$0xff]   ;;  %v300_v20 = vunpack.c.l.s4 %v8469_v19  ;;  %v303_v23 = vshrl.u32 %v302_v21, 7  ;;  %s136_s1 = sshll.u32 %s8471_s25, 4  ;;  %s8389_s26 = scalar_lea.vmem %s125_s8, 32768  ;;  %s137_s1 = int_to_ptr.vmem [resolvable:$true] %s136_s1 }
  0x75   :  { %v6590_v24 = vld.sshfl [vmem:[#allocation10] sm:$0x11 pattern:$0x75316420]  ;;  %p8390_p7 = scmp.ne.s32.totalorder %s125_s8, %s8389_s26  ;;  %p8395_p9 = scmp.lt.s32.totalorder %s8389_s26, %s8389_s26 }
  0x76   :  { %259 = vmatpush1.bf16.msra.mxu0 %v7501_v25  ;;  %728 = vmatpush1.bf16.msra.mxu1 %v7544_v36  ;;  %v301_v22 = vunpack.c.0.s8 %v300_v20 }
  0x77   :  { %758 = vmatprep.subr.bf16.mxu0 %v7507_v26  ;;  %729 = vmatprep.subr.bf16.mxu1 %v7545_v37  ;;  %v298_v26 = vcombine.high %v6590_v24, %v6590_v24  ;;  %p8396_p10 = por %p8395_p9, %p8394_p8 }
  0x78   :  { %v8547_v25 = vsub.s32 %v301_v22, %v303_v23 }
  0x79   :  { %277 = vmatmul.mubr.bf16.vlgmr.msra.gmra.mxu0 %v7502_v29  ;;  %p8397_p11 = pnand %p8396_p10, %p8390_p7 }
  0x7a   :  { %759 = vmatpush1.bf16.msra.mxu0 %v7505_v30  ;;  %730 = vmatpush1.bf16.msra.mxu1 %v7550_v40  ;;  %v305_v27 = vrot.slane %v6590_v24, %v8547_v25  ;;  %v312_v28 = vrot.slane %v298_v26, %v8547_v25 }
  0x7b   :  { %760 = vmatprep.subr.bf16.mxu0 %v7513_v31  ;;  %731 = vmatprep.subr.bf16.mxu1 %v7551_v41  ;;  %v8551_v31 = vsub.s32 0, %v303_v23 }
  0x7c   :  { %v314_v30 = vpack.i.b16 %v305_v27, %v305_v27  ;;  %v321_v32 = vpack.i.b16 %v312_v28, %v312_v28 }
  0x7e   :  { %761 = vmatpush1.bf16.msra.mxu0 %v7511_v34  ;;  %732 = vmatpush2.bf16.msra.mxu1 %v7556_v44  ;;  %v326_v37 = vrot.slane %v321_v32, %v8551_v31 }
  0x7f   :  { %762 = vmatprep.subr.bf16.mxu0 %v7519_v35  ;;  %733 = vmatprep.subr.bf16.mxu1 %v7557_v46  ;;  %v319_v35 = vrot.slane %v314_v30, %v8551_v31 }
  0x82   :  { %763 = vmatpush1.bf16.msra.mxu0 %v7517_v38  ;;  %734 = vmatpush2.bf16.msra.mxu1 %v7562_v48 }
  0x83   :  { %764 = vmatprep.subr.bf16.mxu0 %v7525_v39  ;;  %735 = vmatprep.subr.bf16.mxu1 %v7563_v49 }
  0x86   :  { %765 = vmatpush1.bf16.msra.mxu0 %v7523_v42  ;;  %736 = vmatpush2.bf16.msra.mxu1 %v7568_v52 }
  0x87   :  { %766 = vmatprep.subr.bf16.mxu0 %v7531_v43  ;;  %737 = vmatprep.subr.bf16.mxu1 %v7569_v53 }
  0x8a   :  { %767 = vmatpush1.bf16.msra.mxu0 %v7529_v45  ;;  %738 = vmatpush2.bf16.msra.mxu1 %v7574_v56 }
  0x8b   :  { %768 = vmatprep.subr.bf16.mxu0 %v7537_v47  ;;  %739 = vmatprep.subr.bf16.mxu1 %v7575_v57 }
  0x8e   :  { %769 = vmatpush1.bf16.msra.mxu0 %v7535_v50  ;;  %740 = vmatpush2.bf16.msra.mxu1 %v7580_v60 }
  0x8f   :  { %770 = vmatprep.subr.bf16.mxu0 %v7543_v51  ;;  %741 = vmatprep.subr.bf16.mxu1 %v7581_v7 }
  0x92   :  { %771 = vmatpush1.bf16.msra.mxu0 %v7541_v54  ;;  %742 = vmatpush2.bf16.msra.mxu1 %v7586_v10 }
  0x93   :  { %772 = vmatprep.subr.bf16.mxu0 %v7549_v55  ;;  %743 = vmatprep.subr.bf16.mxu1 %v7587_v11 }
  0x96   :  { %773 = vmatpush1.bf16.msra.mxu0 %v7547_v58  ;;  %744 = vmatpush2.bf16.msra.mxu1 %v7592_v14 }
  0x97   :  { %774 = vmatprep.subr.bf16.mxu0 %v7555_v59  ;;  %745 = vmatprep.subr.bf16.mxu1 %v7593_v15 }
  0x9a   :  { %775 = vmatpush2.bf16.msra.mxu0 %v7553_v61  ;;  %746 = vmatpush2.bf16.msra.mxu1 %v7598_v18 }
  0x9b   :  { %776 = vmatprep.subr.bf16.mxu0 %v7561_v62 }
  0x9e   :  { %777 = vmatpush2.bf16.msra.mxu0 %v7559_v63 }
  0x9f   :  { %778 = vmatprep.subr.bf16.mxu0 %v7567_v1 }
  0xa2   :  { %779 = vmatpush2.bf16.msra.mxu0 %v7565_v2 }
  0xa3   :  { %780 = vmatprep.subr.bf16.mxu0 %v7573_v3 }
  0xa6   :  { %781 = vmatpush2.bf16.msra.mxu0 %v7571_v4 }
  0xa7   :  { %782 = vmatprep.subr.bf16.mxu0 %v7579_v5 }
  0xaa   :  { %783 = vmatpush2.bf16.msra.mxu0 %v7577_v6 }
  0xab   :  { %784 = vmatprep.subr.bf16.mxu0 %v7585_v8 }
  0xae   :  { %785 = vmatpush2.bf16.msra.mxu0 %v7583_v9 }
  0xaf   :  { %786 = vmatprep.subr.bf16.mxu0 %v7591_v12 }
  0xb2   :  { %787 = vmatpush2.bf16.msra.mxu0 %v7589_v13 }
  0xb3   :  { %788 = vmatprep.subr.bf16.mxu0 %v7597_v16 }
  0xb6   :  { %789 = vmatpush2.bf16.msra.mxu0 %v7595_v17 }
 0x139   :  { %v278_v29 = vpop.f32.mrf.mxu0 }
 0x13b   :  { %v280_v33 = vpop.f32.mrf.mxu0 }
 0x13d   :  { %v282_v34 = vpop.f32.mrf.mxu0 }
 0x13e   :  { %v287_v36 = vpack.c.bf16 %v282_v34, %v278_v29 }
 0x13f   :  { %v284_v38 = vpop.f32.mrf.mxu0 }
 0x140   :  { %v288_v39 = vpack.c.bf16 %v284_v38, %v280_v33  ;;  %v327_v40 = vadd.bf16 %v319_v35, %v287_v36 }
 0x142   :  { %v328_v41 = vadd.bf16 %v326_v37, %v288_v39  ;;  %v329_v43 = vmax.bf16 %v8468_v0, %v327_v40 }
 0x144   :  { %v330_v42 = vmax.bf16 %v8468_v0, %v328_v41 }
 0x146   :  { %747 = vmatprep.mubr.bf16.mxu1 %v330_v42  ;;  %790 = vmatprep.mubr.bf16.mxu0 %v330_v42 }
 0x147   :  { %748 = vmatmul.mubr.bf16.vlgmr.msra.gmra.mxu1 %v329_v43  ;;  %791 = vmatmul.mubr.bf16.vlgmr.msra.gmra.mxu0 %v329_v43 }
 0x148   :  { %8400 = shalt.err (!%p8397_p11)  }
 0x149   :  { %127 = dma.hbm_to_vmem [thread:$0]  %s8710_s5, 32768, %s125_s8, [#allocation4] }
 0x14a   :  { %s8409_s29 = scalar_lea.vmem %s137_s1, 57344  ;;  %p8414_p13 = scmp.lt.s32.totalorder %s137_s1, %s137_s1 }
 0x14b   :  { %p8410_p12 = scmp.ne.s32.totalorder %s137_s1, %s8409_s29  ;;  %p8415_p0 = scmp.lt.s32.totalorder %s8409_s29, %s8409_s29 }
 0x14d   :  { %p8416_p1 = por %p8415_p0, %p8414_p13 }
 0x14f   :  { %p8417_p2 = pnand %p8416_p1, %p8410_p12 }
 0x151   :  { %8420 = shalt.err (!%p8417_p2)  }
 0x152   :  { %139 = dma.hbm_to_vmem [thread:$0]  %s8712_s7, 57344, %s137_s1, [#allocation4 + $0x1]  ;;  %v6655_v44 = vld.sshfl [vmem:[#allocation13] sm:$0x33 pattern:$0x75316420] }
 0x153   :  { %v814_v45 = vcombine.high %v6655_v44, %v6655_v44  ;;  %v821_v46 = vrot.slane %v6655_v44, %v8547_v25 }
 0x155   :  { %v828_v47 = vrot.slane %v814_v45, %v8547_v25  ;;  %v829_v48 = vcombine.high %v821_v46, %v821_v46  ;;  %v832_v50 = vpack.i.b16 %v821_v46, %v821_v46 }
 0x157   :  { %v830_v49 = vcombine.high %v828_v47, %v828_v47  ;;  %v846_v51 = vpack.i.b16 %v829_v48, %v829_v48  ;;  %v839_v54 = vpack.i.b16 %v828_v47, %v828_v47  ;;  %v837_v58 = vrot.slane %v832_v50, %v8551_v31 }
 0x159   :  { %v853_v55 = vpack.i.b16 %v830_v49, %v830_v49  ;;  %v851_v59 = vrot.slane %v846_v51, %v8551_v31  ;;  %v844_v1 = vrot.slane %v839_v54, %v8551_v31 }
 0x15b   :  { %v858_v2 = vrot.slane %v853_v55, %v8551_v31 }
 0x207   :  { %v749_v52 = vpop.f32.mrf.mxu1  ;;  %v792_v53 = vpop.f32.mrf.mxu0 }
 0x209   :  { %v751_v56 = vpop.f32.mrf.mxu1  ;;  %v794_v57 = vpop.f32.mrf.mxu0 }
 0x20b   :  { %v753_v60 = vpop.f32.mrf.mxu1  ;;  %v796_v61 = vpop.f32.mrf.mxu0 }
 0x20c   :  { %v801_v62 = vpack.c.bf16 %v753_v60, %v749_v52  ;;  %v803_v63 = vpack.c.bf16 %v796_v61, %v792_v53 }
 0x20d   :  { %v755_v3 = vpop.f32.mrf.mxu1  ;;  %v798_v4 = vpop.f32.mrf.mxu0 }
 0x20e   :  { %v859_v5 = vadd.bf16 %v837_v58, %v801_v62  ;;  %v861_v6 = vadd.bf16 %v851_v59, %v803_v63  ;;  %v802_v7 = vpack.c.bf16 %v755_v3, %v751_v56  ;;  %v804_v8 = vpack.c.bf16 %v798_v4, %v794_v57 }
 0x210   :  { %v8570_v9 = vmax.bf16 %v8468_v0, %v859_v5  ;;  %v8573_v10 = vmax.bf16 %v8468_v0, %v861_v6  ;;  %v860_v11 = vadd.bf16 %v844_v1, %v802_v7  ;;  %v862_v12 = vadd.bf16 %v858_v2, %v804_v8 }
 0x212   :  { %v8576_v13 = vmax.bf16 %v8468_v0, %v860_v11  ;;  %v8579_v14 = vmax.bf16 %v8468_v0, %v862_v12 }
 0x213   :  { %8449 = dma.done.wait [#allocation4], 32768 }
 0x214   :  { %8450 = vsyncadd [#allocation4], 4294934528  ;;  %2439 = vmatprep.mubr.bf16.mxu1 %v8576_v13  ;;  %2482 = vmatprep.mubr.bf16.mxu0 %v8579_v14  ;;  %v927_v15 = vld [vmem:[#allocation2 + $0x1c0] sm:$0xff] }
 0x215   :  { %v931_v16 = vld [vmem:[#allocation2 + $0x1e0] sm:$0xff] }
 0x216   :  { %v1055_v17 = vld [vmem:[#allocation2 + $0x5c0] sm:$0xff]  ;;  %v6713_v18 = vcombine.high %v927_v15, %v931_v16  ;;  %v6712_v20 = vcombine.low %v927_v15, %v931_v16 }
 0x217   :  { %v1059_v19 = vld [vmem:[#allocation2 + $0x5e0] sm:$0xff] }
 0x218   :  { %v919_v21 = vld [vmem:[#allocation2 + $0x180] sm:$0xff]  ;;  %v6841_v23 = vcombine.high %v1055_v17, %v1059_v19  ;;  %v6840_v24 = vcombine.low %v1055_v17, %v1059_v19  ;;  %2407 = vmatprep.subr.bf16.mxu1 %v6713_v18 }
 0x219   :  { %v923_v22 = vld [vmem:[#allocation2 + $0x1a0] sm:$0xff]  ;;  %2408 = vmatpush1.bf16.msra.mxu1 %v6712_v20 }
 0x21a   :  { %v6705_v26 = vcombine.high %v919_v21, %v923_v22  ;;  %v1047_v27 = vld [vmem:[#allocation2 + $0x580] sm:$0xff]  ;;  %2450 = vmatprep.subr.bf16.mxu0 %v6841_v23  ;;  %v6704_v35 = vcombine.low %v919_v21, %v923_v22 }
 0x21b   :  { %v1051_v28 = vld [vmem:[#allocation2 + $0x5a0] sm:$0xff]  ;;  %2451 = vmatpush1.bf16.msra.mxu0 %v6840_v24 }
 0x21c   :  { %v911_v29 = vld [vmem:[#allocation2 + $0x140] sm:$0xff]  ;;  %v6833_v30 = vcombine.high %v1047_v27, %v1051_v28  ;;  %2409 = vmatprep.subr.bf16.mxu1 %v6705_v26  ;;  %v6832_v36 = vcombine.low %v1047_v27, %v1051_v28 }
 0x21d   :  { %v915_v32 = vld [vmem:[#allocation2 + $0x160] sm:$0xff]  ;;  %2410 = vmatpush1.bf16.msra.mxu1 %v6704_v35 }
 0x21e   :  { %v1039_v33 = vld [vmem:[#allocation2 + $0x540] sm:$0xff]  ;;  %v6697_v37 = vcombine.high %v911_v29, %v915_v32  ;;  %2452 = vmatprep.subr.bf16.mxu0 %v6833_v30  ;;  %v6696_v43 = vcombine.low %v911_v29, %v915_v32 }
 0x21f   :  { %v1043_v34 = vld [vmem:[#allocation2 + $0x560] sm:$0xff]  ;;  %2453 = vmatpush1.bf16.msra.mxu0 %v6832_v36 }
 0x220   :  { %v6825_v38 = vcombine.high %v1039_v33, %v1043_v34  ;;  %v903_v39 = vld [vmem:[#allocation2 + $0x100] sm:$0xff]  ;;  %2411 = vmatprep.subr.bf16.mxu1 %v6697_v37  ;;  %v6824_v44 = vcombine.low %v1039_v33, %v1043_v34 }
 0x221   :  { %v907_v40 = vld [vmem:[#allocation2 + $0x120] sm:$0xff]  ;;  %2412 = vmatpush1.bf16.msra.mxu1 %v6696_v43 }
 0x222   :  { %v1031_v41 = vld [vmem:[#allocation2 + $0x500] sm:$0xff]  ;;  %v6689_v45 = vcombine.high %v903_v39, %v907_v40  ;;  %2454 = vmatprep.subr.bf16.mxu0 %v6825_v38  ;;  %v6688_v51 = vcombine.low %v903_v39, %v907_v40 }
 0x223   :  { %v1035_v42 = vld [vmem:[#allocation2 + $0x520] sm:$0xff]  ;;  %2455 = vmatpush1.bf16.msra.mxu0 %v6824_v44 }
 0x224   :  { %v6817_v46 = vcombine.high %v1031_v41, %v1035_v42  ;;  %v895_v47 = vld [vmem:[#allocation2 + $0xc0] sm:$0xff]  ;;  %2413 = vmatprep.subr.bf16.mxu1 %v6689_v45  ;;  %v6816_v52 = vcombine.low %v1031_v41, %v1035_v42 }
 0x225   :  { %v899_v48 = vld [vmem:[#allocation2 + $0xe0] sm:$0xff]  ;;  %2414 = vmatpush1.bf16.msra.mxu1 %v6688_v51 }
 0x226   :  { %v1023_v49 = vld [vmem:[#allocation2 + $0x4c0] sm:$0xff]  ;;  %v6681_v53 = vcombine.high %v895_v47, %v899_v48  ;;  %2456 = vmatprep.subr.bf16.mxu0 %v6817_v46  ;;  %v6680_v59 = vcombine.low %v895_v47, %v899_v48 }
 0x227   :  { %v1027_v50 = vld [vmem:[#allocation2 + $0x4e0] sm:$0xff]  ;;  %2457 = vmatpush1.bf16.msra.mxu0 %v6816_v52 }
 0x228   :  { %v6809_v54 = vcombine.high %v1023_v49, %v1027_v50  ;;  %v887_v55 = vld [vmem:[#allocation2 + $0x80] sm:$0xff]  ;;  %2415 = vmatprep.subr.bf16.mxu1 %v6681_v53  ;;  %v6808_v60 = vcombine.low %v1023_v49, %v1027_v50 }
 0x229   :  { %v891_v56 = vld [vmem:[#allocation2 + $0xa0] sm:$0xff]  ;;  %2416 = vmatpush1.bf16.msra.mxu1 %v6680_v59 }
 0x22a   :  { %v1015_v57 = vld [vmem:[#allocation2 + $0x480] sm:$0xff]  ;;  %v6673_v61 = vcombine.high %v887_v55, %v891_v56  ;;  %2458 = vmatprep.subr.bf16.mxu0 %v6809_v54  ;;  %v6672_v4 = vcombine.low %v887_v55, %v891_v56 }
 0x22b   :  { %v1019_v58 = vld [vmem:[#allocation2 + $0x4a0] sm:$0xff]  ;;  %2459 = vmatpush1.bf16.msra.mxu0 %v6808_v60 }
 0x22c   :  { %v6801_v62 = vcombine.high %v1015_v57, %v1019_v58  ;;  %v879_v63 = vld [vmem:[#allocation2 + $0x40] sm:$0xff]  ;;  %2417 = vmatprep.subr.bf16.mxu1 %v6673_v61  ;;  %v6800_v5 = vcombine.low %v1015_v57, %v1019_v58 }
 0x22d   :  { %v883_v1 = vld [vmem:[#allocation2 + $0x60] sm:$0xff]  ;;  %2418 = vmatpush1.bf16.msra.mxu1 %v6672_v4 }
 0x22e   :  { %v1007_v2 = vld [vmem:[#allocation2 + $0x440] sm:$0xff]  ;;  %v6665_v6 = vcombine.high %v879_v63, %v883_v1  ;;  %2460 = vmatprep.subr.bf16.mxu0 %v6801_v62  ;;  %v6664_v16 = vcombine.low %v879_v63, %v883_v1 }
 0x22f   :  { %v1011_v3 = vld [vmem:[#allocation2 + $0x460] sm:$0xff]  ;;  %2461 = vmatpush1.bf16.msra.mxu0 %v6800_v5 }
 0x230   :  { %v6793_v7 = vcombine.high %v1007_v2, %v1011_v3  ;;  %v871_v8 = vld [vmem:[#allocation2] sm:$0xff]  ;;  %2419 = vmatprep.subr.bf16.mxu1 %v6665_v6  ;;  %v6792_v17 = vcombine.low %v1007_v2, %v1011_v3 }
 0x231   :  { %v875_v11 = vld [vmem:[#allocation2 + $0x20] sm:$0xff]  ;;  %2420 = vmatpush1.bf16.msra.mxu1 %v6664_v16 }
 0x232   :  { %v999_v12 = vld [vmem:[#allocation2 + $0x400] sm:$0xff]  ;;  %v6657_v18 = vcombine.high %v871_v8, %v875_v11  ;;  %2462 = vmatprep.subr.bf16.mxu0 %v6793_v7  ;;  %v6656_v24 = vcombine.low %v871_v8, %v875_v11 }
 0x233   :  { %v1003_v15 = vld [vmem:[#allocation2 + $0x420] sm:$0xff]  ;;  %2463 = vmatpush1.bf16.msra.mxu0 %v6792_v17 }
 0x234   :  { %v6785_v19 = vcombine.high %v999_v12, %v1003_v15  ;;  %v991_v20 = vld [vmem:[#allocation2 + $0x3c0] sm:$0xff]  ;;  %2421 = vmatprep.subr.bf16.mxu1 %v6657_v18  ;;  %v6784_v26 = vcombine.low %v999_v12, %v1003_v15 }
 0x235   :  { %v995_v21 = vld [vmem:[#allocation2 + $0x3e0] sm:$0xff]  ;;  %2422 = vmatpush1.bf16.msra.mxu1 %v6656_v24 }
 0x236   :  { %v1119_v22 = vld [vmem:[#allocation2 + $0x7c0] sm:$0xff]  ;;  %v6777_v27 = vcombine.high %v991_v20, %v995_v21  ;;  %2464 = vmatprep.subr.bf16.mxu0 %v6785_v19  ;;  %v6776_v34 = vcombine.low %v991_v20, %v995_v21 }
 0x237   :  { %v1123_v23 = vld [vmem:[#allocation2 + $0x7e0] sm:$0xff]  ;;  %2465 = vmatpush1.bf16.msra.mxu0 %v6784_v26 }
 0x238   :  { %v6905_v28 = vcombine.high %v1119_v22, %v1123_v23  ;;  %v983_v29 = vld [vmem:[#allocation2 + $0x380] sm:$0xff]  ;;  %2423 = vmatprep.subr.bf16.mxu1 %v6777_v27  ;;  %v6904_v35 = vcombine.low %v1119_v22, %v1123_v23 }
 0x239   :  { %v987_v30 = vld [vmem:[#allocation2 + $0x3a0] sm:$0xff]  ;;  %2424 = vmatpush2.bf16.msra.mxu1 %v6776_v34 }
 0x23a   :  { %v1111_v32 = vld [vmem:[#allocation2 + $0x780] sm:$0xff]  ;;  %v6769_v36 = vcombine.high %v983_v29, %v987_v30  ;;  %2466 = vmatprep.subr.bf16.mxu0 %v6905_v28  ;;  %v6768_v42 = vcombine.low %v983_v29, %v987_v30  ;;  %v928_v28 = vld [vmem:[#allocation2 + $0x1c8] sm:$0xff] }
 0x23b   :  { %v1115_v33 = vld [vmem:[#allocation2 + $0x7a0] sm:$0xff]  ;;  %2467 = vmatpush2.bf16.msra.mxu0 %v6904_v35  ;;  %v932_v29 = vld [vmem:[#allocation2 + $0x1e8] sm:$0xff] }
 0x23c   :  { %v6897_v37 = vcombine.high %v1111_v32, %v1115_v33  ;;  %v975_v38 = vld [vmem:[#allocation2 + $0x340] sm:$0xff]  ;;  %2425 = vmatprep.subr.bf16.mxu1 %v6769_v36  ;;  %v6896_v43 = vcombine.low %v1111_v32, %v1115_v33  ;;  %v1056_v30 = vld [vmem:[#allocation2 + $0x5c8] sm:$0xff]  ;;  %v6715_v35 = vcombine.high %v928_v28, %v932_v29 }
 0x23d   :  { %v979_v39 = vld [vmem:[#allocation2 + $0x360] sm:$0xff]  ;;  %2426 = vmatpush2.bf16.msra.mxu1 %v6768_v42  ;;  %v1060_v32 = vld [vmem:[#allocation2 + $0x5e8] sm:$0xff] }
 0x23e   :  { %v1103_v40 = vld [vmem:[#allocation2 + $0x740] sm:$0xff]  ;;  %v6761_v44 = vcombine.high %v975_v38, %v979_v39  ;;  %2468 = vmatprep.subr.bf16.mxu0 %v6897_v37  ;;  %v6760_v50 = vcombine.low %v975_v38, %v979_v39  ;;  %v6843_v36 = vcombine.high %v1056_v30, %v1060_v32  ;;  %v920_v37 = vld [vmem:[#allocation2 + $0x188] sm:$0xff]  ;;  %v6842_v42 = vcombine.low %v1056_v30, %v1060_v32 }
 0x23f   :  { %v1107_v41 = vld [vmem:[#allocation2 + $0x760] sm:$0xff]  ;;  %2469 = vmatpush2.bf16.msra.mxu0 %v6896_v43  ;;  %v924_v38 = vld [vmem:[#allocation2 + $0x1a8] sm:$0xff] }
 0x240   :  { %v6889_v45 = vcombine.high %v1103_v40, %v1107_v41  ;;  %v967_v46 = vld [vmem:[#allocation2 + $0x300] sm:$0xff]  ;;  %2427 = vmatprep.subr.bf16.mxu1 %v6761_v44  ;;  %v6888_v51 = vcombine.low %v1103_v40, %v1107_v41  ;;  %v1048_v39 = vld [vmem:[#allocation2 + $0x588] sm:$0xff]  ;;  %v6714_v41 = vcombine.low %v928_v28, %v932_v29  ;;  %v6707_v43 = vcombine.high %v920_v37, %v924_v38 }
 0x241   :  { %v971_v47 = vld [vmem:[#allocation2 + $0x320] sm:$0xff]  ;;  %2428 = vmatpush2.bf16.msra.mxu1 %v6760_v50  ;;  %v1052_v40 = vld [vmem:[#allocation2 + $0x5a8] sm:$0xff] }
 0x242   :  { %v1095_v48 = vld [vmem:[#allocation2 + $0x700] sm:$0xff]  ;;  %v6753_v52 = vcombine.high %v967_v46, %v971_v47  ;;  %2470 = vmatprep.subr.bf16.mxu0 %v6889_v45  ;;  %v6752_v58 = vcombine.low %v967_v46, %v971_v47  ;;  %v6835_v44 = vcombine.high %v1048_v39, %v1052_v40  ;;  %v912_v45 = vld [vmem:[#allocation2 + $0x148] sm:$0xff]  ;;  %v6834_v50 = vcombine.low %v1048_v39, %v1052_v40 }
 0x243   :  { %v1099_v49 = vld [vmem:[#allocation2 + $0x720] sm:$0xff]  ;;  %2471 = vmatpush2.bf16.msra.mxu0 %v6888_v51  ;;  %v916_v46 = vld [vmem:[#allocation2 + $0x168] sm:$0xff] }
 0x244   :  { %v6881_v53 = vcombine.high %v1095_v48, %v1099_v49  ;;  %v959_v54 = vld [vmem:[#allocation2 + $0x2c0] sm:$0xff]  ;;  %2429 = vmatprep.subr.bf16.mxu1 %v6753_v52  ;;  %v6880_v59 = vcombine.low %v1095_v48, %v1099_v49  ;;  %v1040_v47 = vld [vmem:[#allocation2 + $0x548] sm:$0xff]  ;;  %v6706_v49 = vcombine.low %v920_v37, %v924_v38  ;;  %v6699_v51 = vcombine.high %v912_v45, %v916_v46 }
 0x245   :  { %v963_v55 = vld [vmem:[#allocation2 + $0x2e0] sm:$0xff]  ;;  %2430 = vmatpush2.bf16.msra.mxu1 %v6752_v58  ;;  %v1044_v48 = vld [vmem:[#allocation2 + $0x568] sm:$0xff] }
 0x246   :  { %v1087_v56 = vld [vmem:[#allocation2 + $0x6c0] sm:$0xff]  ;;  %v6745_v60 = vcombine.high %v959_v54, %v963_v55  ;;  %2472 = vmatprep.subr.bf16.mxu0 %v6881_v53  ;;  %v6744_v3 = vcombine.low %v959_v54, %v963_v55  ;;  %v6827_v52 = vcombine.high %v1040_v47, %v1044_v48  ;;  %v904_v53 = vld [vmem:[#allocation2 + $0x108] sm:$0xff]  ;;  %v6826_v58 = vcombine.low %v1040_v47, %v1044_v48 }
 0x247   :  { %v1091_v57 = vld [vmem:[#allocation2 + $0x6e0] sm:$0xff]  ;;  %2473 = vmatpush2.bf16.msra.mxu0 %v6880_v59  ;;  %v908_v54 = vld [vmem:[#allocation2 + $0x128] sm:$0xff] }
 0x248   :  { %v6873_v61 = vcombine.high %v1087_v56, %v1091_v57  ;;  %v951_v62 = vld [vmem:[#allocation2 + $0x280] sm:$0xff]  ;;  %2431 = vmatprep.subr.bf16.mxu1 %v6745_v60  ;;  %v6872_v4 = vcombine.low %v1087_v56, %v1091_v57  ;;  %v1032_v55 = vld [vmem:[#allocation2 + $0x508] sm:$0xff]  ;;  %v6698_v57 = vcombine.low %v912_v45, %v916_v46  ;;  %v6691_v59 = vcombine.high %v904_v53, %v908_v54 }
 0x249   :  { %v955_v63 = vld [vmem:[#allocation2 + $0x2a0] sm:$0xff]  ;;  %2432 = vmatpush2.bf16.msra.mxu1 %v6744_v3  ;;  %v1036_v56 = vld [vmem:[#allocation2 + $0x528] sm:$0xff] }
 0x24a   :  { %v1079_v1 = vld [vmem:[#allocation2 + $0x680] sm:$0xff]  ;;  %v6737_v5 = vcombine.high %v951_v62, %v955_v63  ;;  %2474 = vmatprep.subr.bf16.mxu0 %v6873_v61  ;;  %v6736_v15 = vcombine.low %v951_v62, %v955_v63  ;;  %v6819_v60 = vcombine.high %v1032_v55, %v1036_v56  ;;  %v896_v61 = vld [vmem:[#allocation2 + $0xc8] sm:$0xff]  ;;  %v6818_v3 = vcombine.low %v1032_v55, %v1036_v56 }
 0x24b   :  { %v1083_v2 = vld [vmem:[#allocation2 + $0x6a0] sm:$0xff]  ;;  %2475 = vmatpush2.bf16.msra.mxu0 %v6872_v4  ;;  %v900_v62 = vld [vmem:[#allocation2 + $0xe8] sm:$0xff] }
 0x24c   :  { %v6865_v6 = vcombine.high %v1079_v1, %v1083_v2  ;;  %v943_v7 = vld [vmem:[#allocation2 + $0x240] sm:$0xff]  ;;  %2433 = vmatprep.subr.bf16.mxu1 %v6737_v5  ;;  %v6864_v16 = vcombine.low %v1079_v1, %v1083_v2  ;;  %v1024_v63 = vld [vmem:[#allocation2 + $0x4c8] sm:$0xff]  ;;  %v6690_v2 = vcombine.low %v904_v53, %v908_v54  ;;  %v6683_v4 = vcombine.high %v896_v61, %v900_v62 }
 0x24d   :  { %v947_v8 = vld [vmem:[#allocation2 + $0x260] sm:$0xff]  ;;  %2434 = vmatpush2.bf16.msra.mxu1 %v6736_v15  ;;  %v1028_v1 = vld [vmem:[#allocation2 + $0x4e8] sm:$0xff] }
 0x24e   :  { %v1071_v11 = vld [vmem:[#allocation2 + $0x640] sm:$0xff]  ;;  %v6729_v17 = vcombine.high %v943_v7, %v947_v8  ;;  %2476 = vmatprep.subr.bf16.mxu0 %v6865_v6  ;;  %v6728_v23 = vcombine.low %v943_v7, %v947_v8  ;;  %v6811_v5 = vcombine.high %v1024_v63, %v1028_v1  ;;  %v888_v6 = vld [vmem:[#allocation2 + $0x88] sm:$0xff]  ;;  %v6810_v15 = vcombine.low %v1024_v63, %v1028_v1 }
 0x24f   :  { %v1075_v12 = vld [vmem:[#allocation2 + $0x660] sm:$0xff]  ;;  %2477 = vmatpush2.bf16.msra.mxu0 %v6864_v16  ;;  %v892_v7 = vld [vmem:[#allocation2 + $0xa8] sm:$0xff] }
 0x250   :  { %v6857_v18 = vcombine.high %v1071_v11, %v1075_v12  ;;  %v935_v19 = vld [vmem:[#allocation2 + $0x200] sm:$0xff]  ;;  %2435 = vmatprep.subr.bf16.mxu1 %v6729_v17  ;;  %v6856_v24 = vcombine.low %v1071_v11, %v1075_v12  ;;  %v1016_v8 = vld [vmem:[#allocation2 + $0x488] sm:$0xff]  ;;  %v6682_v12 = vcombine.low %v896_v61, %v900_v62  ;;  %v6675_v16 = vcombine.high %v888_v6, %v892_v7 }
 0x251   :  { %v939_v20 = vld [vmem:[#allocation2 + $0x220] sm:$0xff]  ;;  %2436 = vmatpush2.bf16.msra.mxu1 %v6728_v23  ;;  %v1020_v11 = vld [vmem:[#allocation2 + $0x4a8] sm:$0xff] }
 0x252   :  { %v1063_v21 = vld [vmem:[#allocation2 + $0x600] sm:$0xff]  ;;  %v6721_v26 = vcombine.high %v935_v19, %v939_v20  ;;  %2478 = vmatprep.subr.bf16.mxu0 %v6857_v18  ;;  %v6720_v33 = vcombine.low %v935_v19, %v939_v20  ;;  %v6803_v17 = vcombine.high %v1016_v8, %v1020_v11  ;;  %v880_v18 = vld [vmem:[#allocation2 + $0x48] sm:$0xff]  ;;  %v6802_v23 = vcombine.low %v1016_v8, %v1020_v11 }
 0x253   :  { %v1067_v22 = vld [vmem:[#allocation2 + $0x620] sm:$0xff]  ;;  %2479 = vmatpush2.bf16.msra.mxu0 %v6856_v24  ;;  %v884_v19 = vld [vmem:[#allocation2 + $0x68] sm:$0xff] }
 0x254   :  { %v6849_v27 = vcombine.high %v1063_v21, %v1067_v22  ;;  %2437 = vmatprep.subr.bf16.mxu1 %v6721_v26  ;;  %v6848_v34 = vcombine.low %v1063_v21, %v1067_v22  ;;  %v1008_v20 = vld [vmem:[#allocation2 + $0x448] sm:$0xff]  ;;  %v6674_v22 = vcombine.low %v888_v6, %v892_v7  ;;  %v6667_v24 = vcombine.high %v880_v18, %v884_v19 }
 0x255   :  { %2438 = vmatpush2.bf16.msra.mxu1 %v6720_v33  ;;  %v1012_v21 = vld [vmem:[#allocation2 + $0x468] sm:$0xff]  ;;  %v6666_v32 = vcombine.low %v880_v18, %v884_v19 }
 0x256   :  { %2480 = vmatprep.subr.bf16.mxu0 %v6849_v27  ;;  %2493 = vmatprep.subr.bf16.mxu1 %v6715_v35  ;;  %v6795_v26 = vcombine.high %v1008_v20, %v1012_v21  ;;  %v872_v27 = vld [vmem:[#allocation2 + $0x8] sm:$0xff]  ;;  %v6794_v33 = vcombine.low %v1008_v20, %v1012_v21 }
 0x257   :  { %2481 = vmatpush2.bf16.msra.mxu0 %v6848_v34  ;;  %v876_v28 = vld [vmem:[#allocation2 + $0x28] sm:$0xff] }
 0x258   :  { %2536 = vmatprep.subr.bf16.mxu0 %v6843_v36  ;;  %2440 = vmatmul.mubr.bf16.vlgmr.msra.gmra.mxu1 %v8570_v9  ;;  %v1000_v29 = vld [vmem:[#allocation2 + $0x408] sm:$0xff]  ;;  %v6659_v34 = vcombine.high %v872_v27, %v876_v28  ;;  %v6658_v40 = vcombine.low %v872_v27, %v876_v28 }
 0x259   :  { %2494 = vmatpush1.bf16.msra.mxu1 %v6714_v41  ;;  %2525 = vmatprep.mubr.bf16.mxu1 %v8576_v13  ;;  %v1004_v30 = vld [vmem:[#allocation2 + $0x428] sm:$0xff] }
 0x25a   :  { %2483 = vmatmul.mubr.bf16.vlgmr.msra.gmra.mxu0 %v8573_v10  ;;  %2495 = vmatprep.subr.bf16.mxu1 %v6707_v43  ;;  %v6787_v35 = vcombine.high %v1000_v29, %v1004_v30  ;;  %v992_v36 = vld [vmem:[#allocation2 + $0x3c8] sm:$0xff]  ;;  %v6786_v41 = vcombine.low %v1000_v29, %v1004_v30 }
 0x25b   :  { %2537 = vmatpush1.bf16.msra.mxu0 %v6842_v42  ;;  %2568 = vmatprep.mubr.bf16.mxu0 %v8579_v14  ;;  %v996_v37 = vld [vmem:[#allocation2 + $0x3e8] sm:$0xff] }
 0x25c   :  { %2538 = vmatprep.subr.bf16.mxu0 %v6835_v44  ;;  %v1120_v38 = vld [vmem:[#allocation2 + $0x7c8] sm:$0xff]  ;;  %v6779_v42 = vcombine.high %v992_v36, %v996_v37  ;;  %v6778_v48 = vcombine.low %v992_v36, %v996_v37 }
 0x25d   :  { %2496 = vmatpush1.bf16.msra.mxu1 %v6706_v49  ;;  %v1124_v39 = vld [vmem:[#allocation2 + $0x7e8] sm:$0xff] }
 0x25e   :  { %2497 = vmatprep.subr.bf16.mxu1 %v6699_v51  ;;  %v6907_v43 = vcombine.high %v1120_v38, %v1124_v39  ;;  %v984_v44 = vld [vmem:[#allocation2 + $0x388] sm:$0xff]  ;;  %v6906_v49 = vcombine.low %v1120_v38, %v1124_v39 }
 0x25f   :  { %2539 = vmatpush1.bf16.msra.mxu0 %v6834_v50  ;;  %v988_v45 = vld [vmem:[#allocation2 + $0x3a8] sm:$0xff] }
 0x260   :  { %2540 = vmatprep.subr.bf16.mxu0 %v6827_v52  ;;  %v1112_v46 = vld [vmem:[#allocation2 + $0x788] sm:$0xff]  ;;  %v6771_v50 = vcombine.high %v984_v44, %v988_v45  ;;  %v6770_v56 = vcombine.low %v984_v44, %v988_v45  ;;  %v933_v44 = vld [vmem:[#allocation2 + $0x1f0] sm:$0xff] }
 0x261   :  { %2498 = vmatpush1.bf16.msra.mxu1 %v6698_v57  ;;  %v1116_v47 = vld [vmem:[#allocation2 + $0x7a8] sm:$0xff]  ;;  %v1057_v45 = vld [vmem:[#allocation2 + $0x5d0] sm:$0xff] }
 0x262   :  { %2499 = vmatprep.subr.bf16.mxu1 %v6691_v59  ;;  %v6899_v51 = vcombine.high %v1112_v46, %v1116_v47  ;;  %v976_v52 = vld [vmem:[#allocation2 + $0x348] sm:$0xff]  ;;  %v6898_v57 = vcombine.low %v1112_v46, %v1116_v47  ;;  %v1061_v46 = vld [vmem:[#allocation2 + $0x5f0] sm:$0xff] }
 0x263   :  { %2541 = vmatpush1.bf16.msra.mxu0 %v6826_v58  ;;  %v980_v53 = vld [vmem:[#allocation2 + $0x368] sm:$0xff] }
 0x264   :  { %2542 = vmatprep.subr.bf16.mxu0 %v6819_v60  ;;  %v1104_v54 = vld [vmem:[#allocation2 + $0x748] sm:$0xff]  ;;  %v6763_v58 = vcombine.high %v976_v52, %v980_v53  ;;  %v6762_v1 = vcombine.low %v976_v52, %v980_v53  ;;  %v925_v52 = vld [vmem:[#allocation2 + $0x1b0] sm:$0xff] }
 0x265   :  { %2500 = vmatpush1.bf16.msra.mxu1 %v6690_v2  ;;  %v1108_v55 = vld [vmem:[#allocation2 + $0x768] sm:$0xff]  ;;  %v1049_v53 = vld [vmem:[#allocation2 + $0x590] sm:$0xff] }
 0x266   :  { %2501 = vmatprep.subr.bf16.mxu1 %v6683_v4  ;;  %v6891_v59 = vcombine.high %v1104_v54, %v1108_v55  ;;  %v968_v60 = vld [vmem:[#allocation2 + $0x308] sm:$0xff]  ;;  %v6890_v2 = vcombine.low %v1104_v54, %v1108_v55  ;;  %v1053_v54 = vld [vmem:[#allocation2 + $0x5b0] sm:$0xff] }
 0x267   :  { %2543 = vmatpush1.bf16.msra.mxu0 %v6818_v3  ;;  %v972_v61 = vld [vmem:[#allocation2 + $0x328] sm:$0xff] }
 0x268   :  { %2544 = vmatprep.subr.bf16.mxu0 %v6811_v5  ;;  %v1096_v62 = vld [vmem:[#allocation2 + $0x708] sm:$0xff]  ;;  %v6755_v3 = vcombine.high %v968_v60, %v972_v61  ;;  %v6754_v11 = vcombine.low %v968_v60, %v972_v61  ;;  %v917_v60 = vld [vmem:[#allocation2 + $0x170] sm:$0xff] }
 0x269   :  { %2502 = vmatpush1.bf16.msra.mxu1 %v6682_v12  ;;  %v1100_v63 = vld [vmem:[#allocation2 + $0x728] sm:$0xff]  ;;  %v1041_v61 = vld [vmem:[#allocation2 + $0x550] sm:$0xff] }
 0x26a   :  { %2503 = vmatprep.subr.bf16.mxu1 %v6675_v16  ;;  %v6883_v4 = vcombine.high %v1096_v62, %v1100_v63  ;;  %v960_v5 = vld [vmem:[#allocation2 + $0x2c8] sm:$0xff]  ;;  %v6882_v12 = vcombine.low %v1096_v62, %v1100_v63  ;;  %v1045_v62 = vld [vmem:[#allocation2 + $0x570] sm:$0xff] }
 0x26b   :  { %2545 = vmatpush1.bf16.msra.mxu0 %v6810_v15  ;;  %v964_v6 = vld [vmem:[#allocation2 + $0x2e8] sm:$0xff] }
 0x26c   :  { %2546 = vmatprep.subr.bf16.mxu0 %v6803_v17  ;;  %v1088_v7 = vld [vmem:[#allocation2 + $0x6c8] sm:$0xff]  ;;  %v6747_v15 = vcombine.high %v960_v5, %v964_v6  ;;  %v6746_v21 = vcombine.low %v960_v5, %v964_v6  ;;  %v909_v5 = vld [vmem:[#allocation2 + $0x130] sm:$0xff] }
 0x26d   :  { %2504 = vmatpush1.bf16.msra.mxu1 %v6674_v22  ;;  %v1092_v8 = vld [vmem:[#allocation2 + $0x6e8] sm:$0xff]  ;;  %v1033_v6 = vld [vmem:[#allocation2 + $0x510] sm:$0xff] }
 0x26e   :  { %2505 = vmatprep.subr.bf16.mxu1 %v6667_v24  ;;  %v6875_v16 = vcombine.high %v1088_v7, %v1092_v8  ;;  %v952_v17 = vld [vmem:[#allocation2 + $0x288] sm:$0xff]  ;;  %v6874_v22 = vcombine.low %v1088_v7, %v1092_v8  ;;  %v1037_v7 = vld [vmem:[#allocation2 + $0x530] sm:$0xff] }
 0x26f   :  { %2547 = vmatpush1.bf16.msra.mxu0 %v6802_v23  ;;  %v956_v18 = vld [vmem:[#allocation2 + $0x2a8] sm:$0xff] }
 0x270   :  { %2548 = vmatprep.subr.bf16.mxu0 %v6795_v26  ;;  %v1080_v19 = vld [vmem:[#allocation2 + $0x688] sm:$0xff]  ;;  %v6739_v23 = vcombine.high %v952_v17, %v956_v18  ;;  %v6738_v30 = vcombine.low %v952_v17, %v956_v18  ;;  %v901_v17 = vld [vmem:[#allocation2 + $0xf0] sm:$0xff] }
 0x271   :  { %2506 = vmatpush1.bf16.msra.mxu1 %v6666_v32  ;;  %v1084_v20 = vld [vmem:[#allocation2 + $0x6a8] sm:$0xff]  ;;  %v1025_v18 = vld [vmem:[#allocation2 + $0x4d0] sm:$0xff] }
 0x272   :  { %2507 = vmatprep.subr.bf16.mxu1 %v6659_v34  ;;  %v6867_v24 = vcombine.high %v1080_v19, %v1084_v20  ;;  %v944_v26 = vld [vmem:[#allocation2 + $0x248] sm:$0xff]  ;;  %v6866_v32 = vcombine.low %v1080_v19, %v1084_v20  ;;  %v1029_v19 = vld [vmem:[#allocation2 + $0x4f0] sm:$0xff] }
 0x273   :  { %2549 = vmatpush1.bf16.msra.mxu0 %v6794_v33  ;;  %v948_v27 = vld [vmem:[#allocation2 + $0x268] sm:$0xff] }
 0x274   :  { %2550 = vmatprep.subr.bf16.mxu0 %v6787_v35  ;;  %v1072_v28 = vld [vmem:[#allocation2 + $0x648] sm:$0xff]  ;;  %v6731_v33 = vcombine.high %v944_v26, %v948_v27  ;;  %v6730_v39 = vcombine.low %v944_v26, %v948_v27  ;;  %v893_v26 = vld [vmem:[#allocation2 + $0xb0] sm:$0xff] }
 0x275   :  { %2508 = vmatpush1.bf16.msra.mxu1 %v6658_v40  ;;  %v1076_v29 = vld [vmem:[#allocation2 + $0x668] sm:$0xff]  ;;  %v1017_v27 = vld [vmem:[#allocation2 + $0x490] sm:$0xff] }
 0x276   :  { %2509 = vmatprep.subr.bf16.mxu1 %v6779_v42  ;;  %v6859_v34 = vcombine.high %v1072_v28, %v1076_v29  ;;  %v936_v35 = vld [vmem:[#allocation2 + $0x208] sm:$0xff]  ;;  %v6858_v40 = vcombine.low %v1072_v28, %v1076_v29  ;;  %v1021_v28 = vld [vmem:[#allocation2 + $0x4b0] sm:$0xff] }
 0x277   :  { %2551 = vmatpush1.bf16.msra.mxu0 %v6786_v41  ;;  %v940_v36 = vld [vmem:[#allocation2 + $0x228] sm:$0xff] }
 0x278   :  { %2552 = vmatprep.subr.bf16.mxu0 %v6907_v43  ;;  %v1064_v37 = vld [vmem:[#allocation2 + $0x608] sm:$0xff]  ;;  %v6723_v41 = vcombine.high %v936_v35, %v940_v36  ;;  %v929_v43 = vld [vmem:[#allocation2 + $0x1d0] sm:$0xff]  ;;  %v6722_v47 = vcombine.low %v936_v35, %v940_v36 }
 0x279   :  { %2510 = vmatpush2.bf16.msra.mxu1 %v6778_v48  ;;  %v1068_v38 = vld [vmem:[#allocation2 + $0x628] sm:$0xff]  ;;  %v6716_v55 = vcombine.low %v929_v43, %v933_v44  ;;  %v885_v35 = vld [vmem:[#allocation2 + $0x70] sm:$0xff] }
 0x27a   :  { %2511 = vmatprep.subr.bf16.mxu1 %v6771_v50  ;;  %v6851_v42 = vcombine.high %v1064_v37, %v1068_v38  ;;  %v6850_v48 = vcombine.low %v1064_v37, %v1068_v38  ;;  %v6845_v50 = vcombine.high %v1057_v45, %v1061_v46  ;;  %v1009_v36 = vld [vmem:[#allocation2 + $0x450] sm:$0xff] }
 0x27b   :  { %2553 = vmatpush2.bf16.msra.mxu0 %v6906_v49  ;;  %v6717_v49 = vcombine.high %v929_v43, %v933_v44  ;;  %v1013_v37 = vld [vmem:[#allocation2 + $0x470] sm:$0xff] }
 0x27c   :  { %2554 = vmatprep.subr.bf16.mxu0 %v6899_v51  ;;  %v921_v51 = vld [vmem:[#allocation2 + $0x190] sm:$0xff] }
 0x27d   :  { %2512 = vmatpush2.bf16.msra.mxu1 %v6770_v56  ;;  %v6844_v56 = vcombine.low %v1057_v45, %v1061_v46  ;;  %v6708_v63 = vcombine.low %v921_v51, %v925_v52  ;;  %v877_v43 = vld [vmem:[#allocation2 + $0x30] sm:$0xff] }
 0x27e   :  { %2513 = vmatprep.subr.bf16.mxu1 %v6763_v58  ;;  %v6837_v58 = vcombine.high %v1049_v53, %v1053_v54  ;;  %v1001_v44 = vld [vmem:[#allocation2 + $0x410] sm:$0xff] }
 0x27f   :  { %2555 = vmatpush2.bf16.msra.mxu0 %v6898_v57  ;;  %v6709_v57 = vcombine.high %v921_v51, %v925_v52  ;;  %v1005_v45 = vld [vmem:[#allocation2 + $0x430] sm:$0xff] }
 0x280   :  { %2556 = vmatprep.subr.bf16.mxu0 %v6891_v59  ;;  %v913_v59 = vld [vmem:[#allocation2 + $0x150] sm:$0xff] }
 0x281   :  { %2514 = vmatpush2.bf16.msra.mxu1 %v6762_v1  ;;  %v6836_v1 = vcombine.low %v1049_v53, %v1053_v54  ;;  %v6700_v8 = vcombine.low %v913_v59, %v917_v60  ;;  %v997_v51 = vld [vmem:[#allocation2 + $0x3f0] sm:$0xff] }
 0x282   :  { %2515 = vmatprep.subr.bf16.mxu1 %v6755_v3  ;;  %v6829_v3 = vcombine.high %v1041_v61, %v1045_v62  ;;  %v1121_v52 = vld [vmem:[#allocation2 + $0x7d0] sm:$0xff] }
 0x283   :  { %2557 = vmatpush2.bf16.msra.mxu0 %v6890_v2  ;;  %v6701_v2 = vcombine.high %v913_v59, %v917_v60  ;;  %v1125_v53 = vld [vmem:[#allocation2 + $0x7f0] sm:$0xff] }
 0x284   :  { %2558 = vmatprep.subr.bf16.mxu0 %v6883_v4  ;;  %v905_v4 = vld [vmem:[#allocation2 + $0x110] sm:$0xff] }
 0x285   :  { %2516 = vmatpush2.bf16.msra.mxu1 %v6754_v11  ;;  %v6828_v11 = vcombine.low %v1041_v61, %v1045_v62  ;;  %v6692_v20 = vcombine.low %v905_v4, %v909_v5  ;;  %v989_v59 = vld [vmem:[#allocation2 + $0x3b0] sm:$0xff] }
 0x286   :  { %2517 = vmatprep.subr.bf16.mxu1 %v6747_v15  ;;  %v6821_v15 = vcombine.high %v1033_v6, %v1037_v7  ;;  %v1113_v60 = vld [vmem:[#allocation2 + $0x790] sm:$0xff] }
 0x287   :  { %2559 = vmatpush2.bf16.msra.mxu0 %v6882_v12  ;;  %v6693_v12 = vcombine.high %v905_v4, %v909_v5  ;;  %v1117_v61 = vld [vmem:[#allocation2 + $0x7b0] sm:$0xff] }
 0x288   :  { %2560 = vmatprep.subr.bf16.mxu0 %v6875_v16  ;;  %v897_v16 = vld [vmem:[#allocation2 + $0xd0] sm:$0xff] }
 0x289   :  { %2518 = vmatpush2.bf16.msra.mxu1 %v6746_v21  ;;  %v6820_v21 = vcombine.low %v1033_v6, %v1037_v7  ;;  %v6684_v29 = vcombine.low %v897_v16, %v901_v17  ;;  %v981_v4 = vld [vmem:[#allocation2 + $0x370] sm:$0xff] }
 0x28a   :  { %2519 = vmatprep.subr.bf16.mxu1 %v6739_v23  ;;  %v6813_v23 = vcombine.high %v1025_v18, %v1029_v19  ;;  %v1105_v5 = vld [vmem:[#allocation2 + $0x750] sm:$0xff] }
 0x28b   :  { %2561 = vmatpush2.bf16.msra.mxu0 %v6874_v22  ;;  %v6685_v22 = vcombine.high %v897_v16, %v901_v17  ;;  %v1109_v6 = vld [vmem:[#allocation2 + $0x770] sm:$0xff] }
 0x28c   :  { %2562 = vmatprep.subr.bf16.mxu0 %v6867_v24  ;;  %v889_v24 = vld [vmem:[#allocation2 + $0x90] sm:$0xff] }
 0x28d   :  { %2520 = vmatpush2.bf16.msra.mxu1 %v6738_v30  ;;  %v6812_v30 = vcombine.low %v1025_v18, %v1029_v19  ;;  %v6676_v38 = vcombine.low %v889_v24, %v893_v26  ;;  %v973_v16 = vld [vmem:[#allocation2 + $0x330] sm:$0xff] }
 0x28e   :  { %2521 = vmatprep.subr.bf16.mxu1 %v6731_v33  ;;  %v6805_v33 = vcombine.high %v1017_v27, %v1021_v28  ;;  %v1097_v17 = vld [vmem:[#allocation2 + $0x710] sm:$0xff] }
 0x28f   :  { %2563 = vmatpush2.bf16.msra.mxu0 %v6866_v32  ;;  %v6677_v32 = vcombine.high %v889_v24, %v893_v26  ;;  %v1101_v18 = vld [vmem:[#allocation2 + $0x730] sm:$0xff] }
 0x290   :  { %2564 = vmatprep.subr.bf16.mxu0 %v6859_v34  ;;  %v881_v34 = vld [vmem:[#allocation2 + $0x50] sm:$0xff] }
 0x291   :  { %2522 = vmatpush2.bf16.msra.mxu1 %v6730_v39  ;;  %v6804_v39 = vcombine.low %v1017_v27, %v1021_v28  ;;  %v6668_v46 = vcombine.low %v881_v34, %v885_v35  ;;  %v965_v24 = vld [vmem:[#allocation2 + $0x2f0] sm:$0xff] }
 0x292   :  { %2523 = vmatprep.subr.bf16.mxu1 %v6723_v41  ;;  %v6797_v41 = vcombine.high %v1009_v36, %v1013_v37  ;;  %v1089_v26 = vld [vmem:[#allocation2 + $0x6d0] sm:$0xff] }
 0x293   :  { %2565 = vmatpush2.bf16.msra.mxu0 %v6858_v40  ;;  %v6669_v40 = vcombine.high %v881_v34, %v885_v35  ;;  %v1093_v27 = vld [vmem:[#allocation2 + $0x6f0] sm:$0xff] }
 0x294   :  { %2566 = vmatprep.subr.bf16.mxu0 %v6851_v42  ;;  %v873_v42 = vld [vmem:[#allocation2 + $0x10] sm:$0xff] }
 0x295   :  { %2524 = vmatpush2.bf16.msra.mxu1 %v6722_v47  ;;  %v6796_v47 = vcombine.low %v1009_v36, %v1013_v37  ;;  %v6660_v54 = vcombine.low %v873_v42, %v877_v43  ;;  %v957_v34 = vld [vmem:[#allocation2 + $0x2b0] sm:$0xff] }
 0x296   :  { %2579 = vmatprep.subr.bf16.mxu1 %v6717_v49  ;;  %v6789_v49 = vcombine.high %v1001_v44, %v1005_v45  ;;  %v1081_v35 = vld [vmem:[#allocation2 + $0x690] sm:$0xff] }
 0x297   :  { %2567 = vmatpush2.bf16.msra.mxu0 %v6850_v48  ;;  %v6661_v48 = vcombine.high %v873_v42, %v877_v43  ;;  %v1085_v36 = vld [vmem:[#allocation2 + $0x6b0] sm:$0xff] }
 0x298   :  { %2622 = vmatprep.subr.bf16.mxu0 %v6845_v50  ;;  %2526 = vmatmul.mubr.bf16.vlgmr.msra.gmra.mxu1 %v8570_v9  ;;  %v993_v50 = vld [vmem:[#allocation2 + $0x3d0] sm:$0xff] }
 0x299   :  { %2580 = vmatpush1.bf16.msra.mxu1 %v6716_v55  ;;  %2611 = vmatprep.mubr.bf16.mxu1 %v8576_v13  ;;  %v6788_v55 = vcombine.low %v1001_v44, %v1005_v45  ;;  %v6780_v62 = vcombine.low %v993_v50, %v997_v51  ;;  %v949_v42 = vld [vmem:[#allocation2 + $0x270] sm:$0xff] }
 0x29a   :  { %2569 = vmatmul.mubr.bf16.vlgmr.msra.gmra.mxu0 %v8573_v10  ;;  %2581 = vmatprep.subr.bf16.mxu1 %v6709_v57  ;;  %v6909_v57 = vcombine.high %v1121_v52, %v1125_v53  ;;  %v1073_v43 = vld [vmem:[#allocation2 + $0x650] sm:$0xff] }
 0x29b   :  { %2623 = vmatpush1.bf16.msra.mxu0 %v6844_v56  ;;  %2654 = vmatprep.mubr.bf16.mxu0 %v8579_v14  ;;  %v6781_v56 = vcombine.high %v993_v50, %v997_v51  ;;  %v1077_v44 = vld [vmem:[#allocation2 + $0x670] sm:$0xff] }
 0x29c   :  { %2624 = vmatprep.subr.bf16.mxu0 %v6837_v58  ;;  %v985_v58 = vld [vmem:[#allocation2 + $0x390] sm:$0xff] }
 0x29d   :  { %2582 = vmatpush1.bf16.msra.mxu1 %v6708_v63  ;;  %v6908_v63 = vcombine.low %v1121_v52, %v1125_v53  ;;  %v6772_v7 = vcombine.low %v985_v58, %v989_v59  ;;  %v941_v50 = vld [vmem:[#allocation2 + $0x230] sm:$0xff] }
 0x29e   :  { %2583 = vmatprep.subr.bf16.mxu1 %v6701_v2  ;;  %v6901_v2 = vcombine.high %v1113_v60, %v1117_v61  ;;  %v1065_v51 = vld [vmem:[#allocation2 + $0x610] sm:$0xff] }
 0x29f   :  { %2625 = vmatpush1.bf16.msra.mxu0 %v6836_v1  ;;  %v6773_v1 = vcombine.high %v985_v58, %v989_v59  ;;  %v1069_v52 = vld [vmem:[#allocation2 + $0x630] sm:$0xff]  ;;  %v934_v58 = vld [vmem:[#allocation2 + $0x1f8] sm:$0xff] }
 0x2a0   :  { %2626 = vmatprep.subr.bf16.mxu0 %v6829_v3  ;;  %v977_v3 = vld [vmem:[#allocation2 + $0x350] sm:$0xff]  ;;  %v1058_v59 = vld [vmem:[#allocation2 + $0x5d8] sm:$0xff] }
 0x2a1   :  { %2584 = vmatpush1.bf16.msra.mxu1 %v6700_v8  ;;  %v6900_v8 = vcombine.low %v1113_v60, %v1117_v61  ;;  %v6764_v19 = vcombine.low %v977_v3, %v981_v4  ;;  %v1062_v60 = vld [vmem:[#allocation2 + $0x5f8] sm:$0xff] }
 0x2a2   :  { %2585 = vmatprep.subr.bf16.mxu1 %v6693_v12  ;;  %v6893_v12 = vcombine.high %v1105_v5, %v1109_v6 }
 0x2a3   :  { %2627 = vmatpush1.bf16.msra.mxu0 %v6828_v11  ;;  %v6765_v11 = vcombine.high %v977_v3, %v981_v4  ;;  %v926_v3 = vld [vmem:[#allocation2 + $0x1b8] sm:$0xff] }
 0x2a4   :  { %2628 = vmatprep.subr.bf16.mxu0 %v6821_v15  ;;  %v969_v15 = vld [vmem:[#allocation2 + $0x310] sm:$0xff]  ;;  %v1050_v4 = vld [vmem:[#allocation2 + $0x598] sm:$0xff] }
 0x2a5   :  { %2586 = vmatpush1.bf16.msra.mxu1 %v6692_v20  ;;  %v6892_v20 = vcombine.low %v1105_v5, %v1109_v6  ;;  %v6756_v28 = vcombine.low %v969_v15, %v973_v16  ;;  %v1054_v5 = vld [vmem:[#allocation2 + $0x5b8] sm:$0xff] }
 0x2a6   :  { %2587 = vmatprep.subr.bf16.mxu1 %v6685_v22  ;;  %v6885_v22 = vcombine.high %v1097_v17, %v1101_v18 }
 0x2a7   :  { %2629 = vmatpush1.bf16.msra.mxu0 %v6820_v21  ;;  %v6757_v21 = vcombine.high %v969_v15, %v973_v16  ;;  %v918_v15 = vld [vmem:[#allocation2 + $0x178] sm:$0xff] }
 0x2a8   :  { %2630 = vmatprep.subr.bf16.mxu0 %v6813_v23  ;;  %v961_v23 = vld [vmem:[#allocation2 + $0x2d0] sm:$0xff]  ;;  %v1042_v16 = vld [vmem:[#allocation2 + $0x558] sm:$0xff] }
 0x2a9   :  { %2588 = vmatpush1.bf16.msra.mxu1 %v6684_v29  ;;  %v6884_v29 = vcombine.low %v1097_v17, %v1101_v18  ;;  %v6748_v37 = vcombine.low %v961_v23, %v965_v24  ;;  %v1046_v17 = vld [vmem:[#allocation2 + $0x578] sm:$0xff] }
 0x2aa   :  { %2589 = vmatprep.subr.bf16.mxu1 %v6677_v32  ;;  %v6877_v32 = vcombine.high %v1089_v26, %v1093_v27 }
 0x2ab   :  { %2631 = vmatpush1.bf16.msra.mxu0 %v6812_v30  ;;  %v6749_v30 = vcombine.high %v961_v23, %v965_v24  ;;  %v910_v23 = vld [vmem:[#allocation2 + $0x138] sm:$0xff] }
 0x2ac   :  { %2632 = vmatprep.subr.bf16.mxu0 %v6805_v33  ;;  %v953_v33 = vld [vmem:[#allocation2 + $0x290] sm:$0xff]  ;;  %v1034_v24 = vld [vmem:[#allocation2 + $0x518] sm:$0xff] }
 0x2ad   :  { %2590 = vmatpush1.bf16.msra.mxu1 %v6676_v38  ;;  %v6876_v38 = vcombine.low %v1089_v26, %v1093_v27  ;;  %v6740_v45 = vcombine.low %v953_v33, %v957_v34  ;;  %v1038_v26 = vld [vmem:[#allocation2 + $0x538] sm:$0xff] }
 0x2ae   :  { %2591 = vmatprep.subr.bf16.mxu1 %v6669_v40  ;;  %v6869_v40 = vcombine.high %v1081_v35, %v1085_v36 }
 0x2af   :  { %2633 = vmatpush1.bf16.msra.mxu0 %v6804_v39  ;;  %v6741_v39 = vcombine.high %v953_v33, %v957_v34  ;;  %v902_v33 = vld [vmem:[#allocation2 + $0xf8] sm:$0xff] }
 0x2b0   :  { %2634 = vmatprep.subr.bf16.mxu0 %v6797_v41  ;;  %v945_v41 = vld [vmem:[#allocation2 + $0x250] sm:$0xff]  ;;  %v1026_v34 = vld [vmem:[#allocation2 + $0x4d8] sm:$0xff] }
 0x2b1   :  { %2592 = vmatpush1.bf16.msra.mxu1 %v6668_v46  ;;  %v6868_v46 = vcombine.low %v1081_v35, %v1085_v36  ;;  %v6732_v53 = vcombine.low %v945_v41, %v949_v42  ;;  %v1030_v35 = vld [vmem:[#allocation2 + $0x4f8] sm:$0xff] }
 0x2b2   :  { %2593 = vmatprep.subr.bf16.mxu1 %v6661_v48  ;;  %v6861_v48 = vcombine.high %v1073_v43, %v1077_v44 }
 0x2b3   :  { %2635 = vmatpush1.bf16.msra.mxu0 %v6796_v47  ;;  %v6733_v47 = vcombine.high %v945_v41, %v949_v42  ;;  %v1022_v41 = vld [vmem:[#allocation2 + $0x4b8] sm:$0xff] }
 0x2b4   :  { %2636 = vmatprep.subr.bf16.mxu0 %v6789_v49  ;;  %v937_v49 = vld [vmem:[#allocation2 + $0x210] sm:$0xff] }
 0x2b5   :  { %2594 = vmatpush1.bf16.msra.mxu1 %v6660_v54  ;;  %v6860_v54 = vcombine.low %v1073_v43, %v1077_v44  ;;  %v6724_v61 = vcombine.low %v937_v49, %v941_v50  ;;  %v6814_v43 = vcombine.low %v1026_v34, %v1030_v35 }
 0x2b6   :  { %2595 = vmatprep.subr.bf16.mxu1 %v6781_v56  ;;  %v6853_v56 = vcombine.high %v1065_v51, %v1069_v52 }
 0x2b7   :  { %2637 = vmatpush1.bf16.msra.mxu0 %v6788_v55  ;;  %v6725_v55 = vcombine.high %v937_v49, %v941_v50  ;;  %v1014_v49 = vld [vmem:[#allocation2 + $0x478] sm:$0xff] }
 0x2b8   :  { %2638 = vmatprep.subr.bf16.mxu0 %v6909_v57  ;;  %v930_v57 = vld [vmem:[#allocation2 + $0x1d8] sm:$0xff] }
 0x2b9   :  { %2596 = vmatpush2.bf16.msra.mxu1 %v6780_v62  ;;  %v6852_v62 = vcombine.low %v1065_v51, %v1069_v52  ;;  %v6718_v6 = vcombine.low %v930_v57, %v934_v58 }
 0x2ba   :  { %2597 = vmatprep.subr.bf16.mxu1 %v6773_v1  ;;  %v6847_v1 = vcombine.high %v1058_v59, %v1062_v60 }
 0x2bb   :  { %2639 = vmatpush2.bf16.msra.mxu0 %v6908_v63  ;;  %v6719_v63 = vcombine.high %v930_v57, %v934_v58  ;;  %v1006_v57 = vld [vmem:[#allocation2 + $0x438] sm:$0xff] }
 0x2bc   :  { %2640 = vmatprep.subr.bf16.mxu0 %v6901_v2  ;;  %v922_v2 = vld [vmem:[#allocation2 + $0x198] sm:$0xff] }
 0x2bd   :  { %2598 = vmatpush2.bf16.msra.mxu1 %v6772_v7  ;;  %v6846_v7 = vcombine.low %v1058_v59, %v1062_v60  ;;  %v6710_v18 = vcombine.low %v922_v2, %v926_v3 }
 0x2be   :  { %2599 = vmatprep.subr.bf16.mxu1 %v6765_v11  ;;  %v6839_v11 = vcombine.high %v1050_v4, %v1054_v5 }
 0x2bf   :  { %2641 = vmatpush2.bf16.msra.mxu0 %v6900_v8  ;;  %v6711_v8 = vcombine.high %v922_v2, %v926_v3  ;;  %v1126_v2 = vld [vmem:[#allocation2 + $0x7f8] sm:$0xff] }
 0x2c0   :  { %2642 = vmatprep.subr.bf16.mxu0 %v6893_v12  ;;  %v914_v12 = vld [vmem:[#allocation2 + $0x158] sm:$0xff] }
 0x2c1   :  { %2600 = vmatpush2.bf16.msra.mxu1 %v6764_v19  ;;  %v6838_v19 = vcombine.low %v1050_v4, %v1054_v5  ;;  %v6702_v27 = vcombine.low %v914_v12, %v918_v15 }
 0x2c2   :  { %2601 = vmatprep.subr.bf16.mxu1 %v6757_v21  ;;  %v6831_v21 = vcombine.high %v1042_v16, %v1046_v17 }
 0x2c3   :  { %2643 = vmatpush2.bf16.msra.mxu0 %v6892_v20  ;;  %v6703_v20 = vcombine.high %v914_v12, %v918_v15  ;;  %v1118_v12 = vld [vmem:[#allocation2 + $0x7b8] sm:$0xff] }
 0x2c4   :  { %2644 = vmatprep.subr.bf16.mxu0 %v6885_v22  ;;  %v906_v22 = vld [vmem:[#allocation2 + $0x118] sm:$0xff] }
 0x2c5   :  { %2602 = vmatpush2.bf16.msra.mxu1 %v6756_v28  ;;  %v6830_v28 = vcombine.low %v1042_v16, %v1046_v17  ;;  %v6694_v36 = vcombine.low %v906_v22, %v910_v23 }
 0x2c6   :  { %2603 = vmatprep.subr.bf16.mxu1 %v6749_v30  ;;  %v6823_v30 = vcombine.high %v1034_v24, %v1038_v26 }
 0x2c7   :  { %2645 = vmatpush2.bf16.msra.mxu0 %v6884_v29  ;;  %v6695_v29 = vcombine.high %v906_v22, %v910_v23  ;;  %v1110_v22 = vld [vmem:[#allocation2 + $0x778] sm:$0xff] }
 0x2c8   :  { %2646 = vmatprep.subr.bf16.mxu0 %v6877_v32  ;;  %v898_v32 = vld [vmem:[#allocation2 + $0xd8] sm:$0xff] }
 0x2c9   :  { %2604 = vmatpush2.bf16.msra.mxu1 %v6748_v37  ;;  %v6687_v37 = vcombine.high %v898_v32, %v902_v33  ;;  %v6686_v42 = vcombine.low %v898_v32, %v902_v33  ;;  %v1102_v32 = vld [vmem:[#allocation2 + $0x738] sm:$0xff] }
 0x2ca   :  { %2605 = vmatprep.subr.bf16.mxu1 %v6741_v39  ;;  %v894_v39 = vld [vmem:[#allocation2 + $0xb8] sm:$0xff] }
 0x2cb   :  { %2647 = vmatpush2.bf16.msra.mxu0 %v6876_v38  ;;  %v890_v38 = vld [vmem:[#allocation2 + $0x98] sm:$0xff] }
 0x2cc   :  { %2648 = vmatprep.subr.bf16.mxu0 %v6869_v40  ;;  %v1018_v40 = vld [vmem:[#allocation2 + $0x498] sm:$0xff]  ;;  %v6679_v44 = vcombine.high %v890_v38, %v894_v39  ;;  %v6678_v50 = vcombine.low %v890_v38, %v894_v39 }
 0x2cd   :  { %2606 = vmatpush2.bf16.msra.mxu1 %v6740_v45  ;;  %v6807_v45 = vcombine.high %v1018_v40, %v1022_v41  ;;  %v6806_v51 = vcombine.low %v1018_v40, %v1022_v41  ;;  %v1094_v38 = vld [vmem:[#allocation2 + $0x6f8] sm:$0xff] }
 0x2ce   :  { %2607 = vmatprep.subr.bf16.mxu1 %v6733_v47  ;;  %v886_v47 = vld [vmem:[#allocation2 + $0x78] sm:$0xff] }
 0x2cf   :  { %2649 = vmatpush2.bf16.msra.mxu0 %v6868_v46  ;;  %v882_v46 = vld [vmem:[#allocation2 + $0x58] sm:$0xff] }
 0x2d0   :  { %2650 = vmatprep.subr.bf16.mxu0 %v6861_v48  ;;  %v1010_v48 = vld [vmem:[#allocation2 + $0x458] sm:$0xff]  ;;  %v6671_v52 = vcombine.high %v882_v46, %v886_v47  ;;  %v6670_v58 = vcombine.low %v882_v46, %v886_v47 }
 0x2d1   :  { %2608 = vmatpush2.bf16.msra.mxu1 %v6732_v53  ;;  %v6799_v53 = vcombine.high %v1010_v48, %v1014_v49  ;;  %v6798_v59 = vcombine.low %v1010_v48, %v1014_v49  ;;  %v1086_v46 = vld [vmem:[#allocation2 + $0x6b8] sm:$0xff] }
 0x2d2   :  { %2609 = vmatprep.subr.bf16.mxu1 %v6725_v55  ;;  %v878_v55 = vld [vmem:[#allocation2 + $0x38] sm:$0xff] }
 0x2d3   :  { %2651 = vmatpush2.bf16.msra.mxu0 %v6860_v54  ;;  %v874_v54 = vld [vmem:[#allocation2 + $0x18] sm:$0xff] }
 0x2d4   :  { %2652 = vmatprep.subr.bf16.mxu0 %v6853_v56  ;;  %v1002_v56 = vld [vmem:[#allocation2 + $0x418] sm:$0xff]  ;;  %v6663_v60 = vcombine.high %v874_v54, %v878_v55  ;;  %v6662_v3 = vcombine.low %v874_v54, %v878_v55 }
 0x2d5   :  { %2610 = vmatpush2.bf16.msra.mxu1 %v6724_v61  ;;  %v6791_v61 = vcombine.high %v1002_v56, %v1006_v57  ;;  %v6790_v4 = vcombine.low %v1002_v56, %v1006_v57  ;;  %v1078_v54 = vld [vmem:[#allocation2 + $0x678] sm:$0xff] }
 0x2d6   :  { %2665 = vmatprep.subr.bf16.mxu1 %v6719_v63  ;;  %v998_v63 = vld [vmem:[#allocation2 + $0x3f8] sm:$0xff] }
 0x2d7   :  { %2653 = vmatpush2.bf16.msra.mxu0 %v6852_v62  ;;  %v994_v62 = vld [vmem:[#allocation2 + $0x3d8] sm:$0xff] }
 0x2d8   :  { %2708 = vmatprep.subr.bf16.mxu0 %v6847_v1  ;;  %2612 = vmatmul.mubr.bf16.vlgmr.msra.gmra.mxu1 %v8570_v9  ;;  %v1122_v1 = vld [vmem:[#allocation2 + $0x7d8] sm:$0xff]  ;;  %v6783_v5 = vcombine.high %v994_v62, %v998_v63  ;;  %v6782_v15 = vcombine.low %v994_v62, %v998_v63 }
 0x2d9   :  { %2666 = vmatpush1.bf16.msra.mxu1 %v6718_v6  ;;  %2697 = vmatprep.mubr.bf16.mxu1 %v8576_v13  ;;  %v6822_v13 = vcombine.low %v1034_v24, %v1038_v26  ;;  %v6911_v6 = vcombine.high %v1122_v1, %v1126_v2  ;;  %v6910_v16 = vcombine.low %v1122_v1, %v1126_v2  ;;  %v1070_v62 = vld [vmem:[#allocation2 + $0x638] sm:$0xff]  ;;  %v8595_v1 = vld [vmem:[#allocation14] sm:$0xff] }
 0x2da   :  { %2655 = vmatmul.mubr.bf16.vlgmr.msra.gmra.mxu0 %v8573_v10  ;;  %2667 = vmatprep.subr.bf16.mxu1 %v6711_v8  ;;  %v990_v8 = vld [vmem:[#allocation2 + $0x3b8] sm:$0xff] }
 0x2db   :  { %2709 = vmatpush1.bf16.msra.mxu0 %v6846_v7  ;;  %2740 = vmatprep.mubr.bf16.mxu0 %v8579_v14  ;;  %v6815_v14 = vcombine.high %v1026_v34, %v1030_v35  ;;  %v986_v7 = vld [vmem:[#allocation2 + $0x398] sm:$0xff] }
 0x2dc   :  { %2710 = vmatprep.subr.bf16.mxu0 %v6839_v11  ;;  %v1114_v11 = vld [vmem:[#allocation2 + $0x798] sm:$0xff]  ;;  %v6775_v17 = vcombine.high %v986_v7, %v990_v8  ;;  %v6774_v23 = vcombine.low %v986_v7, %v990_v8 }
 0x2dd   :  { %2668 = vmatpush1.bf16.msra.mxu1 %v6710_v18  ;;  %v6903_v18 = vcombine.high %v1114_v11, %v1118_v12  ;;  %v6902_v24 = vcombine.low %v1114_v11, %v1118_v12 }
 0x2de   :  { %2669 = vmatprep.subr.bf16.mxu1 %v6703_v20  ;;  %v982_v20 = vld [vmem:[#allocation2 + $0x378] sm:$0xff] }
 0x2df   :  { %2711 = vmatpush1.bf16.msra.mxu0 %v6838_v19  ;;  %v978_v19 = vld [vmem:[#allocation2 + $0x358] sm:$0xff] }
 0x2e0   :  { %2712 = vmatprep.subr.bf16.mxu0 %v6831_v21  ;;  %v1106_v21 = vld [vmem:[#allocation2 + $0x758] sm:$0xff]  ;;  %v6767_v26 = vcombine.high %v978_v19, %v982_v20  ;;  %v6766_v33 = vcombine.low %v978_v19, %v982_v20 }
 0x2e1   :  { %2670 = vmatpush1.bf16.msra.mxu1 %v6702_v27  ;;  %v6895_v27 = vcombine.high %v1106_v21, %v1110_v22  ;;  %v6894_v34 = vcombine.low %v1106_v21, %v1110_v22 }
 0x2e2   :  { %2671 = vmatprep.subr.bf16.mxu1 %v6695_v29  ;;  %v974_v29 = vld [vmem:[#allocation2 + $0x338] sm:$0xff] }
 0x2e3   :  { %2713 = vmatpush1.bf16.msra.mxu0 %v6830_v28  ;;  %v970_v28 = vld [vmem:[#allocation2 + $0x318] sm:$0xff] }
 0x2e4   :  { %2714 = vmatprep.subr.bf16.mxu0 %v6823_v30  ;;  %v1098_v30 = vld [vmem:[#allocation2 + $0x718] sm:$0xff]  ;;  %v6759_v35 = vcombine.high %v970_v28, %v974_v29  ;;  %v6758_v39 = vcombine.low %v970_v28, %v974_v29 }
 0x2e5   :  { %2672 = vmatpush1.bf16.msra.mxu1 %v6694_v36  ;;  %v6887_v36 = vcombine.high %v1098_v30, %v1102_v32  ;;  %v6886_v40 = vcombine.low %v1098_v30, %v1102_v32 }
 0x2e6   :  { %2673 = vmatprep.subr.bf16.mxu1 %v6687_v37  ;;  %v966_v37 = vld [vmem:[#allocation2 + $0x2f8] sm:$0xff] }
 0x2e7   :  { %2715 = vmatpush1.bf16.msra.mxu0 %v6822_v13  ;;  %v962_v13 = vld [vmem:[#allocation2 + $0x2d8] sm:$0xff] }
 0x2e8   :  { %2716 = vmatprep.subr.bf16.mxu0 %v6815_v14  ;;  %v1090_v14 = vld [vmem:[#allocation2 + $0x6d8] sm:$0xff]  ;;  %v6751_v41 = vcombine.high %v962_v13, %v966_v37  ;;  %v6750_v47 = vcombine.low %v962_v13, %v966_v37 }
 0x2e9   :  { %2674 = vmatpush1.bf16.msra.mxu1 %v6686_v42  ;;  %v6879_v42 = vcombine.high %v1090_v14, %v1094_v38  ;;  %v6878_v48 = vcombine.low %v1090_v14, %v1094_v38 }
 0x2ea   :  { %2675 = vmatprep.subr.bf16.mxu1 %v6679_v44  ;;  %v958_v44 = vld [vmem:[#allocation2 + $0x2b8] sm:$0xff] }
 0x2eb   :  { %2717 = vmatpush1.bf16.msra.mxu0 %v6814_v43  ;;  %v954_v43 = vld [vmem:[#allocation2 + $0x298] sm:$0xff] }
 0x2ec   :  { %2718 = vmatprep.subr.bf16.mxu0 %v6807_v45  ;;  %v1082_v45 = vld [vmem:[#allocation2 + $0x698] sm:$0xff]  ;;  %v6743_v49 = vcombine.high %v954_v43, %v958_v44  ;;  %v6742_v55 = vcombine.low %v954_v43, %v958_v44 }
 0x2ed   :  { %2676 = vmatpush1.bf16.msra.mxu1 %v6678_v50  ;;  %v6871_v50 = vcombine.high %v1082_v45, %v1086_v46  ;;  %v6870_v56 = vcombine.low %v1082_v45, %v1086_v46 }
 0x2ee   :  { %2677 = vmatprep.subr.bf16.mxu1 %v6671_v52  ;;  %v950_v52 = vld [vmem:[#allocation2 + $0x278] sm:$0xff] }
 0x2ef   :  { %2719 = vmatpush1.bf16.msra.mxu0 %v6806_v51  ;;  %v946_v51 = vld [vmem:[#allocation2 + $0x258] sm:$0xff] }
 0x2f0   :  { %2720 = vmatprep.subr.bf16.mxu0 %v6799_v53  ;;  %v1074_v53 = vld [vmem:[#allocation2 + $0x658] sm:$0xff]  ;;  %v6735_v57 = vcombine.high %v946_v51, %v950_v52  ;;  %v6734_v63 = vcombine.low %v946_v51, %v950_v52 }
 0x2f1   :  { %2678 = vmatpush1.bf16.msra.mxu1 %v6670_v58  ;;  %v6863_v58 = vcombine.high %v1074_v53, %v1078_v54  ;;  %v6862_v2 = vcombine.low %v1074_v53, %v1078_v54 }
 0x2f2   :  { %2679 = vmatprep.subr.bf16.mxu1 %v6663_v60  ;;  %v942_v60 = vld [vmem:[#allocation2 + $0x238] sm:$0xff] }
 0x2f3   :  { %2721 = vmatpush1.bf16.msra.mxu0 %v6798_v59  ;;  %v938_v59 = vld [vmem:[#allocation2 + $0x218] sm:$0xff] }
 0x2f4   :  { %2722 = vmatprep.subr.bf16.mxu0 %v6791_v61  ;;  %v1066_v61 = vld [vmem:[#allocation2 + $0x618] sm:$0xff] }
 0x2f5   :  { %2680 = vmatpush1.bf16.msra.mxu1 %v6662_v3  ;;  %v6727_v3 = vcombine.high %v938_v59, %v942_v60  ;;  %v6854_v7 = vcombine.low %v1066_v61, %v1070_v62 }
 0x2f6   :  { %2681 = vmatprep.subr.bf16.mxu1 %v6783_v5  ;;  %v2768_v5 = vrot.slane %v8595_v1, %v8547_v25 }
 0x2f7   :  { %2723 = vmatpush1.bf16.msra.mxu0 %v6790_v4  ;;  %v6855_v4 = vcombine.high %v1066_v61, %v1070_v62 }
 0x2f8   :  { %2724 = vmatprep.subr.bf16.mxu0 %v6911_v6  ;;  %v6726_v6 = vcombine.low %v938_v59, %v942_v60  ;;  %v2776_v8 = vcombine.high %v2768_v5, %v2768_v5  ;;  %v2784_v11 = vrot.slane %v2768_v5, %v8547_v25  ;;  %v2761_v59 = vcombine.high %v8595_v1, %v8595_v1 }
 0x2f9   :  { %2682 = vmatpush2.bf16.msra.mxu1 %v6782_v15 }
 0x2fa   :  { %2683 = vmatprep.subr.bf16.mxu1 %v6775_v17  ;;  %v2798_v15 = vrot.slane %v2776_v8, %v8547_v25  ;;  %v2806_v13 = vcombine.high %v2784_v11, %v2784_v11  ;;  %v2775_v60 = vrot.slane %v2761_v59, %v8547_v25 }
 0x2fb   :  { %2725 = vmatpush2.bf16.msra.mxu0 %v6910_v16 }
 0x2fc   :  { %2726 = vmatprep.subr.bf16.mxu0 %v6903_v18  ;;  %v2811_v18 = vpack.i.b16 %v2784_v11, %v2784_v11  ;;  %v2818_v21 = vpack.i.b16 %v2798_v15, %v2798_v15  ;;  %v2808_v14 = vcombine.high %v2798_v15, %v2798_v15  ;;  %v2777_v61 = vcombine.high %v2775_v60, %v2775_v60 }
 0x2fd   :  { %2684 = vmatpush2.bf16.msra.mxu1 %v6774_v23  ;;  %v2791_v62 = vrot.slane %v2775_v60, %v8547_v25 }
 0x2fe   :  { %2685 = vmatprep.subr.bf16.mxu1 %v6767_v26  ;;  %v2816_v26 = vrot.slane %v2811_v18, %v8551_v31  ;;  %v2823_v32 = vrot.slane %v2818_v21, %v8551_v31  ;;  %v2832_v43 = vpack.i.b16 %v2808_v14, %v2808_v14 }
 0x2ff   :  { %2727 = vmatpush2.bf16.msra.mxu0 %v6902_v24  ;;  %v2839_v5 = vpack.i.b16 %v2791_v62, %v2791_v62 }
 0x300   :  { %2728 = vmatprep.subr.bf16.mxu0 %v6895_v27  ;;  %v2837_v53 = vrot.slane %v2832_v43, %v8551_v31 }
 0x301   :  { %2686 = vmatpush2.bf16.msra.mxu1 %v6766_v33 }
 0x302   :  { %2687 = vmatprep.subr.bf16.mxu1 %v6759_v35 }
 0x303   :  { %2729 = vmatpush2.bf16.msra.mxu0 %v6894_v34 }
 0x304   :  { %2730 = vmatprep.subr.bf16.mxu0 %v6887_v36 }
 0x305   :  { %2688 = vmatpush2.bf16.msra.mxu1 %v6758_v39 }
 0x306   :  { %2689 = vmatprep.subr.bf16.mxu1 %v6751_v41 }
 0x307   :  { %2731 = vmatpush2.bf16.msra.mxu0 %v6886_v40  ;;  %v2825_v40 = vpack.i.b16 %v2806_v13, %v2806_v13 }
 0x308   :  { %2732 = vmatprep.subr.bf16.mxu0 %v6879_v42 }
 0x309   :  { %2690 = vmatpush2.bf16.msra.mxu1 %v6750_v47  ;;  %v2830_v47 = vrot.slane %v2825_v40, %v8551_v31 }
 0x30a   :  { %2691 = vmatprep.subr.bf16.mxu1 %v6743_v49 }
 0x30b   :  { %2733 = vmatpush2.bf16.msra.mxu0 %v6878_v48 }
 0x30c   :  { %2734 = vmatprep.subr.bf16.mxu0 %v6871_v50 }
 0x30d   :  { %2692 = vmatpush2.bf16.msra.mxu1 %v6742_v55 }
 0x30e   :  { %2693 = vmatprep.subr.bf16.mxu1 %v6735_v57 }
 0x30f   :  { %2735 = vmatpush2.bf16.msra.mxu0 %v6870_v56 }
 0x310   :  { %2736 = vmatprep.subr.bf16.mxu0 %v6863_v58 }
 0x311   :  { %2694 = vmatpush2.bf16.msra.mxu1 %v6734_v63 }
 0x312   :  { %2695 = vmatprep.subr.bf16.mxu1 %v6727_v3 }
 0x313   :  { %2737 = vmatpush2.bf16.msra.mxu0 %v6862_v2  ;;  %v2805_v2 = vrot.slane %v2777_v61, %v8547_v25 }
 0x314   :  { %2738 = vmatprep.subr.bf16.mxu0 %v6855_v4 }
 0x315   :  { %2696 = vmatpush2.bf16.msra.mxu1 %v6726_v6  ;;  %v2846_v8 = vpack.i.b16 %v2805_v2, %v2805_v2 }
 0x317   :  { %2739 = vmatpush2.bf16.msra.mxu0 %v6854_v7  ;;  %v2851_v21 = vrot.slane %v2846_v8, %v8551_v31 }
 0x318   :  { %v2441_v12 = vpop.f32.mrf.mxu1  ;;  %2698 = vmatmul.mubr.bf16.vlgmr.msra.gmra.mxu1 %v8570_v9 }
 0x31a   :  { %v2484_v16 = vpop.f32.mrf.mxu0  ;;  %2741 = vmatmul.mubr.bf16.vlgmr.msra.gmra.mxu0 %v8573_v10  ;;  %v2443_v17 = vpop.f32.mrf.mxu1 }
 0x31b   :  { %v2485_v23 = vadd.f32 %v2484_v16, %v2441_v12  ;;  %v2844_v16 = vrot.slane %v2839_v5, %v8551_v31 }
 0x31c   :  { %v2486_v19 = vpop.f32.mrf.mxu0  ;;  %v2445_v20 = vpop.f32.mrf.mxu1 }
 0x31d   :  { %v2487_v29 = vadd.f32 %v2486_v19, %v2443_v17 }
 0x31e   :  { %v2488_v22 = vpop.f32.mrf.mxu0  ;;  %v2447_v27 = vpop.f32.mrf.mxu1 }
 0x31f   :  { %v2489_v24 = vadd.f32 %v2488_v22, %v2445_v20 }
 0x320   :  { %v2490_v28 = vpop.f32.mrf.mxu0 }
 0x321   :  { %v2751_v30 = vpack.c.bf16 %v2489_v24, %v2485_v23  ;;  %v2491_v9 = vadd.f32 %v2490_v28, %v2447_v27  ;;  %v2807_v28 = vcombine.high %v2791_v62, %v2791_v62 }
 0x323   :  { %v2866_v33 = vadd.bf16 %v2816_v26, %v2751_v30  ;;  %v2752_v34 = vpack.c.bf16 %v2491_v9, %v2487_v29  ;;  %v2809_v30 = vcombine.high %v2805_v2, %v2805_v2 }
 0x325   :  { %v8606_v10 = vmax.bf16 %v8468_v0, %v2866_v33  ;;  %v2867_v35 = vadd.bf16 %v2823_v32, %v2752_v34  ;;  %v2853_v33 = vpack.i.b16 %v2807_v28, %v2807_v28  ;;  %v2860_v13 = vpack.i.b16 %v2809_v30, %v2809_v30 }
 0x327   :  { %v8609_v36 = vmax.bf16 %v8468_v0, %v2867_v35 }
 0x358   :  { %v2527_v37 = vpop.f32.mrf.mxu1 }
 0x35a   :  { %v2570_v38 = vpop.f32.mrf.mxu0  ;;  %v2529_v39 = vpop.f32.mrf.mxu1 }
 0x35b   :  { %v2571_v45 = vadd.f32 %v2570_v38, %v2527_v37 }
 0x35c   :  { %v2572_v41 = vpop.f32.mrf.mxu0  ;;  %v2531_v42 = vpop.f32.mrf.mxu1 }
 0x35d   :  { %v2573_v50 = vadd.f32 %v2572_v41, %v2529_v39  ;;  %v2858_v39 = vrot.slane %v2853_v33, %v8551_v31 }
 0x35e   :  { %v2574_v44 = vpop.f32.mrf.mxu0  ;;  %v2533_v48 = vpop.f32.mrf.mxu1 }
 0x35f   :  { %v2575_v46 = vadd.f32 %v2574_v44, %v2531_v42 }
 0x360   :  { %v2576_v49 = vpop.f32.mrf.mxu0 }
 0x361   :  { %v2753_v51 = vpack.c.bf16 %v2575_v46, %v2571_v45  ;;  %v2577_v52 = vadd.f32 %v2576_v49, %v2533_v48  ;;  %v2865_v45 = vrot.slane %v2860_v13, %v8551_v31 }
 0x363   :  { %v2868_v54 = vadd.bf16 %v2830_v47, %v2753_v51  ;;  %v2754_v55 = vpack.c.bf16 %v2577_v52, %v2573_v50 }
 0x365   :  { %v8614_v56 = vmax.bf16 %v8468_v0, %v2868_v54  ;;  %v2869_v57 = vadd.bf16 %v2837_v53, %v2754_v55 }
 0x367   :  { %v8617_v58 = vmax.bf16 %v8468_v0, %v2869_v57 }
 0x398   :  { %v2613_v63 = vpop.f32.mrf.mxu1 }
 0x39a   :  { %v2656_v3 = vpop.f32.mrf.mxu0  ;;  %v2615_v4 = vpop.f32.mrf.mxu1 }
 0x39b   :  { %v2657_v12 = vadd.f32 %v2656_v3, %v2613_v63 }
 0x39c   :  { %v2658_v6 = vpop.f32.mrf.mxu0  ;;  %v2617_v7 = vpop.f32.mrf.mxu1 }
 0x39d   :  { %v2659_v18 = vadd.f32 %v2658_v6, %v2615_v4 }
 0x39e   :  { %v2660_v11 = vpop.f32.mrf.mxu0  ;;  %v2619_v1 = vpop.f32.mrf.mxu1 }
 0x39f   :  { %v2661_v15 = vadd.f32 %v2660_v11, %v2617_v7 }
 0x3a0   :  { %v2662_v17 = vpop.f32.mrf.mxu0 }
 0x3a1   :  { %v2755_v19 = vpack.c.bf16 %v2661_v15, %v2657_v12  ;;  %v2663_v20 = vadd.f32 %v2662_v17, %v2619_v1 }
 0x3a3   :  { %v2870_v22 = vadd.bf16 %v2844_v16, %v2755_v19  ;;  %v2756_v23 = vpack.c.bf16 %v2663_v20, %v2659_v18 }
 0x3a5   :  { %v8627_v24 = vmax.bf16 %v8468_v0, %v2870_v22  ;;  %v2871_v26 = vadd.bf16 %v2851_v21, %v2756_v23 }
 0x3a7   :  { %v8630_v27 = vmax.bf16 %v8468_v0, %v2871_v26 }
 0x3d8   :  { %v2699_v29 = vpop.f32.mrf.mxu1 }
 0x3da   :  { %v2742_v9 = vpop.f32.mrf.mxu0  ;;  %v2701_v32 = vpop.f32.mrf.mxu1 }
 0x3db   :  { %v2743_v14 = vadd.f32 %v2742_v9, %v2699_v29 }
 0x3dc   :  { %v2744_v34 = vpop.f32.mrf.mxu0  ;;  %v2703_v35 = vpop.f32.mrf.mxu1 }
 0x3dd   :  { %v2745_v42 = vadd.f32 %v2744_v34, %v2701_v32 }
 0x3de   :  { %v2746_v37 = vpop.f32.mrf.mxu0  ;;  %v2705_v40 = vpop.f32.mrf.mxu1 }
 0x3df   :  { %v2747_v38 = vadd.f32 %v2746_v37, %v2703_v35 }
 0x3e0   :  { %v2748_v41 = vpop.f32.mrf.mxu0 }
 0x3e1   :  { %v2757_v43 = vpack.c.bf16 %v2747_v38, %v2743_v14  ;;  %v2749_v44 = vadd.f32 %v2748_v41, %v2705_v40 }
 0x3e3   :  { %v2872_v46 = vadd.bf16 %v2858_v39, %v2757_v43  ;;  %v2758_v47 = vpack.c.bf16 %v2749_v44, %v2745_v42 }
 0x3e5   :  { %v8635_v48 = vmax.bf16 %v8468_v0, %v2872_v46  ;;  %v2873_v49 = vadd.bf16 %v2865_v45, %v2758_v47 }
 0x3e7   :  { %v8638_v50 = vmax.bf16 %v8468_v0, %v2873_v49 }
 0x3e8   :  { %8451 = dma.done.wait [#allocation4 + $0x1], 57344 }
 0x3e9   :  { %8452 = vsyncadd [#allocation4 + $0x1], 4294909952  ;;  %5734 = vmatprep.mubr.bf16.mxu1 %v8609_v36  ;;  %5777 = vmatprep.mubr.bf16.mxu0 %v8617_v58  ;;  %v7600_v51 = vld [vmem:[#allocation3 + $0x18c] ss:$28 sps:$4 sm:$0xff]   ;;  %v7606_v55 = vld [vmem:[#allocation3 + $0x154] ss:$28 sps:$4 sm:$0xff]  }
 0x3ea   :  { %v7602_v52 = vld [vmem:[#allocation3 + $0x50c] ss:$28 sps:$4 sm:$0xff]   ;;  %5702 = vmatprep.subr.bf16.mxu1 %v7600_v51  ;;  %v7608_v57 = vld [vmem:[#allocation3 + $0x4d4] ss:$28 sps:$4 sm:$0xff]   ;;  %v7612_v60 = vld [vmem:[#allocation3 + $0x11c] ss:$28 sps:$4 sm:$0xff]  }
 0x3eb   :  { %v7604_v53 = vld [vmem:[#allocation3 + $0x188] ss:$28 sps:$4 sm:$0xff]   ;;  %5745 = vmatprep.subr.bf16.mxu0 %v7602_v52  ;;  %v7610_v59 = vld [vmem:[#allocation3 + $0x150] ss:$28 sps:$4 sm:$0xff]   ;;  %v7614_v61 = vld [vmem:[#allocation3 + $0x49c] ss:$28 sps:$4 sm:$0xff]  }
 0x3ec   :  { %v7605_v54 = vld [vmem:[#allocation3 + $0x508] ss:$28 sps:$4 sm:$0xff]   ;;  %5703 = vmatpush1.bf16.msra.mxu1 %v7604_v53  ;;  %v7611_v0 = vld [vmem:[#allocation3 + $0x4d0] ss:$28 sps:$4 sm:$0xff]   ;;  %v7616_v62 = vld [vmem:[#allocation3 + $0x118] ss:$28 sps:$4 sm:$0xff]  }
 0x3ed   :  { %5746 = vmatpush1.bf16.msra.mxu0 %v7605_v54  ;;  %5704 = vmatprep.subr.bf16.mxu1 %v7606_v55  ;;  %v7617_v63 = vld [vmem:[#allocation3 + $0x498] ss:$28 sps:$4 sm:$0xff]   ;;  %v7618_v2 = vld [vmem:[#allocation3 + $0xe4] ss:$28 sps:$4 sm:$0xff]   ;;  %v7624_v6 = vld [vmem:[#allocation3 + $0xac] ss:$28 sps:$4 sm:$0xff]  }
 0x3ee   :  { %5747 = vmatprep.subr.bf16.mxu0 %v7608_v57  ;;  %v7620_v3 = vld [vmem:[#allocation3 + $0x464] ss:$28 sps:$4 sm:$0xff]   ;;  %v7626_v7 = vld [vmem:[#allocation3 + $0x42c] ss:$28 sps:$4 sm:$0xff]   ;;  %v7630_v12 = vld [vmem:[#allocation3 + $0x74] ss:$28 sps:$4 sm:$0xff]  }
 0x3ef   :  { %v7622_v4 = vld [vmem:[#allocation3 + $0xe0] ss:$28 sps:$4 sm:$0xff]   ;;  %v7628_v8 = vld [vmem:[#allocation3 + $0xa8] ss:$28 sps:$4 sm:$0xff]   ;;  %v7632_v15 = vld [vmem:[#allocation3 + $0x3f4] ss:$28 sps:$4 sm:$0xff]  }
 0x3f0   :  { %5705 = vmatpush1.bf16.msra.mxu1 %v7610_v59  ;;  %v7623_v5 = vld [vmem:[#allocation3 + $0x460] ss:$28 sps:$4 sm:$0xff]   ;;  %v7629_v11 = vld [vmem:[#allocation3 + $0x428] ss:$28 sps:$4 sm:$0xff]   ;;  %v7634_v16 = vld [vmem:[#allocation3 + $0x70] ss:$28 sps:$4 sm:$0xff]  }
 0x3f1   :  { %5748 = vmatpush1.bf16.msra.mxu0 %v7611_v0  ;;  %5706 = vmatprep.subr.bf16.mxu1 %v7612_v60  ;;  %v7635_v1 = vld [vmem:[#allocation3 + $0x3f0] ss:$28 sps:$4 sm:$0xff]   ;;  %v7636_v17 = vld [vmem:[#allocation3 + $0x3c] ss:$28 sps:$4 sm:$0xff]   ;;  %v7642_v21 = vld [vmem:[#allocation3 + $0x4] ss:$28 sps:$4 sm:$0xff]  }
 0x3f2   :  { %5749 = vmatprep.subr.bf16.mxu0 %v7614_v61  ;;  %v7638_v18 = vld [vmem:[#allocation3 + $0x3bc] ss:$28 sps:$4 sm:$0xff]   ;;  %v7644_v22 = vld [vmem:[#allocation3 + $0x384] ss:$28 sps:$4 sm:$0xff]   ;;  %v7648_v28 = vld [vmem:[#allocation3 + $0x34c] ss:$28 sps:$4 sm:$0xff]  }
 0x3f3   :  { %v7640_v19 = vld [vmem:[#allocation3 + $0x38] ss:$28 sps:$4 sm:$0xff]   ;;  %v7646_v23 = vld [vmem:[#allocation3] ss:$28 sps:$4 sm:$0xff]   ;;  %v7650_v29 = vld [vmem:[#allocation3 + $0x6cc] ss:$28 sps:$4 sm:$0xff]  }
 0x3f4   :  { %5707 = vmatpush1.bf16.msra.mxu1 %v7616_v62  ;;  %v7641_v20 = vld [vmem:[#allocation3 + $0x3b8] ss:$28 sps:$4 sm:$0xff]   ;;  %v7647_v26 = vld [vmem:[#allocation3 + $0x380] ss:$28 sps:$4 sm:$0xff]   ;;  %v7652_v30 = vld [vmem:[#allocation3 + $0x348] ss:$28 sps:$4 sm:$0xff]  }
 0x3f5   :  { %5750 = vmatpush1.bf16.msra.mxu0 %v7617_v63  ;;  %5708 = vmatprep.subr.bf16.mxu1 %v7618_v2  ;;  %v7653_v9 = vld [vmem:[#allocation3 + $0x6c8] ss:$28 sps:$4 sm:$0xff]   ;;  %v7654_v32 = vld [vmem:[#allocation3 + $0x314] ss:$28 sps:$4 sm:$0xff]   ;;  %v7660_v13 = vld [vmem:[#allocation3 + $0x2dc] ss:$28 sps:$4 sm:$0xff]  }
 0x3f6   :  { %5751 = vmatprep.subr.bf16.mxu0 %v7620_v3  ;;  %v7656_v33 = vld [vmem:[#allocation3 + $0x694] ss:$28 sps:$4 sm:$0xff]   ;;  %v7662_v37 = vld [vmem:[#allocation3 + $0x65c] ss:$28 sps:$4 sm:$0xff]   ;;  %v7666_v39 = vld [vmem:[#allocation3 + $0x2a4] ss:$28 sps:$4 sm:$0xff]  }
 0x3f7   :  { %v7658_v34 = vld [vmem:[#allocation3 + $0x310] ss:$28 sps:$4 sm:$0xff]   ;;  %v7664_v14 = vld [vmem:[#allocation3 + $0x2d8] ss:$28 sps:$4 sm:$0xff]   ;;  %v7668_v40 = vld [vmem:[#allocation3 + $0x624] ss:$28 sps:$4 sm:$0xff]  }
 0x3f8   :  { %5709 = vmatpush1.bf16.msra.mxu1 %v7622_v4  ;;  %v7659_v35 = vld [vmem:[#allocation3 + $0x690] ss:$28 sps:$4 sm:$0xff]   ;;  %v7665_v38 = vld [vmem:[#allocation3 + $0x658] ss:$28 sps:$4 sm:$0xff]   ;;  %v7670_v41 = vld [vmem:[#allocation3 + $0x2a0] ss:$28 sps:$4 sm:$0xff]  }
 0x3f9   :  { %5752 = vmatpush1.bf16.msra.mxu0 %v7623_v5  ;;  %5710 = vmatprep.subr.bf16.mxu1 %v7624_v6  ;;  %v7671_v42 = vld [vmem:[#allocation3 + $0x620] ss:$28 sps:$4 sm:$0xff]   ;;  %v7672_v43 = vld [vmem:[#allocation3 + $0x26c] ss:$28 sps:$4 sm:$0xff]   ;;  %v7678_v47 = vld [vmem:[#allocation3 + $0x234] ss:$28 sps:$4 sm:$0xff]  }
 0x3fa   :  { %5753 = vmatprep.subr.bf16.mxu0 %v7626_v7  ;;  %v7674_v44 = vld [vmem:[#allocation3 + $0x5ec] ss:$28 sps:$4 sm:$0xff]   ;;  %v7680_v49 = vld [vmem:[#allocation3 + $0x5b4] ss:$28 sps:$4 sm:$0xff]   ;;  %v7684_v53 = vld [vmem:[#allocation3 + $0x1fc] ss:$28 sps:$4 sm:$0xff]  }
 0x3fb   :  { %v7676_v45 = vld [vmem:[#allocation3 + $0x268] ss:$28 sps:$4 sm:$0xff]   ;;  %v7682_v51 = vld [vmem:[#allocation3 + $0x230] ss:$28 sps:$4 sm:$0xff]   ;;  %v7686_v54 = vld [vmem:[#allocation3 + $0x57c] ss:$28 sps:$4 sm:$0xff]  }
 0x3fc   :  { %5711 = vmatpush1.bf16.msra.mxu1 %v7628_v8  ;;  %v7677_v46 = vld [vmem:[#allocation3 + $0x5e8] ss:$28 sps:$4 sm:$0xff]   ;;  %v7683_v52 = vld [vmem:[#allocation3 + $0x5b0] ss:$28 sps:$4 sm:$0xff]   ;;  %v7688_v55 = vld [vmem:[#allocation3 + $0x1f8] ss:$28 sps:$4 sm:$0xff]  }
 0x3fd   :  { %5754 = vmatpush1.bf16.msra.mxu0 %v7629_v11  ;;  %5712 = vmatprep.subr.bf16.mxu1 %v7630_v12  ;;  %v7689_v57 = vld [vmem:[#allocation3 + $0x578] ss:$28 sps:$4 sm:$0xff]   ;;  %v7690_v59 = vld [vmem:[#allocation3 + $0x1c4] ss:$28 sps:$4 sm:$0xff]   ;;  %v7698_v62 = vld [vmem:[#allocation3 + $0x88c] ss:$28 sps:$4 sm:$0xff]  }
 0x3fe   :  { %5755 = vmatprep.subr.bf16.mxu0 %v7632_v15  ;;  %v7692_v0 = vld [vmem:[#allocation3 + $0x544] ss:$28 sps:$4 sm:$0xff]   ;;  %v7701_v63 = vld [vmem:[#allocation3 + $0xc0c] ss:$28 sps:$4 sm:$0xff]   ;;  %v7704_v4 = vld [vmem:[#allocation3 + $0x854] ss:$28 sps:$4 sm:$0xff]  }
 0x3ff   :  { %v7694_v60 = vld [vmem:[#allocation3 + $0x1c0] ss:$28 sps:$4 sm:$0xff]   ;;  %v7696_v2 = vld [vmem:[#allocation3 + $0x888] ss:$28 sps:$4 sm:$0xff]   ;;  %v7707_v5 = vld [vmem:[#allocation3 + $0xbd4] ss:$28 sps:$4 sm:$0xff]  }
 0x400   :  { %5713 = vmatpush1.bf16.msra.mxu1 %v7634_v16  ;;  %v7695_v61 = vld [vmem:[#allocation3 + $0x540] ss:$28 sps:$4 sm:$0xff]   ;;  %v7699_v3 = vld [vmem:[#allocation3 + $0xc08] ss:$28 sps:$4 sm:$0xff]   ;;  %v7702_v6 = vld [vmem:[#allocation3 + $0x850] ss:$28 sps:$4 sm:$0xff]  }
 0x401   :  { %5756 = vmatpush1.bf16.msra.mxu0 %v7635_v1  ;;  %5714 = vmatprep.subr.bf16.mxu1 %v7636_v17  ;;  %v7705_v7 = vld [vmem:[#allocation3 + $0xbd0] ss:$28 sps:$4 sm:$0xff]   ;;  %v7710_v8 = vld [vmem:[#allocation3 + $0x81c] ss:$28 sps:$4 sm:$0xff]   ;;  %v7716_v16 = vld [vmem:[#allocation3 + $0x7e4] ss:$28 sps:$4 sm:$0xff]  }
 0x402   :  { %5757 = vmatprep.subr.bf16.mxu0 %v7638_v18  ;;  %v7713_v11 = vld [vmem:[#allocation3 + $0xb9c] ss:$28 sps:$4 sm:$0xff]   ;;  %v7719_v1 = vld [vmem:[#allocation3 + $0xb64] ss:$28 sps:$4 sm:$0xff]   ;;  %s8472_s5 = smov [#allocation17]  }
 0x403   :  { %v7708_v12 = vld [vmem:[#allocation3 + $0x818] ss:$28 sps:$4 sm:$0xff]   ;;  %v7714_v17 = vld [vmem:[#allocation3 + $0x7e0] ss:$28 sps:$4 sm:$0xff]   ;;  %s6545_s7 = sshll.u32 %s8472_s5, 4  ;;  %s6546_s7 = int_to_ptr.vmem [resolvable:$true] %s6545_s7 }
 0x404   :  { %5715 = vmatpush1.bf16.msra.mxu1 %v7640_v19  ;;  %v7711_v15 = vld [vmem:[#allocation3 + $0xb98] ss:$28 sps:$4 sm:$0xff]   ;;  %v7717_v18 = vld [vmem:[#allocation3 + $0xb60] ss:$28 sps:$4 sm:$0xff]   ;;  %v7722_v19 = vld [vmem:[#allocation3 + $0x7ac] ss:$28 sps:$4 sm:$0xff]   ;;  %p8426_p4 = scmp.lt.s32.totalorder %s6546_s7, %s6546_s7 }
 0x405   :  { %5758 = vmatpush1.bf16.msra.mxu0 %v7641_v20  ;;  %5716 = vmatprep.subr.bf16.mxu1 %v7642_v21  ;;  %v7725_v20 = vld [vmem:[#allocation3 + $0xb2c] ss:$28 sps:$4 sm:$0xff]   ;;  %s8421_s10 = scalar_lea.vmem %s6546_s7, 896 }
 0x406   :  { %5759 = vmatprep.subr.bf16.mxu0 %v7644_v22  ;;  %v7720_v21 = vld [vmem:[#allocation3 + $0x7a8] ss:$28 sps:$4 sm:$0xff]   ;;  %p8422_p3 = scmp.ne.s32.totalorder %s6546_s7, %s8421_s10  ;;  %p8427_p5 = scmp.lt.s32.totalorder %s8421_s10, %s8421_s10 }
 0x407   :  { %v7723_v22 = vld [vmem:[#allocation3 + $0xb28] ss:$28 sps:$4 sm:$0xff]  }
 0x408   :  { %5717 = vmatpush1.bf16.msra.mxu1 %v7646_v23  ;;  %v7728_v23 = vld [vmem:[#allocation3 + $0x774] ss:$28 sps:$4 sm:$0xff]   ;;  %p8428_p6 = por %p8427_p5, %p8426_p4 }
 0x409   :  { %5760 = vmatpush1.bf16.msra.mxu0 %v7647_v26  ;;  %5718 = vmatprep.subr.bf16.mxu1 %v7648_v28  ;;  %v7731_v26 = vld [vmem:[#allocation3 + $0xaf4] ss:$28 sps:$4 sm:$0xff]  }
 0x40a   :  { %5761 = vmatprep.subr.bf16.mxu0 %v7650_v29  ;;  %v7726_v28 = vld [vmem:[#allocation3 + $0x770] ss:$28 sps:$4 sm:$0xff]   ;;  %p8429_p7 = pnand %p8428_p6, %p8422_p3 }
 0x40b   :  { %v7729_v29 = vld [vmem:[#allocation3 + $0xaf0] ss:$28 sps:$4 sm:$0xff]  }
 0x40c   :  { %5719 = vmatpush2.bf16.msra.mxu1 %v7652_v30  ;;  %v7734_v30 = vld [vmem:[#allocation3 + $0x73c] ss:$28 sps:$4 sm:$0xff]  }
 0x40d   :  { %5762 = vmatpush2.bf16.msra.mxu0 %v7653_v9  ;;  %5720 = vmatprep.subr.bf16.mxu1 %v7654_v32  ;;  %v7737_v9 = vld [vmem:[#allocation3 + $0xabc] ss:$28 sps:$4 sm:$0xff]  }
 0x40e   :  { %5763 = vmatprep.subr.bf16.mxu0 %v7656_v33  ;;  %v7732_v32 = vld [vmem:[#allocation3 + $0x738] ss:$28 sps:$4 sm:$0xff]  }
 0x40f   :  { %v7735_v33 = vld [vmem:[#allocation3 + $0xab8] ss:$28 sps:$4 sm:$0xff]  }
 0x410   :  { %5721 = vmatpush2.bf16.msra.mxu1 %v7658_v34  ;;  %v7740_v34 = vld [vmem:[#allocation3 + $0x704] ss:$28 sps:$4 sm:$0xff]  }
 0x411   :  { %5764 = vmatpush2.bf16.msra.mxu0 %v7659_v35  ;;  %5722 = vmatprep.subr.bf16.mxu1 %v7660_v13  ;;  %v7743_v35 = vld [vmem:[#allocation3 + $0xa84] ss:$28 sps:$4 sm:$0xff]  }
 0x412   :  { %5765 = vmatprep.subr.bf16.mxu0 %v7662_v37  ;;  %v7738_v13 = vld [vmem:[#allocation3 + $0x700] ss:$28 sps:$4 sm:$0xff]  }
 0x413   :  { %v7741_v37 = vld [vmem:[#allocation3 + $0xa80] ss:$28 sps:$4 sm:$0xff]  }
 0x414   :  { %5723 = vmatpush2.bf16.msra.mxu1 %v7664_v14  ;;  %v7746_v14 = vld [vmem:[#allocation3 + $0xa4c] ss:$28 sps:$4 sm:$0xff]  }
 0x415   :  { %5766 = vmatpush2.bf16.msra.mxu0 %v7665_v38  ;;  %5724 = vmatprep.subr.bf16.mxu1 %v7666_v39  ;;  %v7749_v38 = vld [vmem:[#allocation3 + $0xdcc] ss:$28 sps:$4 sm:$0xff]  }
 0x416   :  { %5767 = vmatprep.subr.bf16.mxu0 %v7668_v40  ;;  %v7744_v39 = vld [vmem:[#allocation3 + $0xa48] ss:$28 sps:$4 sm:$0xff]  }
 0x417   :  { %v7747_v40 = vld [vmem:[#allocation3 + $0xdc8] ss:$28 sps:$4 sm:$0xff]  }
 0x418   :  { %5725 = vmatpush2.bf16.msra.mxu1 %v7670_v41  ;;  %v7752_v41 = vld [vmem:[#allocation3 + $0xa14] ss:$28 sps:$4 sm:$0xff]  }
 0x419   :  { %5768 = vmatpush2.bf16.msra.mxu0 %v7671_v42  ;;  %5726 = vmatprep.subr.bf16.mxu1 %v7672_v43  ;;  %v7755_v42 = vld [vmem:[#allocation3 + $0xd94] ss:$28 sps:$4 sm:$0xff]  }
 0x41a   :  { %5769 = vmatprep.subr.bf16.mxu0 %v7674_v44  ;;  %v7750_v43 = vld [vmem:[#allocation3 + $0xa10] ss:$28 sps:$4 sm:$0xff]  }
 0x41b   :  { %v7753_v44 = vld [vmem:[#allocation3 + $0xd90] ss:$28 sps:$4 sm:$0xff]  }
 0x41c   :  { %5727 = vmatpush2.bf16.msra.mxu1 %v7676_v45  ;;  %v7758_v45 = vld [vmem:[#allocation3 + $0x9dc] ss:$28 sps:$4 sm:$0xff]  }
 0x41d   :  { %5770 = vmatpush2.bf16.msra.mxu0 %v7677_v46  ;;  %5728 = vmatprep.subr.bf16.mxu1 %v7678_v47  ;;  %v7761_v46 = vld [vmem:[#allocation3 + $0xd5c] ss:$28 sps:$4 sm:$0xff]  }
 0x41e   :  { %5771 = vmatprep.subr.bf16.mxu0 %v7680_v49  ;;  %v7756_v47 = vld [vmem:[#allocation3 + $0x9d8] ss:$28 sps:$4 sm:$0xff]  }
 0x41f   :  { %v7759_v49 = vld [vmem:[#allocation3 + $0xd58] ss:$28 sps:$4 sm:$0xff]  }
 0x420   :  { %5729 = vmatpush2.bf16.msra.mxu1 %v7682_v51  ;;  %v7764_v51 = vld [vmem:[#allocation3 + $0x9a4] ss:$28 sps:$4 sm:$0xff]  }
 0x421   :  { %5772 = vmatpush2.bf16.msra.mxu0 %v7683_v52  ;;  %5730 = vmatprep.subr.bf16.mxu1 %v7684_v53  ;;  %v7767_v52 = vld [vmem:[#allocation3 + $0xd24] ss:$28 sps:$4 sm:$0xff]  }
 0x422   :  { %5773 = vmatprep.subr.bf16.mxu0 %v7686_v54  ;;  %v7762_v53 = vld [vmem:[#allocation3 + $0x9a0] ss:$28 sps:$4 sm:$0xff]  }
 0x423   :  { %v7765_v54 = vld [vmem:[#allocation3 + $0xd20] ss:$28 sps:$4 sm:$0xff]  }
 0x424   :  { %5731 = vmatpush2.bf16.msra.mxu1 %v7688_v55  ;;  %v7770_v55 = vld [vmem:[#allocation3 + $0x96c] ss:$28 sps:$4 sm:$0xff]  }
 0x425   :  { %5774 = vmatpush2.bf16.msra.mxu0 %v7689_v57  ;;  %5732 = vmatprep.subr.bf16.mxu1 %v7690_v59  ;;  %v7773_v57 = vld [vmem:[#allocation3 + $0xcec] ss:$28 sps:$4 sm:$0xff]  }
 0x426   :  { %5775 = vmatprep.subr.bf16.mxu0 %v7692_v0  ;;  %v7768_v59 = vld [vmem:[#allocation3 + $0x968] ss:$28 sps:$4 sm:$0xff]  }
 0x427   :  { %v7771_v0 = vld [vmem:[#allocation3 + $0xce8] ss:$28 sps:$4 sm:$0xff]  }
 0x428   :  { %5733 = vmatpush2.bf16.msra.mxu1 %v7694_v60  ;;  %v7776_v60 = vld [vmem:[#allocation3 + $0x934] ss:$28 sps:$4 sm:$0xff]  }
 0x429   :  { %5776 = vmatpush2.bf16.msra.mxu0 %v7695_v61  ;;  %5788 = vmatprep.subr.bf16.mxu1 %v7698_v62  ;;  %v7779_v61 = vld [vmem:[#allocation3 + $0xcb4] ss:$28 sps:$4 sm:$0xff]  }
 0x42a   :  { %5831 = vmatprep.subr.bf16.mxu0 %v7701_v63  ;;  %v7774_v62 = vld [vmem:[#allocation3 + $0x930] ss:$28 sps:$4 sm:$0xff]  }
 0x42b   :  { %5735 = vmatmul.mubr.bf16.vlgmr.msra.gmra.mxu1 %v8606_v10  ;;  %v7777_v63 = vld [vmem:[#allocation3 + $0xcb0] ss:$28 sps:$4 sm:$0xff]  }
 0x42c   :  { %5778 = vmatmul.mubr.bf16.vlgmr.msra.gmra.mxu0 %v8614_v56  ;;  %5789 = vmatpush1.bf16.msra.mxu1 %v7696_v2  ;;  %v7782_v2 = vld [vmem:[#allocation3 + $0x8fc] ss:$28 sps:$4 sm:$0xff]  }
 0x42d   :  { %5832 = vmatpush1.bf16.msra.mxu0 %v7699_v3  ;;  %5790 = vmatprep.subr.bf16.mxu1 %v7704_v4  ;;  %v7785_v3 = vld [vmem:[#allocation3 + $0xc7c] ss:$28 sps:$4 sm:$0xff]  }
 0x42e   :  { %5833 = vmatprep.subr.bf16.mxu0 %v7707_v5  ;;  %5820 = vmatprep.mubr.bf16.mxu1 %v8630_v27  ;;  %v7780_v4 = vld [vmem:[#allocation3 + $0x8f8] ss:$28 sps:$4 sm:$0xff]  }
 0x42f   :  { %5863 = vmatprep.mubr.bf16.mxu0 %v8638_v50  ;;  %v7783_v5 = vld [vmem:[#allocation3 + $0xc78] ss:$28 sps:$4 sm:$0xff]  }
 0x430   :  { %5791 = vmatpush1.bf16.msra.mxu1 %v7702_v6  ;;  %v7788_v6 = vld [vmem:[#allocation3 + $0x8c4] ss:$28 sps:$4 sm:$0xff]  }
 0x431   :  { %5834 = vmatpush1.bf16.msra.mxu0 %v7705_v7  ;;  %5792 = vmatprep.subr.bf16.mxu1 %v7710_v8  ;;  %v7791_v7 = vld [vmem:[#allocation3 + $0xc44] ss:$28 sps:$4 sm:$0xff]  }
 0x432   :  { %5835 = vmatprep.subr.bf16.mxu0 %v7713_v11  ;;  %v7786_v8 = vld [vmem:[#allocation3 + $0x8c0] ss:$28 sps:$4 sm:$0xff]  }
 0x433   :  { %v7789_v11 = vld [vmem:[#allocation3 + $0xc40] ss:$28 sps:$4 sm:$0xff]  }
 0x434   :  { %5793 = vmatpush1.bf16.msra.mxu1 %v7708_v12  ;;  %v7794_v12 = vld [vmem:[#allocation3 + $0x194] ss:$28 sps:$4 sm:$0xff]  }
 0x435   :  { %5836 = vmatpush1.bf16.msra.mxu0 %v7711_v15  ;;  %5794 = vmatprep.subr.bf16.mxu1 %v7716_v16  ;;  %v7797_v15 = vld [vmem:[#allocation3 + $0x514] ss:$28 sps:$4 sm:$0xff]  }
 0x436   :  { %5837 = vmatprep.subr.bf16.mxu0 %v7719_v1  ;;  %v7792_v16 = vld [vmem:[#allocation3 + $0x190] ss:$28 sps:$4 sm:$0xff]  }
 0x437   :  { %v7795_v1 = vld [vmem:[#allocation3 + $0x510] ss:$28 sps:$4 sm:$0xff]  }
 0x438   :  { %5795 = vmatpush1.bf16.msra.mxu1 %v7714_v17  ;;  %v7800_v17 = vld [vmem:[#allocation3 + $0x15c] ss:$28 sps:$4 sm:$0xff]  }
 0x439   :  { %5838 = vmatpush1.bf16.msra.mxu0 %v7717_v18  ;;  %5796 = vmatprep.subr.bf16.mxu1 %v7722_v19  ;;  %v7803_v18 = vld [vmem:[#allocation3 + $0x4dc] ss:$28 sps:$4 sm:$0xff]  }
 0x43a   :  { %5839 = vmatprep.subr.bf16.mxu0 %v7725_v20  ;;  %v7798_v19 = vld [vmem:[#allocation3 + $0x158] ss:$28 sps:$4 sm:$0xff]  }
 0x43b   :  { %v7801_v20 = vld [vmem:[#allocation3 + $0x4d8] ss:$28 sps:$4 sm:$0xff]  }
 0x43c   :  { %5797 = vmatpush1.bf16.msra.mxu1 %v7720_v21  ;;  %v7806_v21 = vld [vmem:[#allocation3 + $0x124] ss:$28 sps:$4 sm:$0xff]  }
 0x43d   :  { %5840 = vmatpush1.bf16.msra.mxu0 %v7723_v22  ;;  %5798 = vmatprep.subr.bf16.mxu1 %v7728_v23  ;;  %v7809_v22 = vld [vmem:[#allocation3 + $0x4a4] ss:$28 sps:$4 sm:$0xff]  }
 0x43e   :  { %5841 = vmatprep.subr.bf16.mxu0 %v7731_v26  ;;  %v7804_v23 = vld [vmem:[#allocation3 + $0x120] ss:$28 sps:$4 sm:$0xff]  }
 0x43f   :  { %v7807_v26 = vld [vmem:[#allocation3 + $0x4a0] ss:$28 sps:$4 sm:$0xff]  }
 0x440   :  { %5799 = vmatpush1.bf16.msra.mxu1 %v7726_v28  ;;  %v7812_v28 = vld [vmem:[#allocation3 + $0xec] ss:$28 sps:$4 sm:$0xff]  }
 0x441   :  { %5842 = vmatpush1.bf16.msra.mxu0 %v7729_v29  ;;  %5800 = vmatprep.subr.bf16.mxu1 %v7734_v30  ;;  %v7815_v29 = vld [vmem:[#allocation3 + $0x46c] ss:$28 sps:$4 sm:$0xff]  }
 0x442   :  { %5843 = vmatprep.subr.bf16.mxu0 %v7737_v9  ;;  %v7810_v30 = vld [vmem:[#allocation3 + $0xe8] ss:$28 sps:$4 sm:$0xff]  }
 0x443   :  { %v7813_v9 = vld [vmem:[#allocation3 + $0x468] ss:$28 sps:$4 sm:$0xff]  }
 0x444   :  { %5801 = vmatpush1.bf16.msra.mxu1 %v7732_v32  ;;  %v7818_v32 = vld [vmem:[#allocation3 + $0xb4] ss:$28 sps:$4 sm:$0xff]  }
 0x445   :  { %5844 = vmatpush1.bf16.msra.mxu0 %v7735_v33  ;;  %5802 = vmatprep.subr.bf16.mxu1 %v7740_v34  ;;  %v7821_v33 = vld [vmem:[#allocation3 + $0x434] ss:$28 sps:$4 sm:$0xff]  }
 0x446   :  { %5845 = vmatprep.subr.bf16.mxu0 %v7743_v35  ;;  %v7816_v34 = vld [vmem:[#allocation3 + $0xb0] ss:$28 sps:$4 sm:$0xff]  }
 0x447   :  { %v7819_v35 = vld [vmem:[#allocation3 + $0x430] ss:$28 sps:$4 sm:$0xff]  }
 0x448   :  { %5803 = vmatpush1.bf16.msra.mxu1 %v7738_v13  ;;  %v7824_v13 = vld [vmem:[#allocation3 + $0x7c] ss:$28 sps:$4 sm:$0xff]  }
 0x449   :  { %5846 = vmatpush1.bf16.msra.mxu0 %v7741_v37  ;;  %5804 = vmatprep.subr.bf16.mxu1 %v7746_v14  ;;  %v7827_v37 = vld [vmem:[#allocation3 + $0x3fc] ss:$28 sps:$4 sm:$0xff]  }
 0x44a   :  { %5847 = vmatprep.subr.bf16.mxu0 %v7749_v38  ;;  %v7822_v14 = vld [vmem:[#allocation3 + $0x78] ss:$28 sps:$4 sm:$0xff]  }
 0x44b   :  { %v7825_v38 = vld [vmem:[#allocation3 + $0x3f8] ss:$28 sps:$4 sm:$0xff]  }
 0x44c   :  { %5805 = vmatpush2.bf16.msra.mxu1 %v7744_v39  ;;  %v7830_v39 = vld [vmem:[#allocation3 + $0x44] ss:$28 sps:$4 sm:$0xff]  }
 0x44d   :  { %5848 = vmatpush2.bf16.msra.mxu0 %v7747_v40  ;;  %5806 = vmatprep.subr.bf16.mxu1 %v7752_v41  ;;  %v7833_v40 = vld [vmem:[#allocation3 + $0x3c4] ss:$28 sps:$4 sm:$0xff]  }
 0x44e   :  { %5849 = vmatprep.subr.bf16.mxu0 %v7755_v42  ;;  %v7828_v41 = vld [vmem:[#allocation3 + $0x40] ss:$28 sps:$4 sm:$0xff]  }
 0x44f   :  { %v7831_v42 = vld [vmem:[#allocation3 + $0x3c0] ss:$28 sps:$4 sm:$0xff]  }
 0x450   :  { %5807 = vmatpush2.bf16.msra.mxu1 %v7750_v43  ;;  %v7836_v43 = vld [vmem:[#allocation3 + $0xc] ss:$28 sps:$4 sm:$0xff]  }
 0x451   :  { %5850 = vmatpush2.bf16.msra.mxu0 %v7753_v44  ;;  %5808 = vmatprep.subr.bf16.mxu1 %v7758_v45  ;;  %v7839_v44 = vld [vmem:[#allocation3 + $0x38c] ss:$28 sps:$4 sm:$0xff]  }
 0x452   :  { %5851 = vmatprep.subr.bf16.mxu0 %v7761_v46  ;;  %v7834_v45 = vld [vmem:[#allocation3 + $0x8] ss:$28 sps:$4 sm:$0xff]  }
 0x453   :  { %v7837_v46 = vld [vmem:[#allocation3 + $0x388] ss:$28 sps:$4 sm:$0xff]  }
 0x454   :  { %5809 = vmatpush2.bf16.msra.mxu1 %v7756_v47  ;;  %v7842_v47 = vld [vmem:[#allocation3 + $0x354] ss:$28 sps:$4 sm:$0xff]  }
 0x455   :  { %5852 = vmatpush2.bf16.msra.mxu0 %v7759_v49  ;;  %5810 = vmatprep.subr.bf16.mxu1 %v7764_v51  ;;  %v7845_v49 = vld [vmem:[#allocation3 + $0x6d4] ss:$28 sps:$4 sm:$0xff]  }
 0x456   :  { %5853 = vmatprep.subr.bf16.mxu0 %v7767_v52  ;;  %v7840_v51 = vld [vmem:[#allocation3 + $0x350] ss:$28 sps:$4 sm:$0xff]  }
 0x457   :  { %v7843_v52 = vld [vmem:[#allocation3 + $0x6d0] ss:$28 sps:$4 sm:$0xff]  }
 0x458   :  { %5811 = vmatpush2.bf16.msra.mxu1 %v7762_v53  ;;  %v7848_v53 = vld [vmem:[#allocation3 + $0x31c] ss:$28 sps:$4 sm:$0xff]  }
 0x459   :  { %5854 = vmatpush2.bf16.msra.mxu0 %v7765_v54  ;;  %5812 = vmatprep.subr.bf16.mxu1 %v7770_v55  ;;  %v7851_v54 = vld [vmem:[#allocation3 + $0x69c] ss:$28 sps:$4 sm:$0xff]  }
 0x45a   :  { %5855 = vmatprep.subr.bf16.mxu0 %v7773_v57  ;;  %v7846_v55 = vld [vmem:[#allocation3 + $0x318] ss:$28 sps:$4 sm:$0xff]  }
 0x45b   :  { %v7849_v57 = vld [vmem:[#allocation3 + $0x698] ss:$28 sps:$4 sm:$0xff]  }
 0x45c   :  { %5813 = vmatpush2.bf16.msra.mxu1 %v7768_v59  ;;  %v7854_v59 = vld [vmem:[#allocation3 + $0x2e4] ss:$28 sps:$4 sm:$0xff]  }
 0x45d   :  { %5856 = vmatpush2.bf16.msra.mxu0 %v7771_v0  ;;  %5814 = vmatprep.subr.bf16.mxu1 %v7776_v60  ;;  %v7857_v0 = vld [vmem:[#allocation3 + $0x664] ss:$28 sps:$4 sm:$0xff]  }
 0x45e   :  { %5857 = vmatprep.subr.bf16.mxu0 %v7779_v61  ;;  %v7852_v60 = vld [vmem:[#allocation3 + $0x2e0] ss:$28 sps:$4 sm:$0xff]  }
 0x45f   :  { %v7855_v61 = vld [vmem:[#allocation3 + $0x660] ss:$28 sps:$4 sm:$0xff]  }
 0x460   :  { %5815 = vmatpush2.bf16.msra.mxu1 %v7774_v62  ;;  %v7860_v62 = vld [vmem:[#allocation3 + $0x2ac] ss:$28 sps:$4 sm:$0xff]  }
 0x461   :  { %5858 = vmatpush2.bf16.msra.mxu0 %v7777_v63  ;;  %5816 = vmatprep.subr.bf16.mxu1 %v7782_v2  ;;  %v7863_v63 = vld [vmem:[#allocation3 + $0x62c] ss:$28 sps:$4 sm:$0xff]  }
 0x462   :  { %5859 = vmatprep.subr.bf16.mxu0 %v7785_v3  ;;  %v7858_v2 = vld [vmem:[#allocation3 + $0x2a8] ss:$28 sps:$4 sm:$0xff]  }
 0x463   :  { %v7861_v3 = vld [vmem:[#allocation3 + $0x628] ss:$28 sps:$4 sm:$0xff]  }
 0x464   :  { %5817 = vmatpush2.bf16.msra.mxu1 %v7780_v4  ;;  %v7866_v4 = vld [vmem:[#allocation3 + $0x274] ss:$28 sps:$4 sm:$0xff]  }
 0x465   :  { %5860 = vmatpush2.bf16.msra.mxu0 %v7783_v5  ;;  %5818 = vmatprep.subr.bf16.mxu1 %v7788_v6  ;;  %v7869_v5 = vld [vmem:[#allocation3 + $0x5f4] ss:$28 sps:$4 sm:$0xff]  }
 0x466   :  { %5861 = vmatprep.subr.bf16.mxu0 %v7791_v7  ;;  %v7864_v6 = vld [vmem:[#allocation3 + $0x270] ss:$28 sps:$4 sm:$0xff]  }
 0x467   :  { %v7867_v7 = vld [vmem:[#allocation3 + $0x5f0] ss:$28 sps:$4 sm:$0xff]  }
 0x468   :  { %5819 = vmatpush2.bf16.msra.mxu1 %v7786_v8  ;;  %v7872_v8 = vld [vmem:[#allocation3 + $0x23c] ss:$28 sps:$4 sm:$0xff]  }
 0x469   :  { %5862 = vmatpush2.bf16.msra.mxu0 %v7789_v11  ;;  %5874 = vmatprep.subr.bf16.mxu1 %v7794_v12  ;;  %v7875_v11 = vld [vmem:[#allocation3 + $0x5bc] ss:$28 sps:$4 sm:$0xff]  }
 0x46a   :  { %5917 = vmatprep.subr.bf16.mxu0 %v7797_v15  ;;  %v7870_v12 = vld [vmem:[#allocation3 + $0x238] ss:$28 sps:$4 sm:$0xff]  }
 0x46b   :  { %5821 = vmatmul.mubr.bf16.vlgmr.msra.gmra.mxu1 %v8627_v24  ;;  %v7873_v15 = vld [vmem:[#allocation3 + $0x5b8] ss:$28 sps:$4 sm:$0xff]  }
 0x46c   :  { %5864 = vmatmul.mubr.bf16.vlgmr.msra.gmra.mxu0 %v8635_v48  ;;  %5875 = vmatpush1.bf16.msra.mxu1 %v7792_v16  ;;  %v7878_v16 = vld [vmem:[#allocation3 + $0x204] ss:$28 sps:$4 sm:$0xff]  }
 0x46d   :  { %5918 = vmatpush1.bf16.msra.mxu0 %v7795_v1  ;;  %5876 = vmatprep.subr.bf16.mxu1 %v7800_v17  ;;  %v7881_v1 = vld [vmem:[#allocation3 + $0x584] ss:$28 sps:$4 sm:$0xff]  }
 0x46e   :  { %5919 = vmatprep.subr.bf16.mxu0 %v7803_v18  ;;  %5906 = vmatprep.mubr.bf16.mxu1 %v8609_v36  ;;  %v7876_v17 = vld [vmem:[#allocation3 + $0x200] ss:$28 sps:$4 sm:$0xff]  }
 0x46f   :  { %5949 = vmatprep.mubr.bf16.mxu0 %v8617_v58  ;;  %v7879_v18 = vld [vmem:[#allocation3 + $0x580] ss:$28 sps:$4 sm:$0xff]  }
 0x470   :  { %5877 = vmatpush1.bf16.msra.mxu1 %v7798_v19  ;;  %v7884_v19 = vld [vmem:[#allocation3 + $0x1cc] ss:$28 sps:$4 sm:$0xff]  }
 0x471   :  { %5920 = vmatpush1.bf16.msra.mxu0 %v7801_v20  ;;  %5878 = vmatprep.subr.bf16.mxu1 %v7806_v21  ;;  %v7887_v20 = vld [vmem:[#allocation3 + $0x54c] ss:$28 sps:$4 sm:$0xff]  }
 0x472   :  { %5921 = vmatprep.subr.bf16.mxu0 %v7809_v22  ;;  %v7882_v21 = vld [vmem:[#allocation3 + $0x1c8] ss:$28 sps:$4 sm:$0xff]  }
 0x473   :  { %v7885_v22 = vld [vmem:[#allocation3 + $0x548] ss:$28 sps:$4 sm:$0xff]  }
 0x474   :  { %5879 = vmatpush1.bf16.msra.mxu1 %v7804_v23  ;;  %v7890_v23 = vld [vmem:[#allocation3 + $0x894] ss:$28 sps:$4 sm:$0xff]  }
 0x475   :  { %5922 = vmatpush1.bf16.msra.mxu0 %v7807_v26  ;;  %5880 = vmatprep.subr.bf16.mxu1 %v7812_v28  ;;  %v7893_v26 = vld [vmem:[#allocation3 + $0xc14] ss:$28 sps:$4 sm:$0xff]  }
 0x476   :  { %5923 = vmatprep.subr.bf16.mxu0 %v7815_v29  ;;  %v7888_v28 = vld [vmem:[#allocation3 + $0x890] ss:$28 sps:$4 sm:$0xff]  }
 0x477   :  { %v7891_v29 = vld [vmem:[#allocation3 + $0xc10] ss:$28 sps:$4 sm:$0xff]  }
 0x478   :  { %5881 = vmatpush1.bf16.msra.mxu1 %v7810_v30  ;;  %v7896_v30 = vld [vmem:[#allocation3 + $0x85c] ss:$28 sps:$4 sm:$0xff]  }
 0x479   :  { %5924 = vmatpush1.bf16.msra.mxu0 %v7813_v9  ;;  %5882 = vmatprep.subr.bf16.mxu1 %v7818_v32  ;;  %v7899_v9 = vld [vmem:[#allocation3 + $0xbdc] ss:$28 sps:$4 sm:$0xff]  }
 0x47a   :  { %5925 = vmatprep.subr.bf16.mxu0 %v7821_v33  ;;  %v7894_v32 = vld [vmem:[#allocation3 + $0x858] ss:$28 sps:$4 sm:$0xff]  }
 0x47b   :  { %v7897_v33 = vld [vmem:[#allocation3 + $0xbd8] ss:$28 sps:$4 sm:$0xff]  }
 0x47c   :  { %5883 = vmatpush1.bf16.msra.mxu1 %v7816_v34  ;;  %v7902_v34 = vld [vmem:[#allocation3 + $0x824] ss:$28 sps:$4 sm:$0xff]  }
 0x47d   :  { %5926 = vmatpush1.bf16.msra.mxu0 %v7819_v35  ;;  %5884 = vmatprep.subr.bf16.mxu1 %v7824_v13  ;;  %v7905_v35 = vld [vmem:[#allocation3 + $0xba4] ss:$28 sps:$4 sm:$0xff]  }
 0x47e   :  { %5927 = vmatprep.subr.bf16.mxu0 %v7827_v37  ;;  %v7900_v13 = vld [vmem:[#allocation3 + $0x820] ss:$28 sps:$4 sm:$0xff]  }
 0x47f   :  { %v7903_v37 = vld [vmem:[#allocation3 + $0xba0] ss:$28 sps:$4 sm:$0xff]  }
 0x480   :  { %5885 = vmatpush1.bf16.msra.mxu1 %v7822_v14  ;;  %v7908_v14 = vld [vmem:[#allocation3 + $0x7ec] ss:$28 sps:$4 sm:$0xff]  }
 0x481   :  { %5928 = vmatpush1.bf16.msra.mxu0 %v7825_v38  ;;  %5886 = vmatprep.subr.bf16.mxu1 %v7830_v39  ;;  %v7911_v38 = vld [vmem:[#allocation3 + $0xb6c] ss:$28 sps:$4 sm:$0xff]  }
 0x482   :  { %5929 = vmatprep.subr.bf16.mxu0 %v7833_v40  ;;  %v7906_v39 = vld [vmem:[#allocation3 + $0x7e8] ss:$28 sps:$4 sm:$0xff]  }
 0x483   :  { %v7909_v40 = vld [vmem:[#allocation3 + $0xb68] ss:$28 sps:$4 sm:$0xff]  }
 0x484   :  { %5887 = vmatpush1.bf16.msra.mxu1 %v7828_v41  ;;  %v7914_v41 = vld [vmem:[#allocation3 + $0x7b4] ss:$28 sps:$4 sm:$0xff]  }
 0x485   :  { %5930 = vmatpush1.bf16.msra.mxu0 %v7831_v42  ;;  %5888 = vmatprep.subr.bf16.mxu1 %v7836_v43  ;;  %v7917_v42 = vld [vmem:[#allocation3 + $0xb34] ss:$28 sps:$4 sm:$0xff]  }
 0x486   :  { %5931 = vmatprep.subr.bf16.mxu0 %v7839_v44  ;;  %v7912_v43 = vld [vmem:[#allocation3 + $0x7b0] ss:$28 sps:$4 sm:$0xff]  }
 0x487   :  { %v7915_v44 = vld [vmem:[#allocation3 + $0xb30] ss:$28 sps:$4 sm:$0xff]  }
 0x488   :  { %5889 = vmatpush1.bf16.msra.mxu1 %v7834_v45  ;;  %v7920_v45 = vld [vmem:[#allocation3 + $0x77c] ss:$28 sps:$4 sm:$0xff]  }
 0x489   :  { %5932 = vmatpush1.bf16.msra.mxu0 %v7837_v46  ;;  %5890 = vmatprep.subr.bf16.mxu1 %v7842_v47  ;;  %v7923_v46 = vld [vmem:[#allocation3 + $0xafc] ss:$28 sps:$4 sm:$0xff]  }
 0x48a   :  { %5933 = vmatprep.subr.bf16.mxu0 %v7845_v49  ;;  %v7918_v47 = vld [vmem:[#allocation3 + $0x778] ss:$28 sps:$4 sm:$0xff]  }
 0x48b   :  { %v7921_v49 = vld [vmem:[#allocation3 + $0xaf8] ss:$28 sps:$4 sm:$0xff]  }
 0x48c   :  { %5891 = vmatpush2.bf16.msra.mxu1 %v7840_v51  ;;  %v7926_v51 = vld [vmem:[#allocation3 + $0x744] ss:$28 sps:$4 sm:$0xff]  }
 0x48d   :  { %5934 = vmatpush2.bf16.msra.mxu0 %v7843_v52  ;;  %5892 = vmatprep.subr.bf16.mxu1 %v7848_v53  ;;  %v7929_v52 = vld [vmem:[#allocation3 + $0xac4] ss:$28 sps:$4 sm:$0xff]  }
 0x48e   :  { %5935 = vmatprep.subr.bf16.mxu0 %v7851_v54  ;;  %v7924_v53 = vld [vmem:[#allocation3 + $0x740] ss:$28 sps:$4 sm:$0xff]  }
 0x48f   :  { %v7927_v54 = vld [vmem:[#allocation3 + $0xac0] ss:$28 sps:$4 sm:$0xff]  }
 0x490   :  { %5893 = vmatpush2.bf16.msra.mxu1 %v7846_v55  ;;  %v7932_v55 = vld [vmem:[#allocation3 + $0x70c] ss:$28 sps:$4 sm:$0xff]  }
 0x491   :  { %5936 = vmatpush2.bf16.msra.mxu0 %v7849_v57  ;;  %5894 = vmatprep.subr.bf16.mxu1 %v7854_v59  ;;  %v7935_v57 = vld [vmem:[#allocation3 + $0xa8c] ss:$28 sps:$4 sm:$0xff]  }
 0x492   :  { %5937 = vmatprep.subr.bf16.mxu0 %v7857_v0  ;;  %v7930_v59 = vld [vmem:[#allocation3 + $0x708] ss:$28 sps:$4 sm:$0xff]  }
 0x493   :  { %v7933_v0 = vld [vmem:[#allocation3 + $0xa88] ss:$28 sps:$4 sm:$0xff]  }
 0x494   :  { %5895 = vmatpush2.bf16.msra.mxu1 %v7852_v60  ;;  %v7938_v60 = vld [vmem:[#allocation3 + $0xa54] ss:$28 sps:$4 sm:$0xff]  }
 0x495   :  { %5938 = vmatpush2.bf16.msra.mxu0 %v7855_v61  ;;  %5896 = vmatprep.subr.bf16.mxu1 %v7860_v62  ;;  %v7941_v61 = vld [vmem:[#allocation3 + $0xdd4] ss:$28 sps:$4 sm:$0xff]  }
 0x496   :  { %5939 = vmatprep.subr.bf16.mxu0 %v7863_v63  ;;  %v7936_v62 = vld [vmem:[#allocation3 + $0xa50] ss:$28 sps:$4 sm:$0xff]  }
 0x497   :  { %v7939_v63 = vld [vmem:[#allocation3 + $0xdd0] ss:$28 sps:$4 sm:$0xff]  }
 0x498   :  { %5897 = vmatpush2.bf16.msra.mxu1 %v7858_v2  ;;  %v7944_v2 = vld [vmem:[#allocation3 + $0xa1c] ss:$28 sps:$4 sm:$0xff]  }
 0x499   :  { %5940 = vmatpush2.bf16.msra.mxu0 %v7861_v3  ;;  %5898 = vmatprep.subr.bf16.mxu1 %v7866_v4  ;;  %v7947_v3 = vld [vmem:[#allocation3 + $0xd9c] ss:$28 sps:$4 sm:$0xff]  }
 0x49a   :  { %5941 = vmatprep.subr.bf16.mxu0 %v7869_v5  ;;  %v7942_v4 = vld [vmem:[#allocation3 + $0xa18] ss:$28 sps:$4 sm:$0xff]  }
 0x49b   :  { %v7945_v5 = vld [vmem:[#allocation3 + $0xd98] ss:$28 sps:$4 sm:$0xff]  }
 0x49c   :  { %5899 = vmatpush2.bf16.msra.mxu1 %v7864_v6  ;;  %v7950_v6 = vld [vmem:[#allocation3 + $0x9e4] ss:$28 sps:$4 sm:$0xff]  }
 0x49d   :  { %5942 = vmatpush2.bf16.msra.mxu0 %v7867_v7  ;;  %5900 = vmatprep.subr.bf16.mxu1 %v7872_v8  ;;  %v7953_v7 = vld [vmem:[#allocation3 + $0xd64] ss:$28 sps:$4 sm:$0xff]  }
 0x49e   :  { %5943 = vmatprep.subr.bf16.mxu0 %v7875_v11  ;;  %v7948_v8 = vld [vmem:[#allocation3 + $0x9e0] ss:$28 sps:$4 sm:$0xff]  }
 0x49f   :  { %v7951_v11 = vld [vmem:[#allocation3 + $0xd60] ss:$28 sps:$4 sm:$0xff]  }
 0x4a0   :  { %5901 = vmatpush2.bf16.msra.mxu1 %v7870_v12  ;;  %v7956_v12 = vld [vmem:[#allocation3 + $0x9ac] ss:$28 sps:$4 sm:$0xff]  }
 0x4a1   :  { %5944 = vmatpush2.bf16.msra.mxu0 %v7873_v15  ;;  %5902 = vmatprep.subr.bf16.mxu1 %v7878_v16  ;;  %v7959_v15 = vld [vmem:[#allocation3 + $0xd2c] ss:$28 sps:$4 sm:$0xff]  }
 0x4a2   :  { %5945 = vmatprep.subr.bf16.mxu0 %v7881_v1  ;;  %v7954_v16 = vld [vmem:[#allocation3 + $0x9a8] ss:$28 sps:$4 sm:$0xff]  }
 0x4a3   :  { %v7957_v1 = vld [vmem:[#allocation3 + $0xd28] ss:$28 sps:$4 sm:$0xff]  }
 0x4a4   :  { %5903 = vmatpush2.bf16.msra.mxu1 %v7876_v17  ;;  %v7962_v17 = vld [vmem:[#allocation3 + $0x974] ss:$28 sps:$4 sm:$0xff]  }
 0x4a5   :  { %5946 = vmatpush2.bf16.msra.mxu0 %v7879_v18  ;;  %5904 = vmatprep.subr.bf16.mxu1 %v7884_v19  ;;  %v7965_v18 = vld [vmem:[#allocation3 + $0xcf4] ss:$28 sps:$4 sm:$0xff]  }
 0x4a6   :  { %5947 = vmatprep.subr.bf16.mxu0 %v7887_v20  ;;  %v7960_v19 = vld [vmem:[#allocation3 + $0x970] ss:$28 sps:$4 sm:$0xff]  }
 0x4a7   :  { %v7963_v20 = vld [vmem:[#allocation3 + $0xcf0] ss:$28 sps:$4 sm:$0xff]  }
 0x4a8   :  { %5905 = vmatpush2.bf16.msra.mxu1 %v7882_v21  ;;  %v7968_v21 = vld [vmem:[#allocation3 + $0x93c] ss:$28 sps:$4 sm:$0xff]  }
 0x4a9   :  { %5948 = vmatpush2.bf16.msra.mxu0 %v7885_v22  ;;  %5960 = vmatprep.subr.bf16.mxu1 %v7890_v23  ;;  %v7971_v22 = vld [vmem:[#allocation3 + $0xcbc] ss:$28 sps:$4 sm:$0xff]  }
 0x4aa   :  { %6003 = vmatprep.subr.bf16.mxu0 %v7893_v26  ;;  %v7966_v23 = vld [vmem:[#allocation3 + $0x938] ss:$28 sps:$4 sm:$0xff]  }
 0x4ab   :  { %5907 = vmatmul.mubr.bf16.vlgmr.msra.gmra.mxu1 %v8606_v10  ;;  %v7969_v26 = vld [vmem:[#allocation3 + $0xcb8] ss:$28 sps:$4 sm:$0xff]  }
 0x4ac   :  { %5950 = vmatmul.mubr.bf16.vlgmr.msra.gmra.mxu0 %v8614_v56  ;;  %5961 = vmatpush1.bf16.msra.mxu1 %v7888_v28  ;;  %v7974_v28 = vld [vmem:[#allocation3 + $0x904] ss:$28 sps:$4 sm:$0xff]  }
 0x4ad   :  { %6004 = vmatpush1.bf16.msra.mxu0 %v7891_v29  ;;  %5962 = vmatprep.subr.bf16.mxu1 %v7896_v30  ;;  %v7977_v29 = vld [vmem:[#allocation3 + $0xc84] ss:$28 sps:$4 sm:$0xff]  }
 0x4ae   :  { %6005 = vmatprep.subr.bf16.mxu0 %v7899_v9  ;;  %5992 = vmatprep.mubr.bf16.mxu1 %v8630_v27  ;;  %v7972_v30 = vld [vmem:[#allocation3 + $0x900] ss:$28 sps:$4 sm:$0xff]  }
 0x4af   :  { %6035 = vmatprep.mubr.bf16.mxu0 %v8638_v50  ;;  %v7975_v9 = vld [vmem:[#allocation3 + $0xc80] ss:$28 sps:$4 sm:$0xff]  }
 0x4b0   :  { %5963 = vmatpush1.bf16.msra.mxu1 %v7894_v32  ;;  %v7980_v32 = vld [vmem:[#allocation3 + $0x8cc] ss:$28 sps:$4 sm:$0xff]  }
 0x4b1   :  { %6006 = vmatpush1.bf16.msra.mxu0 %v7897_v33  ;;  %5964 = vmatprep.subr.bf16.mxu1 %v7902_v34  ;;  %v7983_v33 = vld [vmem:[#allocation3 + $0xc4c] ss:$28 sps:$4 sm:$0xff]  }
 0x4b2   :  { %6007 = vmatprep.subr.bf16.mxu0 %v7905_v35  ;;  %v7978_v34 = vld [vmem:[#allocation3 + $0x8c8] ss:$28 sps:$4 sm:$0xff]  }
 0x4b3   :  { %v7981_v35 = vld [vmem:[#allocation3 + $0xc48] ss:$28 sps:$4 sm:$0xff]  }
 0x4b4   :  { %5965 = vmatpush1.bf16.msra.mxu1 %v7900_v13  ;;  %v7986_v13 = vld [vmem:[#allocation3 + $0x19c] ss:$28 sps:$4 sm:$0xff]  }
 0x4b5   :  { %6008 = vmatpush1.bf16.msra.mxu0 %v7903_v37  ;;  %5966 = vmatprep.subr.bf16.mxu1 %v7908_v14  ;;  %v7989_v37 = vld [vmem:[#allocation3 + $0x51c] ss:$28 sps:$4 sm:$0xff]  }
 0x4b6   :  { %6009 = vmatprep.subr.bf16.mxu0 %v7911_v38  ;;  %v7984_v14 = vld [vmem:[#allocation3 + $0x198] ss:$28 sps:$4 sm:$0xff]  }
 0x4b7   :  { %v7987_v38 = vld [vmem:[#allocation3 + $0x518] ss:$28 sps:$4 sm:$0xff]  }
 0x4b8   :  { %5967 = vmatpush1.bf16.msra.mxu1 %v7906_v39  ;;  %v7992_v39 = vld [vmem:[#allocation3 + $0x164] ss:$28 sps:$4 sm:$0xff]  }
 0x4b9   :  { %6010 = vmatpush1.bf16.msra.mxu0 %v7909_v40  ;;  %5968 = vmatprep.subr.bf16.mxu1 %v7914_v41  ;;  %v7995_v40 = vld [vmem:[#allocation3 + $0x4e4] ss:$28 sps:$4 sm:$0xff]  }
 0x4ba   :  { %6011 = vmatprep.subr.bf16.mxu0 %v7917_v42  ;;  %v7990_v41 = vld [vmem:[#allocation3 + $0x160] ss:$28 sps:$4 sm:$0xff]  }
 0x4bb   :  { %v7993_v42 = vld [vmem:[#allocation3 + $0x4e0] ss:$28 sps:$4 sm:$0xff]  }
 0x4bc   :  { %5969 = vmatpush1.bf16.msra.mxu1 %v7912_v43  ;;  %v7998_v43 = vld [vmem:[#allocation3 + $0x12c] ss:$28 sps:$4 sm:$0xff]  }
 0x4bd   :  { %6012 = vmatpush1.bf16.msra.mxu0 %v7915_v44  ;;  %5970 = vmatprep.subr.bf16.mxu1 %v7920_v45  ;;  %v8001_v44 = vld [vmem:[#allocation3 + $0x4ac] ss:$28 sps:$4 sm:$0xff]  }
 0x4be   :  { %6013 = vmatprep.subr.bf16.mxu0 %v7923_v46  ;;  %v7996_v45 = vld [vmem:[#allocation3 + $0x128] ss:$28 sps:$4 sm:$0xff]  }
 0x4bf   :  { %v7999_v46 = vld [vmem:[#allocation3 + $0x4a8] ss:$28 sps:$4 sm:$0xff]  }
 0x4c0   :  { %5971 = vmatpush1.bf16.msra.mxu1 %v7918_v47  ;;  %v8004_v47 = vld [vmem:[#allocation3 + $0xf4] ss:$28 sps:$4 sm:$0xff]  }
 0x4c1   :  { %6014 = vmatpush1.bf16.msra.mxu0 %v7921_v49  ;;  %5972 = vmatprep.subr.bf16.mxu1 %v7926_v51  ;;  %v8007_v49 = vld [vmem:[#allocation3 + $0x474] ss:$28 sps:$4 sm:$0xff]  }
 0x4c2   :  { %6015 = vmatprep.subr.bf16.mxu0 %v7929_v52  ;;  %v8002_v51 = vld [vmem:[#allocation3 + $0xf0] ss:$28 sps:$4 sm:$0xff]  }
 0x4c3   :  { %v8005_v52 = vld [vmem:[#allocation3 + $0x470] ss:$28 sps:$4 sm:$0xff]  }
 0x4c4   :  { %5973 = vmatpush1.bf16.msra.mxu1 %v7924_v53  ;;  %v8010_v53 = vld [vmem:[#allocation3 + $0xbc] ss:$28 sps:$4 sm:$0xff]  }
 0x4c5   :  { %6016 = vmatpush1.bf16.msra.mxu0 %v7927_v54  ;;  %5974 = vmatprep.subr.bf16.mxu1 %v7932_v55  ;;  %v8013_v54 = vld [vmem:[#allocation3 + $0x43c] ss:$28 sps:$4 sm:$0xff]  }
 0x4c6   :  { %6017 = vmatprep.subr.bf16.mxu0 %v7935_v57  ;;  %v8008_v55 = vld [vmem:[#allocation3 + $0xb8] ss:$28 sps:$4 sm:$0xff]  }
 0x4c7   :  { %v8011_v57 = vld [vmem:[#allocation3 + $0x438] ss:$28 sps:$4 sm:$0xff]  }
 0x4c8   :  { %5975 = vmatpush1.bf16.msra.mxu1 %v7930_v59  ;;  %v8016_v59 = vld [vmem:[#allocation3 + $0x84] ss:$28 sps:$4 sm:$0xff]  }
 0x4c9   :  { %6018 = vmatpush1.bf16.msra.mxu0 %v7933_v0  ;;  %5976 = vmatprep.subr.bf16.mxu1 %v7938_v60  ;;  %v8019_v0 = vld [vmem:[#allocation3 + $0x404] ss:$28 sps:$4 sm:$0xff]  }
 0x4ca   :  { %6019 = vmatprep.subr.bf16.mxu0 %v7941_v61  ;;  %v8014_v60 = vld [vmem:[#allocation3 + $0x80] ss:$28 sps:$4 sm:$0xff]  }
 0x4cb   :  { %v8017_v61 = vld [vmem:[#allocation3 + $0x400] ss:$28 sps:$4 sm:$0xff]  }
 0x4cc   :  { %5977 = vmatpush2.bf16.msra.mxu1 %v7936_v62  ;;  %v8022_v62 = vld [vmem:[#allocation3 + $0x4c] ss:$28 sps:$4 sm:$0xff]  }
 0x4cd   :  { %6020 = vmatpush2.bf16.msra.mxu0 %v7939_v63  ;;  %5978 = vmatprep.subr.bf16.mxu1 %v7944_v2  ;;  %v8025_v63 = vld [vmem:[#allocation3 + $0x3cc] ss:$28 sps:$4 sm:$0xff]  }
 0x4ce   :  { %6021 = vmatprep.subr.bf16.mxu0 %v7947_v3  ;;  %v8020_v2 = vld [vmem:[#allocation3 + $0x48] ss:$28 sps:$4 sm:$0xff]  }
 0x4cf   :  { %v8023_v3 = vld [vmem:[#allocation3 + $0x3c8] ss:$28 sps:$4 sm:$0xff]  }
 0x4d0   :  { %5979 = vmatpush2.bf16.msra.mxu1 %v7942_v4  ;;  %v8028_v4 = vld [vmem:[#allocation3 + $0x14] ss:$28 sps:$4 sm:$0xff]  }
 0x4d1   :  { %6022 = vmatpush2.bf16.msra.mxu0 %v7945_v5  ;;  %5980 = vmatprep.subr.bf16.mxu1 %v7950_v6  ;;  %v8031_v5 = vld [vmem:[#allocation3 + $0x394] ss:$28 sps:$4 sm:$0xff]  }
 0x4d2   :  { %6023 = vmatprep.subr.bf16.mxu0 %v7953_v7  ;;  %v8026_v6 = vld [vmem:[#allocation3 + $0x10] ss:$28 sps:$4 sm:$0xff]  }
 0x4d3   :  { %v8029_v7 = vld [vmem:[#allocation3 + $0x390] ss:$28 sps:$4 sm:$0xff]  }
 0x4d4   :  { %5981 = vmatpush2.bf16.msra.mxu1 %v7948_v8  ;;  %v8034_v8 = vld [vmem:[#allocation3 + $0x35c] ss:$28 sps:$4 sm:$0xff]  }
 0x4d5   :  { %6024 = vmatpush2.bf16.msra.mxu0 %v7951_v11  ;;  %5982 = vmatprep.subr.bf16.mxu1 %v7956_v12  ;;  %v8037_v11 = vld [vmem:[#allocation3 + $0x6dc] ss:$28 sps:$4 sm:$0xff]  }
 0x4d6   :  { %6025 = vmatprep.subr.bf16.mxu0 %v7959_v15  ;;  %v8032_v12 = vld [vmem:[#allocation3 + $0x358] ss:$28 sps:$4 sm:$0xff]  }
 0x4d7   :  { %v8035_v15 = vld [vmem:[#allocation3 + $0x6d8] ss:$28 sps:$4 sm:$0xff]  }
 0x4d8   :  { %5983 = vmatpush2.bf16.msra.mxu1 %v7954_v16  ;;  %v8040_v16 = vld [vmem:[#allocation3 + $0x324] ss:$28 sps:$4 sm:$0xff]  }
 0x4d9   :  { %6026 = vmatpush2.bf16.msra.mxu0 %v7957_v1  ;;  %5984 = vmatprep.subr.bf16.mxu1 %v7962_v17  ;;  %v8043_v1 = vld [vmem:[#allocation3 + $0x6a4] ss:$28 sps:$4 sm:$0xff]  }
 0x4da   :  { %6027 = vmatprep.subr.bf16.mxu0 %v7965_v18  ;;  %v8038_v17 = vld [vmem:[#allocation3 + $0x320] ss:$28 sps:$4 sm:$0xff]  }
 0x4db   :  { %v8041_v18 = vld [vmem:[#allocation3 + $0x6a0] ss:$28 sps:$4 sm:$0xff]  }
 0x4dc   :  { %5985 = vmatpush2.bf16.msra.mxu1 %v7960_v19  ;;  %v8046_v19 = vld [vmem:[#allocation3 + $0x2ec] ss:$28 sps:$4 sm:$0xff]  }
 0x4dd   :  { %6028 = vmatpush2.bf16.msra.mxu0 %v7963_v20  ;;  %5986 = vmatprep.subr.bf16.mxu1 %v7968_v21  ;;  %v8049_v20 = vld [vmem:[#allocation3 + $0x66c] ss:$28 sps:$4 sm:$0xff]  }
 0x4de   :  { %6029 = vmatprep.subr.bf16.mxu0 %v7971_v22  ;;  %v8044_v21 = vld [vmem:[#allocation3 + $0x2e8] ss:$28 sps:$4 sm:$0xff]  }
 0x4df   :  { %v8047_v22 = vld [vmem:[#allocation3 + $0x668] ss:$28 sps:$4 sm:$0xff]  }
 0x4e0   :  { %5987 = vmatpush2.bf16.msra.mxu1 %v7966_v23  ;;  %v8052_v23 = vld [vmem:[#allocation3 + $0x2b4] ss:$28 sps:$4 sm:$0xff]  }
 0x4e1   :  { %6030 = vmatpush2.bf16.msra.mxu0 %v7969_v26  ;;  %5988 = vmatprep.subr.bf16.mxu1 %v7974_v28  ;;  %v8055_v26 = vld [vmem:[#allocation3 + $0x634] ss:$28 sps:$4 sm:$0xff]  }
 0x4e2   :  { %6031 = vmatprep.subr.bf16.mxu0 %v7977_v29  ;;  %v8050_v28 = vld [vmem:[#allocation3 + $0x2b0] ss:$28 sps:$4 sm:$0xff]  }
 0x4e3   :  { %v8053_v29 = vld [vmem:[#allocation3 + $0x630] ss:$28 sps:$4 sm:$0xff]  }
 0x4e4   :  { %5989 = vmatpush2.bf16.msra.mxu1 %v7972_v30  ;;  %v8058_v30 = vld [vmem:[#allocation3 + $0x27c] ss:$28 sps:$4 sm:$0xff]  }
 0x4e5   :  { %6032 = vmatpush2.bf16.msra.mxu0 %v7975_v9  ;;  %5990 = vmatprep.subr.bf16.mxu1 %v7980_v32  ;;  %v8061_v9 = vld [vmem:[#allocation3 + $0x5fc] ss:$28 sps:$4 sm:$0xff]  }
 0x4e6   :  { %6033 = vmatprep.subr.bf16.mxu0 %v7983_v33  ;;  %v8056_v32 = vld [vmem:[#allocation3 + $0x278] ss:$28 sps:$4 sm:$0xff]  }
 0x4e7   :  { %v8059_v33 = vld [vmem:[#allocation3 + $0x5f8] ss:$28 sps:$4 sm:$0xff]  }
 0x4e8   :  { %5991 = vmatpush2.bf16.msra.mxu1 %v7978_v34  ;;  %v8064_v34 = vld [vmem:[#allocation3 + $0x244] ss:$28 sps:$4 sm:$0xff]  }
 0x4e9   :  { %6034 = vmatpush2.bf16.msra.mxu0 %v7981_v35  ;;  %6046 = vmatprep.subr.bf16.mxu1 %v7986_v13  ;;  %v8067_v35 = vld [vmem:[#allocation3 + $0x5c4] ss:$28 sps:$4 sm:$0xff]  }
 0x4ea   :  { %6089 = vmatprep.subr.bf16.mxu0 %v7989_v37  ;;  %v8062_v13 = vld [vmem:[#allocation3 + $0x240] ss:$28 sps:$4 sm:$0xff]  }
 0x4eb   :  { %5993 = vmatmul.mubr.bf16.vlgmr.msra.gmra.mxu1 %v8627_v24  ;;  %v8065_v37 = vld [vmem:[#allocation3 + $0x5c0] ss:$28 sps:$4 sm:$0xff]  }
 0x4ec   :  { %6036 = vmatmul.mubr.bf16.vlgmr.msra.gmra.mxu0 %v8635_v48  ;;  %6047 = vmatpush1.bf16.msra.mxu1 %v7984_v14  ;;  %v8070_v14 = vld [vmem:[#allocation3 + $0x20c] ss:$28 sps:$4 sm:$0xff]  }
 0x4ed   :  { %6090 = vmatpush1.bf16.msra.mxu0 %v7987_v38  ;;  %6048 = vmatprep.subr.bf16.mxu1 %v7992_v39  ;;  %v5736_v38 = vpop.f32.mrf.mxu1  ;;  %v5779_v39 = vpop.f32.mrf.mxu0 }
 0x4ee   :  { %6091 = vmatprep.subr.bf16.mxu0 %v7995_v40  ;;  %6078 = vmatprep.mubr.bf16.mxu1 %v8609_v36  ;;  %v8073_v40 = vld [vmem:[#allocation3 + $0x58c] ss:$28 sps:$4 sm:$0xff]  }
 0x4ef   :  { %6121 = vmatprep.mubr.bf16.mxu0 %v8617_v58 }
 0x4f0   :  { %6049 = vmatpush1.bf16.msra.mxu1 %v7990_v41  ;;  %v8068_v41 = vld [vmem:[#allocation3 + $0x208] ss:$28 sps:$4 sm:$0xff]  }
 0x4f1   :  { %6092 = vmatpush1.bf16.msra.mxu0 %v7993_v42  ;;  %6050 = vmatprep.subr.bf16.mxu1 %v7998_v43  ;;  %v8071_v42 = vld [vmem:[#allocation3 + $0x588] ss:$28 sps:$4 sm:$0xff]   ;;  %v8076_v43 = vld [vmem:[#allocation3 + $0x1d4] ss:$28 sps:$4 sm:$0xff]  }
 0x4f2   :  { %6093 = vmatprep.subr.bf16.mxu0 %v8001_v44  ;;  %v8658_v44 = vld [vmem:[#allocation16] sm:$0x7f] }
 0x4f4   :  { %6051 = vmatpush1.bf16.msra.mxu1 %v7996_v45  ;;  %v5738_v45 = vpop.f32.mrf.mxu1 }
 0x4f5   :  { %6094 = vmatpush1.bf16.msra.mxu0 %v7999_v46  ;;  %6052 = vmatprep.subr.bf16.mxu1 %v8004_v47  ;;  %v5781_v46 = vpop.f32.mrf.mxu0  ;;  %v8079_v47 = vld [vmem:[#allocation3 + $0x554] ss:$28 sps:$4 sm:$0xff]  }
 0x4f6   :  { %6095 = vmatprep.subr.bf16.mxu0 %v8007_v49  ;;  %v8074_v49 = vld [vmem:[#allocation3 + $0x1d0] ss:$28 sps:$4 sm:$0xff]  }
 0x4f8   :  { %6053 = vmatpush1.bf16.msra.mxu1 %v8002_v51  ;;  %v8077_v51 = vld [vmem:[#allocation3 + $0x550] ss:$28 sps:$4 sm:$0xff]  }
 0x4f9   :  { %6096 = vmatpush1.bf16.msra.mxu0 %v8005_v52  ;;  %6054 = vmatprep.subr.bf16.mxu1 %v8010_v53  ;;  %v6398_v52 = vrot.slane %v8658_v44, %v8547_v25  ;;  %v8082_v53 = vld [vmem:[#allocation3 + $0x89c] ss:$28 sps:$4 sm:$0xff]  }
 0x4fa   :  { %6097 = vmatprep.subr.bf16.mxu0 %v8013_v54  ;;  %v5740_v54 = vpop.f32.mrf.mxu1 }
 0x4fc   :  { %6055 = vmatpush1.bf16.msra.mxu1 %v8008_v55  ;;  %v5783_v55 = vpop.f32.mrf.mxu0 }
 0x4fd   :  { %6098 = vmatpush1.bf16.msra.mxu0 %v8011_v57  ;;  %6056 = vmatprep.subr.bf16.mxu1 %v8016_v59  ;;  %v8085_v57 = vld [vmem:[#allocation3 + $0xc1c] ss:$28 sps:$4 sm:$0xff]   ;;  %v6406_v59 = vcombine.high %v6398_v52, %v6398_v52 }
 0x4fe   :  { %6099 = vmatprep.subr.bf16.mxu0 %v8019_v0  ;;  %v8080_v0 = vld [vmem:[#allocation3 + $0x898] ss:$28 sps:$4 sm:$0xff]  }
 0x500   :  { %6057 = vmatpush1.bf16.msra.mxu1 %v8014_v60  ;;  %v8083_v60 = vld [vmem:[#allocation3 + $0xc18] ss:$28 sps:$4 sm:$0xff]  }
 0x501   :  { %6100 = vmatpush1.bf16.msra.mxu0 %v8017_v61  ;;  %6058 = vmatprep.subr.bf16.mxu1 %v8022_v62  ;;  %v5742_v61 = vpop.f32.mrf.mxu1  ;;  %v5785_v62 = vpop.f32.mrf.mxu0 }
 0x502   :  { %6101 = vmatprep.subr.bf16.mxu0 %v8025_v63  ;;  %v8088_v63 = vld [vmem:[#allocation3 + $0x864] ss:$28 sps:$4 sm:$0xff]  }
 0x504   :  { %6059 = vmatpush1.bf16.msra.mxu1 %v8020_v2  ;;  %v8091_v2 = vld [vmem:[#allocation3 + $0xbe4] ss:$28 sps:$4 sm:$0xff]  }
 0x505   :  { %6102 = vmatpush1.bf16.msra.mxu0 %v8023_v3  ;;  %6060 = vmatprep.subr.bf16.mxu1 %v8028_v4 }
 0x506   :  { %6103 = vmatprep.subr.bf16.mxu0 %v8031_v5  ;;  %v8665_v5 = vrot.slane %v6398_v52, %v8547_v25 }
 0x508   :  { %6061 = vmatpush1.bf16.msra.mxu1 %v8026_v6  ;;  %v8668_v6 = vrot.slane %v6406_v59, %v8547_v25 }
 0x509   :  { %6104 = vmatpush1.bf16.msra.mxu0 %v8029_v7  ;;  %6062 = vmatprep.subr.bf16.mxu1 %v8034_v8  ;;  %v5780_v7 = vadd.f32 %v5779_v39, %v5736_v38  ;;  %v8086_v8 = vld [vmem:[#allocation3 + $0x860] ss:$28 sps:$4 sm:$0xff]  }
 0x50a   :  { %6105 = vmatprep.subr.bf16.mxu0 %v8037_v11  ;;  %v8089_v11 = vld [vmem:[#allocation3 + $0xbe0] ss:$28 sps:$4 sm:$0xff]  }
 0x50c   :  { %6063 = vmatpush2.bf16.msra.mxu1 %v8032_v12 }
 0x50d   :  { %6106 = vmatpush2.bf16.msra.mxu0 %v8035_v15  ;;  %6064 = vmatprep.subr.bf16.mxu1 %v8040_v16  ;;  %v8094_v16 = vld [vmem:[#allocation3 + $0x82c] ss:$28 sps:$4 sm:$0xff]  }
 0x50e   :  { %6107 = vmatprep.subr.bf16.mxu0 %v8043_v1  ;;  %v8097_v1 = vld [vmem:[#allocation3 + $0xbac] ss:$28 sps:$4 sm:$0xff]  }
 0x510   :  { %6065 = vmatpush2.bf16.msra.mxu1 %v8038_v17  ;;  %v5782_v17 = vadd.f32 %v5781_v46, %v5738_v45  ;;  %v8101_v45 = vld [vmem:[#allocation3 + $0xb70] ss:$28 sps:$4 sm:$0xff]   ;;  %v8106_v46 = vld [vmem:[#allocation3 + $0x7bc] ss:$28 sps:$4 sm:$0xff]  }
 0x511   :  { %6108 = vmatpush2.bf16.msra.mxu0 %v8041_v18  ;;  %6066 = vmatprep.subr.bf16.mxu1 %v8046_v19  ;;  %v5784_v18 = vadd.f32 %v5783_v55, %v5740_v54  ;;  %v8107_v54 = vld [vmem:[#allocation3 + $0xb38] ss:$28 sps:$4 sm:$0xff]   ;;  %v8112_v55 = vld [vmem:[#allocation3 + $0x784] ss:$28 sps:$4 sm:$0xff]  }
 0x512   :  { %6109 = vmatprep.subr.bf16.mxu0 %v8049_v20 }
 0x514   :  { %6067 = vmatpush2.bf16.msra.mxu1 %v8044_v21 }
 0x515   :  { %6110 = vmatpush2.bf16.msra.mxu0 %v8047_v22  ;;  %6068 = vmatprep.subr.bf16.mxu1 %v8052_v23  ;;  %v6440_v22 = vpack.i.b16 %v8665_v5, %v8665_v5  ;;  %v6447_v23 = vpack.i.b16 %v8668_v6, %v8668_v6 }
 0x516   :  { %6111 = vmatprep.subr.bf16.mxu0 %v8055_v26  ;;  %v5786_v26 = vadd.f32 %v5785_v62, %v5742_v61  ;;  %v8113_v61 = vld [vmem:[#allocation3 + $0xb00] ss:$28 sps:$4 sm:$0xff]   ;;  %v8118_v62 = vld [vmem:[#allocation3 + $0x74c] ss:$28 sps:$4 sm:$0xff]  }
 0x517   :  { %v6452_v39 = vrot.slane %v6447_v23, %v8551_v31  ;;  %v8140_v23 = vld [vmem:[#allocation3 + $0x9e8] ss:$28 sps:$4 sm:$0xff]  }
 0x518   :  { %6069 = vmatpush2.bf16.msra.mxu1 %v8050_v28 }
 0x519   :  { %6112 = vmatpush2.bf16.msra.mxu0 %v8053_v29  ;;  %6070 = vmatprep.subr.bf16.mxu1 %v8058_v30  ;;  %v8092_v30 = vld [vmem:[#allocation3 + $0x828] ss:$28 sps:$4 sm:$0xff]  }
 0x51a   :  { %6113 = vmatprep.subr.bf16.mxu0 %v8061_v9  ;;  %v8095_v9 = vld [vmem:[#allocation3 + $0xba8] ss:$28 sps:$4 sm:$0xff]  }
 0x51c   :  { %6071 = vmatpush2.bf16.msra.mxu1 %v8056_v32 }
 0x51d   :  { %6114 = vmatpush2.bf16.msra.mxu0 %v8059_v33  ;;  %6072 = vmatprep.subr.bf16.mxu1 %v8064_v34  ;;  %v8100_v33 = vld [vmem:[#allocation3 + $0x7f4] ss:$28 sps:$4 sm:$0xff]  }
 0x51e   :  { %6115 = vmatprep.subr.bf16.mxu0 %v8067_v35  ;;  %v8103_v34 = vld [vmem:[#allocation3 + $0xb74] ss:$28 sps:$4 sm:$0xff]  }
 0x520   :  { %6073 = vmatpush2.bf16.msra.mxu1 %v8062_v13 }
 0x521   :  { %6116 = vmatpush2.bf16.msra.mxu0 %v8065_v37  ;;  %6074 = vmatprep.subr.bf16.mxu1 %v8070_v14  ;;  %v6445_v14 = vrot.slane %v6440_v22, %v8551_v31  ;;  %v8145_v22 = vld [vmem:[#allocation3 + $0xd6c] ss:$28 sps:$4 sm:$0xff]  }
 0x522   :  { %6117 = vmatprep.subr.bf16.mxu0 %v8073_v40 }
 0x524   :  { %6075 = vmatpush2.bf16.msra.mxu1 %v8068_v41 }
 0x525   :  { %6118 = vmatpush2.bf16.msra.mxu0 %v8071_v42  ;;  %6076 = vmatprep.subr.bf16.mxu1 %v8076_v43  ;;  %v8098_v43 = vld [vmem:[#allocation3 + $0x7f0] ss:$28 sps:$4 sm:$0xff]  }
 0x526   :  { %6119 = vmatprep.subr.bf16.mxu0 %v8079_v47  ;;  %v8109_v47 = vld [vmem:[#allocation3 + $0xb3c] ss:$28 sps:$4 sm:$0xff]  }
 0x528   :  { %6077 = vmatpush2.bf16.msra.mxu1 %v8074_v49 }
 0x529   :  { %6120 = vmatpush2.bf16.msra.mxu0 %v8077_v51  ;;  %6132 = vmatprep.subr.bf16.mxu1 %v8082_v53  ;;  %v8104_v53 = vld [vmem:[#allocation3 + $0x7b8] ss:$28 sps:$4 sm:$0xff]  }
 0x52a   :  { %6175 = vmatprep.subr.bf16.mxu0 %v8085_v57  ;;  %v8115_v57 = vld [vmem:[#allocation3 + $0xb04] ss:$28 sps:$4 sm:$0xff]  }
 0x52b   :  { %v5822_v3 = vpop.f32.mrf.mxu1  ;;  %6079 = vmatmul.mubr.bf16.vlgmr.msra.gmra.mxu1 %v8606_v10 }
 0x52c   :  { %v5865_v4 = vpop.f32.mrf.mxu0  ;;  %6122 = vmatmul.mubr.bf16.vlgmr.msra.gmra.mxu0 %v8614_v56  ;;  %6133 = vmatpush1.bf16.msra.mxu1 %v8080_v0  ;;  %v5823_v19 = vadd.f32 %v5822_v3, %v5780_v7  ;;  %v8119_v3 = vld [vmem:[#allocation3 + $0xac8] ss:$28 sps:$4 sm:$0xff]   ;;  %v8127_v7 = vld [vmem:[#allocation3 + $0xa94] ss:$28 sps:$4 sm:$0xff]  }
 0x52d   :  { %6176 = vmatpush1.bf16.msra.mxu0 %v8083_v60  ;;  %v5824_v12 = vpop.f32.mrf.mxu1  ;;  %6134 = vmatprep.subr.bf16.mxu1 %v8088_v63  ;;  %v8110_v60 = vld [vmem:[#allocation3 + $0x780] ss:$28 sps:$4 sm:$0xff]   ;;  %v8121_v63 = vld [vmem:[#allocation3 + $0xacc] ss:$28 sps:$4 sm:$0xff]  }
 0x52e   :  { %v5867_v15 = vpop.f32.mrf.mxu0  ;;  %6177 = vmatprep.subr.bf16.mxu0 %v8091_v2  ;;  %6164 = vmatprep.mubr.bf16.mxu1 %v8630_v27  ;;  %v5825_v28 = vadd.f32 %v5824_v12, %v5782_v17  ;;  %v5866_v35 = vadd.f32 %v5865_v4, %v5823_v19  ;;  %v8116_v2 = vld [vmem:[#allocation3 + $0x748] ss:$28 sps:$4 sm:$0xff]   ;;  %v8124_v4 = vld [vmem:[#allocation3 + $0x714] ss:$28 sps:$4 sm:$0xff]   ;;  %v8130_v12 = vld [vmem:[#allocation3 + $0xa5c] ss:$28 sps:$4 sm:$0xff]  }
 0x52f   :  { %6207 = vmatprep.mubr.bf16.mxu0 %v8638_v50  ;;  %v5826_v20 = vpop.f32.mrf.mxu1  ;;  %v8136_v17 = vld [vmem:[#allocation3 + $0xa24] ss:$28 sps:$4 sm:$0xff]  }
 0x530   :  { %v5869_v21 = vpop.f32.mrf.mxu0  ;;  %v5827_v29 = vadd.f32 %v5826_v20, %v5784_v18  ;;  %6135 = vmatpush1.bf16.msra.mxu1 %v8086_v8  ;;  %v5868_v40 = vadd.f32 %v5867_v15, %v5825_v28  ;;  %v8122_v8 = vld [vmem:[#allocation3 + $0x710] ss:$28 sps:$4 sm:$0xff]   ;;  %v8133_v15 = vld [vmem:[#allocation3 + $0xddc] ss:$28 sps:$4 sm:$0xff]   ;;  %v8139_v18 = vld [vmem:[#allocation3 + $0xda4] ss:$28 sps:$4 sm:$0xff]  }
 0x531   :  { %6178 = vmatpush1.bf16.msra.mxu0 %v8089_v11  ;;  %v5828_v32 = vpop.f32.mrf.mxu1  ;;  %6136 = vmatprep.subr.bf16.mxu1 %v8094_v16  ;;  %v8125_v11 = vld [vmem:[#allocation3 + $0xa90] ss:$28 sps:$4 sm:$0xff]   ;;  %v8128_v16 = vld [vmem:[#allocation3 + $0xa58] ss:$28 sps:$4 sm:$0xff]   ;;  %v8134_v19 = vld [vmem:[#allocation3 + $0xa20] ss:$28 sps:$4 sm:$0xff]  }
 0x532   :  { %6179 = vmatprep.subr.bf16.mxu0 %v8097_v1  ;;  %v5870_v13 = vadd.f32 %v5869_v21, %v5827_v29  ;;  %v5829_v37 = vadd.f32 %v5828_v32, %v5786_v26  ;;  %v5871_v38 = vpop.f32.mrf.mxu0  ;;  %v8131_v1 = vld [vmem:[#allocation3 + $0xdd8] ss:$28 sps:$4 sm:$0xff]   ;;  %v8137_v20 = vld [vmem:[#allocation3 + $0xda0] ss:$28 sps:$4 sm:$0xff]   ;;  %v8142_v21 = vld [vmem:[#allocation3 + $0x9ec] ss:$28 sps:$4 sm:$0xff]  }
 0x533   :  { %v8143_v26 = vld [vmem:[#allocation3 + $0xd68] ss:$28 sps:$4 sm:$0xff]   ;;  %v8148_v28 = vld [vmem:[#allocation3 + $0x9b4] ss:$28 sps:$4 sm:$0xff]   ;;  %v8154_v32 = vld [vmem:[#allocation3 + $0x97c] ss:$28 sps:$4 sm:$0xff]  }
 0x534   :  { %v6382_v41 = vpack.c.bf16 %v5870_v13, %v5866_v35  ;;  %v5872_v42 = vadd.f32 %v5871_v38, %v5829_v37  ;;  %6137 = vmatpush1.bf16.msra.mxu1 %v8092_v30  ;;  %v8151_v29 = vld [vmem:[#allocation3 + $0xd34] ss:$28 sps:$4 sm:$0xff]   ;;  %v8160_v13 = vld [vmem:[#allocation3 + $0x944] ss:$28 sps:$4 sm:$0xff]  }
 0x535   :  { %6180 = vmatpush1.bf16.msra.mxu0 %v8095_v9  ;;  %6138 = vmatprep.subr.bf16.mxu1 %v8100_v33  ;;  %v8146_v30 = vld [vmem:[#allocation3 + $0x9b0] ss:$28 sps:$4 sm:$0xff]   ;;  %v8157_v33 = vld [vmem:[#allocation3 + $0xcfc] ss:$28 sps:$4 sm:$0xff]   ;;  %v8163_v37 = vld [vmem:[#allocation3 + $0xcc4] ss:$28 sps:$4 sm:$0xff]  }
 0x536   :  { %6181 = vmatprep.subr.bf16.mxu0 %v8103_v34  ;;  %v6383_v49 = vpack.c.bf16 %v5872_v42, %v5868_v40  ;;  %v6488_v51 = vadd.bf16 %v6445_v14, %v6382_v41  ;;  %v8149_v9 = vld [vmem:[#allocation3 + $0xd30] ss:$28 sps:$4 sm:$0xff]   ;;  %v8152_v34 = vld [vmem:[#allocation3 + $0x978] ss:$28 sps:$4 sm:$0xff]   ;;  %v8158_v14 = vld [vmem:[#allocation3 + $0x940] ss:$28 sps:$4 sm:$0xff]  }
 0x537   :  { %v8155_v35 = vld [vmem:[#allocation3 + $0xcf8] ss:$28 sps:$4 sm:$0xff]   ;;  %v8161_v38 = vld [vmem:[#allocation3 + $0xcc0] ss:$28 sps:$4 sm:$0xff]   ;;  %v8169_v40 = vld [vmem:[#allocation3 + $0xc8c] ss:$28 sps:$4 sm:$0xff]  }
 0x538   :  { %v6489_v52 = vadd.bf16 %v6452_v39, %v6383_v49  ;;  %6139 = vmatpush1.bf16.msra.mxu1 %v8098_v43  ;;  %v8166_v39 = vld [vmem:[#allocation3 + $0x90c] ss:$28 sps:$4 sm:$0xff]   ;;  %v8172_v43 = vld [vmem:[#allocation3 + $0x8d4] ss:$28 sps:$4 sm:$0xff]   ;;  %v8176_v49 = vld [vmem:[#allocation3 + $0x360] ss:$28 sps:$4 sm:$0xff]  }
 0x539   :  { %6182 = vmatpush1.bf16.msra.mxu0 %v8101_v45  ;;  %6140 = vmatprep.subr.bf16.mxu1 %v8106_v46  ;;  %v8164_v41 = vld [vmem:[#allocation3 + $0x908] ss:$28 sps:$4 sm:$0xff]   ;;  %v8175_v45 = vld [vmem:[#allocation3 + $0xc54] ss:$28 sps:$4 sm:$0xff]  }
 0x53a   :  { %6183 = vmatprep.subr.bf16.mxu0 %v8109_v47  ;;  %v7360_v59 = vcombine.low %v6488_v51, %v6489_v52  ;;  %v7364_v0 = vcombine.high %v6488_v51, %v6489_v52  ;;  %v8167_v42 = vld [vmem:[#allocation3 + $0xc88] ss:$28 sps:$4 sm:$0xff]   ;;  %v8170_v46 = vld [vmem:[#allocation3 + $0x8d0] ss:$28 sps:$4 sm:$0xff]   ;;  %v8177_v51 = vld [vmem:[#allocation3 + $0x6e0] ss:$28 sps:$4 sm:$0xff]  }
 0x53b   :  { %v8173_v47 = vld [vmem:[#allocation3 + $0xc50] ss:$28 sps:$4 sm:$0xff]   ;;  %v8178_v52 = vld [vmem:[#allocation3 + $0x1a0] ss:$28 sps:$4 sm:$0xff]  }
 0x53c   :  { %6532 = vst [vmem:[#allocation17] sm:$0xff] %v7360_v59  ;;  %6536 = vst [vmem:[#allocation17 + $0x1c] sm:$0xff] %v7364_v0  ;;  %6141 = vmatpush1.bf16.msra.mxu1 %v8104_v53  ;;  %v8179_v53 = vld [vmem:[#allocation3 + $0x520] ss:$28 sps:$4 sm:$0xff]   ;;  %v8183_v59 = vld [vmem:[#allocation3 + $0x4e8] ss:$28 sps:$4 sm:$0xff]  }
 0x53d   :  { %6184 = vmatpush1.bf16.msra.mxu0 %v8107_v54  ;;  %6142 = vmatprep.subr.bf16.mxu1 %v8112_v55  ;;  %v8180_v54 = vld [vmem:[#allocation3 + $0x328] ss:$28 sps:$4 sm:$0xff]   ;;  %v8184_v0 = vld [vmem:[#allocation3 + $0x2f0] ss:$28 sps:$4 sm:$0xff]  }
 0x53e   :  { %6185 = vmatprep.subr.bf16.mxu0 %v8115_v57  ;;  %v8181_v55 = vld [vmem:[#allocation3 + $0x6a8] ss:$28 sps:$4 sm:$0xff]  }
 0x53f   :  { %v8182_v57 = vld [vmem:[#allocation3 + $0x168] ss:$28 sps:$4 sm:$0xff]  }
 0x540   :  { %6143 = vmatpush1.bf16.msra.mxu1 %v8110_v60  ;;  %v8185_v60 = vld [vmem:[#allocation3 + $0x670] ss:$28 sps:$4 sm:$0xff]  }
 0x541   :  { %6186 = vmatpush1.bf16.msra.mxu0 %v8113_v61  ;;  %6144 = vmatprep.subr.bf16.mxu1 %v8118_v62  ;;  %v8186_v61 = vld [vmem:[#allocation3 + $0x130] ss:$28 sps:$4 sm:$0xff]  }
 0x542   :  { %6187 = vmatprep.subr.bf16.mxu0 %v8121_v63  ;;  %v8187_v62 = vld [vmem:[#allocation3 + $0x4b0] ss:$28 sps:$4 sm:$0xff]   ;;  %v8188_v63 = vld [vmem:[#allocation3 + $0x2b8] ss:$28 sps:$4 sm:$0xff]  }
 0x544   :  { %6145 = vmatpush1.bf16.msra.mxu1 %v8116_v2  ;;  %v8189_v2 = vld [vmem:[#allocation3 + $0x638] ss:$28 sps:$4 sm:$0xff]  }
 0x545   :  { %6188 = vmatpush1.bf16.msra.mxu0 %v8119_v3  ;;  %6146 = vmatprep.subr.bf16.mxu1 %v8124_v4  ;;  %v8190_v3 = vld [vmem:[#allocation3 + $0xf8] ss:$28 sps:$4 sm:$0xff]  }
 0x546   :  { %6189 = vmatprep.subr.bf16.mxu0 %v8127_v7  ;;  %v8191_v4 = vld [vmem:[#allocation3 + $0x478] ss:$28 sps:$4 sm:$0xff]   ;;  %v8192_v7 = vld [vmem:[#allocation3 + $0x280] ss:$28 sps:$4 sm:$0xff]  }
 0x548   :  { %6147 = vmatpush1.bf16.msra.mxu1 %v8122_v8  ;;  %v8193_v8 = vld [vmem:[#allocation3 + $0x600] ss:$28 sps:$4 sm:$0xff]  }
 0x549   :  { %6190 = vmatpush1.bf16.msra.mxu0 %v8125_v11  ;;  %6148 = vmatprep.subr.bf16.mxu1 %v8130_v12  ;;  %v8196_v11 = vld [vmem:[#allocation3 + $0x248] ss:$28 sps:$4 sm:$0xff]  }
 0x54a   :  { %6191 = vmatprep.subr.bf16.mxu0 %v8133_v15  ;;  %v8197_v12 = vld [vmem:[#allocation3 + $0x5c8] ss:$28 sps:$4 sm:$0xff]  }
 0x54b   :  { %v8198_v15 = vld [vmem:[#allocation3 + $0x88] ss:$28 sps:$4 sm:$0xff]  }
 0x54c   :  { %6149 = vmatpush2.bf16.msra.mxu1 %v8128_v16  ;;  %v8199_v16 = vld [vmem:[#allocation3 + $0x408] ss:$28 sps:$4 sm:$0xff]  }
 0x54d   :  { %6192 = vmatpush2.bf16.msra.mxu0 %v8131_v1  ;;  %6150 = vmatprep.subr.bf16.mxu1 %v8136_v17  ;;  %v8200_v1 = vld [vmem:[#allocation3 + $0x210] ss:$28 sps:$4 sm:$0xff]  }
 0x54e   :  { %6193 = vmatprep.subr.bf16.mxu0 %v8139_v18  ;;  %v8201_v17 = vld [vmem:[#allocation3 + $0x590] ss:$28 sps:$4 sm:$0xff]  }
 0x54f   :  { %v8202_v18 = vld [vmem:[#allocation3 + $0x50] ss:$28 sps:$4 sm:$0xff]  }
 0x550   :  { %6151 = vmatpush2.bf16.msra.mxu1 %v8134_v19  ;;  %v8203_v19 = vld [vmem:[#allocation3 + $0x3d0] ss:$28 sps:$4 sm:$0xff]  }
 0x551   :  { %6194 = vmatpush2.bf16.msra.mxu0 %v8137_v20  ;;  %6152 = vmatprep.subr.bf16.mxu1 %v8142_v21  ;;  %v8204_v20 = vld [vmem:[#allocation3 + $0x1d8] ss:$28 sps:$4 sm:$0xff]  }
 0x552   :  { %6195 = vmatprep.subr.bf16.mxu0 %v8145_v22  ;;  %v8205_v21 = vld [vmem:[#allocation3 + $0x558] ss:$28 sps:$4 sm:$0xff]  }
 0x553   :  { %v8206_v22 = vld [vmem:[#allocation3 + $0x18] ss:$28 sps:$4 sm:$0xff]  }
 0x554   :  { %6153 = vmatpush2.bf16.msra.mxu1 %v8140_v23  ;;  %v8207_v23 = vld [vmem:[#allocation3 + $0x398] ss:$28 sps:$4 sm:$0xff]  }
 0x555   :  { %6196 = vmatpush2.bf16.msra.mxu0 %v8143_v26  ;;  %6154 = vmatprep.subr.bf16.mxu1 %v8148_v28  ;;  %v8208_v26 = vld [vmem:[#allocation3 + $0xa60] ss:$28 sps:$4 sm:$0xff]  }
 0x556   :  { %6197 = vmatprep.subr.bf16.mxu0 %v8151_v29  ;;  %v8209_v28 = vld [vmem:[#allocation3 + $0xde0] ss:$28 sps:$4 sm:$0xff]  }
 0x557   :  { %v8210_v29 = vld [vmem:[#allocation3 + $0x8a0] ss:$28 sps:$4 sm:$0xff]  }
 0x558   :  { %6155 = vmatpush2.bf16.msra.mxu1 %v8146_v30  ;;  %v8211_v30 = vld [vmem:[#allocation3 + $0xc20] ss:$28 sps:$4 sm:$0xff]  }
 0x559   :  { %6198 = vmatpush2.bf16.msra.mxu0 %v8149_v9  ;;  %6156 = vmatprep.subr.bf16.mxu1 %v8154_v32  ;;  %v8212_v9 = vld [vmem:[#allocation3 + $0xa28] ss:$28 sps:$4 sm:$0xff]  }
 0x55a   :  { %6199 = vmatprep.subr.bf16.mxu0 %v8157_v33  ;;  %v8213_v32 = vld [vmem:[#allocation3 + $0xda8] ss:$28 sps:$4 sm:$0xff]  }
 0x55b   :  { %v8214_v33 = vld [vmem:[#allocation3 + $0x868] ss:$28 sps:$4 sm:$0xff]  }
 0x55c   :  { %6157 = vmatpush2.bf16.msra.mxu1 %v8152_v34  ;;  %v8215_v34 = vld [vmem:[#allocation3 + $0xbe8] ss:$28 sps:$4 sm:$0xff]  }
 0x55d   :  { %6200 = vmatpush2.bf16.msra.mxu0 %v8155_v35  ;;  %6158 = vmatprep.subr.bf16.mxu1 %v8160_v13  ;;  %v8216_v35 = vld [vmem:[#allocation3 + $0x9f0] ss:$28 sps:$4 sm:$0xff]  }
 0x55e   :  { %6201 = vmatprep.subr.bf16.mxu0 %v8163_v37  ;;  %v8217_v13 = vld [vmem:[#allocation3 + $0xd70] ss:$28 sps:$4 sm:$0xff]  }
 0x55f   :  { %v8218_v37 = vld [vmem:[#allocation3 + $0x830] ss:$28 sps:$4 sm:$0xff]  }
 0x560   :  { %6159 = vmatpush2.bf16.msra.mxu1 %v8158_v14  ;;  %v8219_v14 = vld [vmem:[#allocation3 + $0xbb0] ss:$28 sps:$4 sm:$0xff]  }
 0x561   :  { %6202 = vmatpush2.bf16.msra.mxu0 %v8161_v38  ;;  %6160 = vmatprep.subr.bf16.mxu1 %v8166_v39  ;;  %v8222_v38 = vld [vmem:[#allocation3 + $0x7f8] ss:$28 sps:$4 sm:$0xff]  }
 0x562   :  { %6203 = vmatprep.subr.bf16.mxu0 %v8169_v40  ;;  %v8223_v39 = vld [vmem:[#allocation3 + $0xb78] ss:$28 sps:$4 sm:$0xff]   ;;  %v8224_v40 = vld [vmem:[#allocation3 + $0x980] ss:$28 sps:$4 sm:$0xff]  }
 0x564   :  { %6161 = vmatpush2.bf16.msra.mxu1 %v8164_v41  ;;  %v8225_v41 = vld [vmem:[#allocation3 + $0xd00] ss:$28 sps:$4 sm:$0xff]  }
 0x565   :  { %6204 = vmatpush2.bf16.msra.mxu0 %v8167_v42  ;;  %6162 = vmatprep.subr.bf16.mxu1 %v8172_v43  ;;  %v8228_v42 = vld [vmem:[#allocation3 + $0x948] ss:$28 sps:$4 sm:$0xff]  }
 0x566   :  { %6205 = vmatprep.subr.bf16.mxu0 %v8175_v45  ;;  %v8229_v43 = vld [vmem:[#allocation3 + $0xcc8] ss:$28 sps:$4 sm:$0xff]  }
 0x567   :  { %v8230_v45 = vld [vmem:[#allocation3 + $0x788] ss:$28 sps:$4 sm:$0xff]  }
 0x568   :  { %6163 = vmatpush2.bf16.msra.mxu1 %v8170_v46  ;;  %v8231_v46 = vld [vmem:[#allocation3 + $0xb08] ss:$28 sps:$4 sm:$0xff]  }
 0x569   :  { %6206 = vmatpush2.bf16.msra.mxu0 %v8173_v47  ;;  %7370 = vmatprep.subr.bf16.mxu1 %v8176_v49 }
 0x56a   :  { %7392 = vmatprep.subr.bf16.mxu0 %v8177_v51  ;;  %v8232_v51 = vld [vmem:[#allocation3 + $0x910] ss:$28 sps:$4 sm:$0xff]  }
 0x56b   :  { %6165 = vmatmul.mubr.bf16.vlgmr.msra.gmra.mxu1 %v8627_v24  ;;  %v5908_v47 = vpop.f32.mrf.mxu1 }
 0x56c   :  { %6208 = vmatmul.mubr.bf16.vlgmr.msra.gmra.mxu0 %v8635_v48  ;;  %7371 = vmatpush3.bf16.msra.mxu1 %v8178_v52  ;;  %v5951_v49 = vpop.f32.mrf.mxu0  ;;  %v8233_v52 = vld [vmem:[#allocation3 + $0xc90] ss:$28 sps:$4 sm:$0xff]  }
 0x56d   :  { %7393 = vmatpush3.bf16.msra.mxu0 %v8179_v53  ;;  %7372 = vmatprep.subr.bf16.mxu1 %v8180_v54  ;;  %v8234_v53 = vld [vmem:[#allocation3 + $0x750] ss:$28 sps:$4 sm:$0xff]  }
 0x56e   :  { %7394 = vmatprep.subr.bf16.mxu0 %v8181_v55  ;;  %6250 = vmatprep.mubr.bf16.mxu1 %v8609_v36  ;;  %v8194_v36 = vld [vmem:[#allocation3 + $0xc0] ss:$28 sps:$4 sm:$0xff]   ;;  %v8235_v54 = vld [vmem:[#allocation3 + $0xad0] ss:$28 sps:$4 sm:$0xff]   ;;  %v5910_v55 = vpop.f32.mrf.mxu1 }
 0x56f   :  { %6291 = vmatprep.mubr.bf16.mxu0 %v8617_v58  ;;  %v8195_v58 = vld [vmem:[#allocation3 + $0x440] ss:$28 sps:$4 sm:$0xff]  }
 0x570   :  { %7373 = vmatpush3.bf16.msra.mxu1 %v8182_v57  ;;  %v5953_v57 = vpop.f32.mrf.mxu0 }
 0x571   :  { %7395 = vmatpush3.bf16.msra.mxu0 %v8183_v59  ;;  %7374 = vmatprep.subr.bf16.mxu1 %v8184_v0  ;;  %v8236_v59 = vld [vmem:[#allocation3 + $0x8d8] ss:$28 sps:$4 sm:$0xff]  }
 0x572   :  { %7396 = vmatprep.subr.bf16.mxu0 %v8185_v60  ;;  %v8237_v0 = vld [vmem:[#allocation3 + $0xc58] ss:$28 sps:$4 sm:$0xff]  }
 0x573   :  { %v8238_v60 = vld [vmem:[#allocation3 + $0x718] ss:$28 sps:$4 sm:$0xff]  }
 0x574   :  { %7375 = vmatpush3.bf16.msra.mxu1 %v8186_v61  ;;  %v8239_v61 = vld [vmem:[#allocation3 + $0xa98] ss:$28 sps:$4 sm:$0xff]  }
 0x575   :  { %7397 = vmatpush3.bf16.msra.mxu0 %v8187_v62  ;;  %7376 = vmatprep.subr.bf16.mxu1 %v8188_v63  ;;  %v5912_v62 = vpop.f32.mrf.mxu1  ;;  %v5955_v63 = vpop.f32.mrf.mxu0 }
 0x576   :  { %7398 = vmatprep.subr.bf16.mxu0 %v8189_v2 }
 0x577   :  { %v5914_v2 = vpop.f32.mrf.mxu1 }
 0x578   :  { %7377 = vmatpush3.bf16.msra.mxu1 %v8190_v3  ;;  %v5957_v3 = vpop.f32.mrf.mxu0 }
 0x579   :  { %7399 = vmatpush3.bf16.msra.mxu0 %v8191_v4  ;;  %7378 = vmatprep.subr.bf16.mxu1 %v8192_v7 }
 0x57a   :  { %7400 = vmatprep.subr.bf16.mxu0 %v8193_v8  ;;  %v6436_v8 = vcombine.high %v8665_v5, %v8665_v5 }
 0x57c   :  { %7379 = vmatpush3.bf16.msra.mxu1 %v8194_v36  ;;  %v5952_v36 = vadd.f32 %v5951_v49, %v5908_v47 }
 0x57d   :  { %7401 = vmatpush3.bf16.msra.mxu0 %v8195_v58  ;;  %7380 = vmatprep.subr.bf16.mxu1 %v8196_v11  ;;  %v6438_v58 = vcombine.high %v8668_v6, %v8668_v6 }
 0x57e   :  { %7402 = vmatprep.subr.bf16.mxu0 %v8197_v12 }
 0x580   :  { %7381 = vmatpush3.bf16.msra.mxu1 %v8198_v15  ;;  %v5954_v15 = vadd.f32 %v5953_v57, %v5910_v55 }
 0x581   :  { %7403 = vmatpush3.bf16.msra.mxu0 %v8199_v16  ;;  %7382 = vmatprep.subr.bf16.mxu1 %v8200_v1  ;;  %v5956_v16 = vadd.f32 %v5955_v63, %v5912_v62 }
 0x582   :  { %7404 = vmatprep.subr.bf16.mxu0 %v8201_v17 }
 0x584   :  { %7383 = vmatpush3.bf16.msra.mxu1 %v8202_v18 }
 0x585   :  { %7405 = vmatpush3.bf16.msra.mxu0 %v8203_v19  ;;  %7384 = vmatprep.subr.bf16.mxu1 %v8204_v20  ;;  %v6454_v19 = vpack.i.b16 %v6436_v8, %v6436_v8  ;;  %v5958_v20 = vadd.f32 %v5957_v3, %v5914_v2 }
 0x586   :  { %7406 = vmatprep.subr.bf16.mxu0 %v8205_v21 }
 0x588   :  { %7385 = vmatpush3.bf16.msra.mxu1 %v8206_v22  ;;  %v6461_v22 = vpack.i.b16 %v6438_v58, %v6438_v58 }
 0x589   :  { %7407 = vmatpush3.bf16.msra.mxu0 %v8207_v23  ;;  %7414 = vmatprep.subr.bf16.mxu1 %v8208_v26 }
 0x58a   :  { %7436 = vmatprep.subr.bf16.mxu0 %v8209_v28  ;;  %v6459_v28 = vrot.slane %v6454_v19, %v8551_v31 }
 0x58b   :  { %6251 = vmatmul.mubr.bf16.vlgmr.msra.gmra.mxu1 %v8606_v10  ;;  %v8220_v10 = vld [vmem:[#allocation3 + $0x9b8] ss:$28 sps:$4 sm:$0xff]  }
 0x58c   :  { %6292 = vmatmul.mubr.bf16.vlgmr.msra.gmra.mxu0 %v8614_v56  ;;  %7415 = vmatpush3.bf16.msra.mxu1 %v8210_v29  ;;  %v8221_v56 = vld [vmem:[#allocation3 + $0xd38] ss:$28 sps:$4 sm:$0xff]  }
 0x58d   :  { %7437 = vmatpush3.bf16.msra.mxu0 %v8211_v30  ;;  %7416 = vmatprep.subr.bf16.mxu1 %v8212_v9 }
 0x58e   :  { %7438 = vmatprep.subr.bf16.mxu0 %v8213_v32  ;;  %6332 = vmatprep.mubr.bf16.mxu1 %v8630_v27  ;;  %v8226_v27 = vld [vmem:[#allocation3 + $0x7c0] ss:$28 sps:$4 sm:$0xff]   ;;  %v6466_v32 = vrot.slane %v6461_v22, %v8551_v31 }
 0x58f   :  { %6373 = vmatprep.mubr.bf16.mxu0 %v8638_v50  ;;  %v8227_v50 = vld [vmem:[#allocation3 + $0xb40] ss:$28 sps:$4 sm:$0xff]  }
 0x590   :  { %7417 = vmatpush3.bf16.msra.mxu1 %v8214_v33 }
 0x591   :  { %7439 = vmatpush3.bf16.msra.mxu0 %v8215_v34  ;;  %7418 = vmatprep.subr.bf16.mxu1 %v8216_v35 }
 0x592   :  { %7440 = vmatprep.subr.bf16.mxu0 %v8217_v13 }
 0x594   :  { %7419 = vmatpush3.bf16.msra.mxu1 %v8218_v37 }
 0x595   :  { %7441 = vmatpush3.bf16.msra.mxu0 %v8219_v14  ;;  %7420 = vmatprep.subr.bf16.mxu1 %v8220_v10 }
 0x596   :  { %7442 = vmatprep.subr.bf16.mxu0 %v8221_v56  ;;  %v6391_v56 = vcombine.high %v8658_v44, %v8658_v44 }
 0x598   :  { %7421 = vmatpush3.bf16.msra.mxu1 %v8222_v38 }
 0x599   :  { %7443 = vmatpush3.bf16.msra.mxu0 %v8223_v39  ;;  %7422 = vmatprep.subr.bf16.mxu1 %v8224_v40  ;;  %v6405_v40 = vrot.slane %v6391_v56, %v8547_v25 }
 0x59a   :  { %7444 = vmatprep.subr.bf16.mxu0 %v8225_v41 }
 0x59b   :  { %v6421_v47 = vrot.slane %v6405_v40, %v8547_v25 }
 0x59c   :  { %7423 = vmatpush3.bf16.msra.mxu1 %v8226_v27 }
 0x59d   :  { %7445 = vmatpush3.bf16.msra.mxu0 %v8227_v50  ;;  %7424 = vmatprep.subr.bf16.mxu1 %v8228_v42  ;;  %v6407_v50 = vcombine.high %v6405_v40, %v6405_v40 }
 0x59e   :  { %7446 = vmatprep.subr.bf16.mxu0 %v8229_v43 }
 0x5a0   :  { %7425 = vmatpush3.bf16.msra.mxu1 %v8230_v45 }
 0x5a1   :  { %7447 = vmatpush3.bf16.msra.mxu0 %v8231_v46  ;;  %7426 = vmatprep.subr.bf16.mxu1 %v8232_v51  ;;  %v6435_v51 = vrot.slane %v6407_v50, %v8547_v25 }
 0x5a2   :  { %7448 = vmatprep.subr.bf16.mxu0 %v8233_v52 }
 0x5a3   :  { %v6475_v63 = vpack.i.b16 %v6435_v51, %v6435_v51 }
 0x5a4   :  { %7427 = vmatpush3.bf16.msra.mxu1 %v8234_v53 }
 0x5a5   :  { %7449 = vmatpush3.bf16.msra.mxu0 %v8235_v54  ;;  %7428 = vmatprep.subr.bf16.mxu1 %v8236_v59 }
 0x5a6   :  { %7450 = vmatprep.subr.bf16.mxu0 %v8237_v0  ;;  %v6468_v0 = vpack.i.b16 %v6421_v47, %v6421_v47 }
 0x5a8   :  { %7429 = vmatpush3.bf16.msra.mxu1 %v8238_v60  ;;  %v6473_v8 = vrot.slane %v6468_v0, %v8551_v31 }
 0x5a9   :  { %7451 = vmatpush3.bf16.msra.mxu0 %v8239_v61 }
 0x5ab   :  { %v5994_v4 = vpop.f32.mrf.mxu1  ;;  %6333 = vmatmul.mubr.bf16.vlgmr.msra.gmra.mxu1 %v8627_v24 }
 0x5ac   :  { %v6037_v7 = vpop.f32.mrf.mxu0  ;;  %6374 = vmatmul.mubr.bf16.vlgmr.msra.gmra.mxu0 %v8635_v48  ;;  %v5995_v1 = vadd.f32 %v5994_v4, %v5952_v36 }
 0x5ad   :  { %v5996_v11 = vpop.f32.mrf.mxu1 }
 0x5ae   :  { %v6039_v12 = vpop.f32.mrf.mxu0  ;;  %v5997_v21 = vadd.f32 %v5996_v11, %v5954_v15  ;;  %v6038_v23 = vadd.f32 %v6037_v7, %v5995_v1 }
 0x5af   :  { %v5998_v17 = vpop.f32.mrf.mxu1 }
 0x5b0   :  { %v6041_v18 = vpop.f32.mrf.mxu0  ;;  %v5999_v24 = vadd.f32 %v5998_v17, %v5956_v16  ;;  %v6040_v6 = vadd.f32 %v6039_v12, %v5997_v21  ;;  %v6480_v12 = vrot.slane %v6475_v63, %v8551_v31 }
 0x5b1   :  { %v6000_v48 = vpop.f32.mrf.mxu1 }
 0x5b2   :  { %v6042_v26 = vadd.f32 %v6041_v18, %v5999_v24  ;;  %v6001_v5 = vadd.f32 %v6000_v48, %v5958_v20  ;;  %v6043_v29 = vpop.f32.mrf.mxu0 }
 0x5b4   :  { %v6384_v30 = vpack.c.bf16 %v6042_v26, %v6038_v23  ;;  %v6044_v9 = vadd.f32 %v6043_v29, %v6001_v5 }
 0x5b6   :  { %v6385_v33 = vpack.c.bf16 %v6044_v9, %v6040_v6  ;;  %v6490_v34 = vadd.bf16 %v6459_v28, %v6384_v30 }
 0x5b8   :  { %v6491_v35 = vadd.bf16 %v6466_v32, %v6385_v33 }
 0x5ba   :  { %v7361_v13 = vcombine.low %v6490_v34, %v6491_v35  ;;  %v7365_v37 = vcombine.high %v6490_v34, %v6491_v35  ;;  %v6437_v35 = vcombine.high %v6421_v47, %v6421_v47 }
 0x5bc   :  { %6533 = vst [vmem:[#allocation17 + $0x8] sm:$0xff] %v7361_v13  ;;  %6537 = vst [vmem:[#allocation17 + $0x24] sm:$0xff] %v7365_v37 }
 0x5eb   :  { %v6080_v14 = vpop.f32.mrf.mxu1 }
 0x5ec   :  { %v6123_v10 = vpop.f32.mrf.mxu0 }
 0x5ed   :  { %v6082_v38 = vpop.f32.mrf.mxu1  ;;  %v6124_v49 = vadd.f32 %v6123_v10, %v6080_v14 }
 0x5ee   :  { %v6125_v39 = vpop.f32.mrf.mxu0 }
 0x5ef   :  { %v6084_v41 = vpop.f32.mrf.mxu1  ;;  %v6126_v54 = vadd.f32 %v6125_v39, %v6082_v38 }
 0x5f0   :  { %v6127_v27 = vpop.f32.mrf.mxu0 }
 0x5f1   :  { %v6086_v42 = vpop.f32.mrf.mxu1  ;;  %v6128_v44 = vadd.f32 %v6127_v27, %v6084_v41  ;;  %v6482_v41 = vpack.i.b16 %v6437_v35, %v6437_v35 }
 0x5f2   :  { %v6129_v43 = vpop.f32.mrf.mxu0 }
 0x5f3   :  { %v6130_v60 = vadd.f32 %v6129_v43, %v6086_v42 }
 0x62b   :  { %v6166_v45 = vpop.f32.mrf.mxu1 }
 0x62c   :  { %v6209_v46 = vpop.f32.mrf.mxu0  ;;  %v6167_v55 = vadd.f32 %v6166_v45, %v6124_v49 }
 0x62d   :  { %v6168_v52 = vpop.f32.mrf.mxu1 }
 0x62e   :  { %v6211_v53 = vpop.f32.mrf.mxu0  ;;  %v6169_v61 = vadd.f32 %v6168_v52, %v6126_v54  ;;  %v6210_v3 = vadd.f32 %v6209_v46, %v6167_v55  ;;  %v6487_v46 = vrot.slane %v6482_v41, %v8551_v31 }
 0x62f   :  { %v6170_v57 = vpop.f32.mrf.mxu1 }
 0x630   :  { %v6213_v59 = vpop.f32.mrf.mxu0  ;;  %v6171_v62 = vadd.f32 %v6170_v57, %v6128_v44  ;;  %v6212_v25 = vadd.f32 %v6211_v53, %v6169_v61 }
 0x631   :  { %v6172_v2 = vpop.f32.mrf.mxu1 }
 0x632   :  { %v6214_v4 = vadd.f32 %v6213_v59, %v6171_v62  ;;  %v6173_v7 = vadd.f32 %v6172_v2, %v6130_v60  ;;  %v6215_v36 = vpop.f32.mrf.mxu0 }
 0x634   :  { %v6386_v58 = vpack.c.bf16 %v6214_v4, %v6210_v3  ;;  %v6216_v11 = vadd.f32 %v6215_v36, %v6173_v7 }
 0x636   :  { %v6387_v15 = vpack.c.bf16 %v6216_v11, %v6212_v25  ;;  %v6492_v16 = vadd.bf16 %v6473_v8, %v6386_v58 }
 0x638   :  { %v6493_v1 = vadd.bf16 %v6480_v12, %v6387_v15 }
 0x63a   :  { %v7362_v17 = vcombine.low %v6492_v16, %v6493_v1  ;;  %v7366_v18 = vcombine.high %v6492_v16, %v6493_v1 }
 0x63c   :  { %6534 = vst [vmem:[#allocation17 + $0x10] sm:$0xff] %v7362_v17  ;;  %6538 = vst [vmem:[#allocation17 + $0x2c] sm:$0xff] %v7366_v18 }
 0x64b   :  { %v7386_v19 = vpop.f32.mrf.mxu1 }
 0x64c   :  { %v7408_v20 = vpop.f32.mrf.mxu0 }
 0x64d   :  { %v7387_v21 = vpop.f32.mrf.mxu1 }
 0x64e   :  { %v7409_v24 = vpop.f32.mrf.mxu0  ;;  %v7388_v29 = vadd.f32 %v7387_v21, %v7386_v19 }
 0x64f   :  { %v7389_v22 = vpop.f32.mrf.mxu1  ;;  %v7410_v6 = vadd.f32 %v7409_v24, %v7408_v20 }
 0x650   :  { %v7411_v48 = vpop.f32.mrf.mxu0 }
 0x651   :  { %v7390_v23 = vpop.f32.mrf.mxu1  ;;  %v6294_v14 = vadd.f32 %v7410_v6, %v7388_v29 }
 0x652   :  { %v7412_v26 = vpop.f32.mrf.mxu0  ;;  %v7391_v32 = vadd.f32 %v7390_v23, %v7389_v22 }
 0x653   :  { %v7413_v33 = vadd.f32 %v7412_v26, %v7411_v48 }
 0x655   :  { %v6297_v38 = vadd.f32 %v7413_v33, %v7391_v32 }
 0x66b   :  { %v7430_v5 = vpop.f32.mrf.mxu1 }
 0x66c   :  { %v7452_v28 = vpop.f32.mrf.mxu0 }
 0x66d   :  { %v7431_v30 = vpop.f32.mrf.mxu1 }
 0x66e   :  { %v7453_v9 = vpop.f32.mrf.mxu0  ;;  %v7432_v34 = vadd.f32 %v7431_v30, %v7430_v5 }
 0x66f   :  { %v7433_v13 = vpop.f32.mrf.mxu1  ;;  %v7454_v27 = vadd.f32 %v7453_v9, %v7452_v28 }
 0x670   :  { %v7455_v37 = vpop.f32.mrf.mxu0  ;;  %v6335_v39 = vadd.f32 %v7432_v34, %v6294_v14 }
 0x671   :  { %v7434_v10 = vpop.f32.mrf.mxu1 }
 0x672   :  { %v7456_v56 = vpop.f32.mrf.mxu0  ;;  %v7435_v40 = vadd.f32 %v7434_v10, %v7433_v13  ;;  %v6376_v43 = vadd.f32 %v7454_v27, %v6335_v39 }
 0x673   :  { %v7457_v42 = vadd.f32 %v7456_v56, %v7455_v37 }
 0x674   :  { %v6338_v50 = vadd.f32 %v7435_v40, %v6297_v38 }
 0x676   :  { %v6379_v45 = vadd.f32 %v7457_v42, %v6338_v50 }
 0x678   :  { %v6388_v49 = vpack.c.bf16 %v6379_v45, %v6376_v43 }
 0x67a   :  { %v6494_v47 = vadd.bf16 %v6487_v46, %v6388_v49 }
 0x67c   :  { %v7363_v51 = vcombine.low %v6494_v47, %v6494_v47  ;;  %v7367_v52 = vcombine.high %v6494_v47, %v6494_v47 }
 0x67e   :  { %6535 = vst [vmem:[#allocation17 + $0x18] sm:$0xf] %v7363_v51  ;;  %6539 = vst [vmem:[#allocation17 + $0x34] sm:$0xf] %v7367_v52 }
 0x67f   :  { %8432 = shalt.err (!%p8429_p7)
}
 0x680   :  { %s8473_s11 = smov 448   ;;  %s8474_s12 = smov 28  }
 0x681   :  { %6551 = dma.vmem_to_hbm [thread:$0]  %s6546_s7, 896, %s8714_s9, [#allocation7], %s8473_s11, %s8473_s11, %s8474_s12  }
 0x682   :  { %8453 = dma.done.wait [#allocation7], 896  }
 0x683   :  { %8454 = vsyncadd [#allocation7], 4294966400 }
 0x684   :  { %6555 = vsyncpa [#allocation6], 1 }
 0x685   :  { %6556 = vsyncpa [#allocation9], 1 }
 0x686   :  { %6557 = vsyncpa [#allocation12], 1 }
 0x687   :  { %6558 = vsyncpa [#allocation15], 1 }
 0x688   :  { %6559 = vsyncpa [#allocation7], 1 }
 0x689   :  { %6560 = vsyncmov [#allocation4] }
 0x68c   :  { %s6561_s15 = vpop.sfrf %6560 }
 0x68d   :  { %p7368_p8 = scmp.ne.s32.totalorder %s6561_s15, 0 }
 0x68f   :  { %6565 = shalt.err (%p7368_p8)  }
 0x690   :  { %6567 = vsyncmov [#allocation4 + $0x1] }
 0x693   :  { %s6568_s6 = vpop.sfrf %6567 }
 0x694   :  { %p7369_p9 = scmp.ne.s32.totalorder %s6568_s6, 0 }
 0x696   :  { %6572 = shalt.err (%p7369_p9)  }

</bundles_post_ra>
